<compile_context>
chip_gen: v7x
topology: tpu7x:2x2x1
jax: 0.10.0
libtpu: 0.0.40
codegen_flags: <defaults>
</compile_context>

<pallas_src>
import functools

import jax
import jax.numpy as jnp
import numpy as np
from jax import lax
from jax.experimental import pallas as pl
from jax.experimental.pallas import tpu as pltpu

# --- constants implied by the module -----------------------------------------
N_SQUARES = 64
N_PIECE_CLASSES = 13
PIECE_RANGE = N_SQUARES * N_PIECE_CLASSES          # 832
TURN_OFF = PIECE_RANGE                              # 832 (1 logit)
CASTLE_OFF = TURN_OFF + 1                           # 833 (4 logits)
EP_OFF = CASTLE_OFF + 4                             # 837 (65 logits)
CLOCK_OFF = EP_OFF + 65                             # 902 (2 values)
SIZE = CLOCK_OFF + 2                                # 904
TAIL_SIZE = SIZE - PIECE_RANGE                      # 72

WHITE_PAWN_IDX = 1
BLACK_PAWN_IDX = 7

# rows inside the repacked (72, B) tail slab: [ ep(65) | turn(1) | cast(4) | clk(2) ]
# (EP first so the 65-row softmax slice starts at a sublane-aligned offset 0)
R_EP, R_TURN, R_CAST, R_CLK = 0, 65, 66, 70


# --- math helpers --------------------------------------------------------------
def _softplus(x):
    # numerically stable softplus
    return jnp.maximum(x, 0.0) + jnp.log(1.0 + jnp.exp(-jnp.abs(x)))


def _logsumexp_last(x):
    m = jnp.max(x, axis=-1, keepdims=True)
    return (m + jnp.log(jnp.sum(jnp.exp(x - m), axis=-1, keepdims=True)))[..., 0]


def _softmax_last(x):
    m = jnp.max(x, axis=-1, keepdims=True)
    e = jnp.exp(x - m)
    return e / jnp.sum(e, axis=-1, keepdims=True)


def _argmax_onehot_last(x):
    ids = lax.broadcasted_iota(jnp.int32, x.shape, x.ndim - 1)
    mx = jnp.max(x, axis=-1, keepdims=True)
    big = jnp.int32(2 ** 30)
    idx = jnp.min(jnp.where(x == mx, ids, big), axis=-1, keepdims=True)
    return (ids == idx).astype(x.dtype)


# --- the Pallas kernel ----------------------------------------------------------
def board_loss_kernel(po_ref, pt_ref, to_ref, tt_ref, pw_ref, pv_ref, out_ref,
                      *, total_b, block_b, padded):
    f32 = jnp.float32
    po = po_ref[...]                               # (13, 64, bb) piece logits
    pt = pt_ref[...]                               # (13, 64, bb) one-hot targets
    to = to_ref[...]                               # (72, bb) tail outputs
    tt = tt_ref[...]                               # (72, bb) tail targets
    pw = pw_ref[...]                               # (13, 64) pieces_weight / per-square norm
    pv = pv_ref[...]                               # (72, 2) packed small params
    bb = po.shape[2]

    # per-board validity mask (1, bb): only emitted when the batch was padded.
    if padded:
        lane = lax.broadcasted_iota(jnp.int32, (1, bb), 1)
        valid = (pl.program_id(0) * block_b + lane < total_b).astype(f32)

        def vmask(x):
            return x * valid
    else:
        def vmask(x):
            return x

    # ---- shared softmax / logsumexp over the 13 piece classes (axis 0) --------
    m = jnp.max(po, axis=0)                        # (64, bb)
    e = jnp.exp(po - m[None])                      # (13, 64, bb)
    s = jnp.sum(e, axis=0)                         # (64, bb)
    sm = e * pl.reciprocal(s, approx=True)[None]   # (13, 64, bb) softmax
    lse = m + jnp.log(s)                           # (64, bb)

    # ---- piece_loss_fn: per-square weighted cross entropy ---------------------
    # one-hot targets => picked logit is sum(po * pt) over classes (no argmax).
    # zero-padded boards have w == 0, so they contribute nothing here.
    x_y = jnp.sum(po * pt, axis=0)                 # (64, bb)
    w = jnp.sum(pt * pw[:, :, None], axis=0)       # (64, bb) = weight / norm
    piece_partial = jnp.sum((lse - x_y) * w) * (1.0 / 64.0)

    # ---- piece_count_loss_fn ---------------------------------------------------
    cc = jnp.sum(sm * pt, axis=1)                  # (13, bb) correct prob mass
    tc = jnp.sum(pt, axis=1)                       # (13, bb) target counts
    ic = jnp.sum(sm, axis=1) - cc                  # (13, bb) incorrect prob mass
    count_unred = (tc - cc) ** 2 + ic * ic * pl.reciprocal(1.0 + tc, approx=True)
    count_partial = jnp.sum(vmask(count_unred))    # mean via 1/(13*B) below

    # ---- illegal_pawn_loss_fn (back ranks = squares 0..7 and 56..63) ----------
    pawn = sm[WHITE_PAWN_IDX] + sm[BLACK_PAWN_IDX]   # (64, bb)
    pawn_back = pawn[0:8] + pawn[56:64]              # (8, bb)
    pawn_partial = jnp.sum(vmask(pawn_back))         # 32 probs per board

    # ---- turn / castling: BCEWithLogits(pos_weight) ----------------------------
    # (+1e-14 kept only for bit-fidelity with the original module; it is a no-op)
    tx = to[R_TURN:R_TURN + 1] + 1e-14               # (1, bb)
    ty = tt[R_TURN:R_TURN + 1]
    tpw = pv[R_TURN:R_TURN + 1, 0:1]                  # (1, 1)
    turn_partial = jnp.sum(vmask(tpw * ty * _softplus(-tx)
                                 + (1.0 - ty) * _softplus(tx)))

    cx = to[R_CAST:R_CAST + 4] + 1e-14                # (4, bb)
    cy = tt[R_CAST:R_CAST + 4]
    cpw = pv[R_CAST:R_CAST + 4, 0:1]                  # (4, 1)
    cast_partial = jnp.sum(vmask(cpw * cy * _softplus(-cx)
                                 + (1.0 - cy) * _softplus(cx)))

    # ---- en_passant_loss_fn: weighted CE (num/den partials) + illegal mass ----
    ex = to[R_EP:R_EP + 65]                           # (65, bb)
    et = tt[R_EP:R_EP + 65]                           # one-hot assumption
    ew = pv[R_EP:R_EP + 65, 0:1]                      # (65, 1) class weights
    em = pv[R_EP:R_EP + 65, 1:2]                      # (65, 1) illegal mask
    e_m = jnp.max(ex, axis=0, keepdims=True)          # (1, bb)
    e_e = jnp.exp(ex - e_m)                           # (65, bb)
    e_s = jnp.sum(e_e, axis=0, keepdims=True)         # (1, bb)
    e_lse = e_m + jnp.log(e_s)                        # (1, bb)
    e_xy = jnp.sum(ex * et, axis=0, keepdims=True)
    e_wy = jnp.sum(et * ew, axis=0, keepdims=True)    # zero on padded boards
    ep_num_partial = jnp.sum(e_wy * (e_lse - e_xy))
    ep_den_partial = jnp.sum(e_wy)                    # precondition: > 0 over full batch
    ep_ill = jnp.sum(e_e * em, axis=0, keepdims=True) * pl.reciprocal(e_s, approx=True)
    ep_illegal_partial = jnp.sum(vmask(ep_ill))

    # ---- clock_loss_fn: L1 (zero-padded boards contribute |0-0| = 0) -----------
    clock_partial = jnp.sum(jnp.abs(to[R_CLK:R_CLK + 2] - tt[R_CLK:R_CLK + 2]))

    # ---- combine the additive (mean-style) terms into one partial sum ----------
    tb = float(total_b)
    main_partial = (piece_partial
                    + count_partial * (1.0 / (13.0 * tb))
                    + pawn_partial * (1.0 / (32.0 * tb))
                    + turn_partial * (1.0 / tb)
                    + cast_partial * (1.0 / (4.0 * tb))
                    + ep_illegal_partial * (1.0 / (65.0 * tb))
                    + clock_partial * (1.0 / (2.0 * tb)))

    # Pack partials into a lane-dense (1, 8, 128) output tile:
    #   [0,0,0] = additive partial, [0,0,1] = EP-CE numerator, [0,0,2] = EP-CE denom.
    lane8 = lax.broadcasted_iota(jnp.int32, (8, 128), 1)
    sub8 = lax.broadcasted_iota(jnp.int32, (8, 128), 0)
    row0 = sub8 == 0
    tile = jnp.where(row0 & (lane8 == 0), main_partial,
           jnp.where(row0 & (lane8 == 1), ep_num_partial,
           jnp.where(row0 & (lane8 == 2), ep_den_partial, 0.0)))
    out_ref[...] = tile[None]


# --- wrapper: layout plumbing + pallas_call -------------------------------------
def _pick_block_b(batch: int) -> int:
    # The batch is the lane (minor) axis inside the kernel, so blocks are
    # multiples of 128 boards.  Batches >= 256 always get >= 2 grid blocks so
    # the "parallel" axis can shard across both TensorCores on v7x; block size
    # is capped so double-buffered I/O + temporaries stay well inside VMEM on
    # v5e (16 MiB default scoped), v6e (32/128 MiB) and v7x (32/64 MiB).
    if batch <= 256:
        return 128
    if batch <= 1024:
        return 256
    return 512


def board_loss(output, target, params):
    B = output.shape[0]
    block_b = _pick_block_b(B)
    nblocks = pl.cdiv(B, block_b)
    padded_b = nblocks * block_b
    pad = padded_b - B

    if pad:
        # zero-pad the batch; padded boards are neutralized inside the kernel
        # (validity mask) or are structurally zero-contribution (CE / clocks).
        output_p = jnp.pad(output, ((0, pad), (0, 0)))
        target_p = jnp.pad(target, ((0, pad), (0, 0)))
    else:
        output_p, target_p = output, target

    def relayout(x):
        # pieces: (Bp, 832) -> (13 classes, 64 squares, Bp boards)  [batch on lanes]
        pieces = jnp.transpose(
            x[:, :PIECE_RANGE].reshape(padded_b, N_SQUARES, N_PIECE_CLASSES),
            (2, 1, 0))
        # tail: repack to [ep | turn | castling | clocks] so the 65-logit EP
        # block starts at a sublane-aligned row, then put the batch on lanes.
        tail = jnp.transpose(jnp.concatenate(
            [x[:, EP_OFF:EP_OFF + 65],
             x[:, TURN_OFF:TURN_OFF + 1],
             x[:, CASTLE_OFF:CASTLE_OFF + 4],
             x[:, CLOCK_OFF:CLOCK_OFF + 2]], axis=1))        # (72, Bp)
        return pieces, tail

    po_t, tail_o = relayout(output_p)
    pt_t, tail_t = relayout(target_p)

    # parameter-only math hoisted out of the kernel
    pw = params["pieces_weight"]                                       # (64, 13)
    pw_norm_t = jnp.transpose(pw / jnp.sum(pw, axis=-1, keepdims=True))  # (13, 64)
    col0 = jnp.concatenate([params["ep_w"].reshape(65),
                            params["turn_w"].reshape(1),
                            params["cast_w"].reshape(4),
                            jnp.zeros((2,), jnp.float32)])
    col1 = jnp.concatenate([params["ep_mask"].reshape(65),
                            jnp.zeros((7,), jnp.float32)])
    pvec = jnp.stack([col0, col1], axis=1)                             # (72, 2)

    partials = pl.pallas_call(
        functools.partial(board_loss_kernel,
                          total_b=int(B), block_b=block_b, padded=bool(pad)),
        out_shape=jax.ShapeDtypeStruct((nblocks, 8, 128), jnp.float32),
        grid=(nblocks,),
        in_specs=[
            pl.BlockSpec((N_PIECE_CLASSES, N_SQUARES, block_b), lambda i: (0, 0, i)),
            pl.BlockSpec((N_PIECE_CLASSES, N_SQUARES, block_b), lambda i: (0, 0, i)),
            pl.BlockSpec((TAIL_SIZE, block_b), lambda i: (0, i)),
            pl.BlockSpec((TAIL_SIZE, block_b), lambda i: (0, i)),
            # constant-index parameter inputs (small; resident across grid steps)
            pl.BlockSpec((N_PIECE_CLASSES, N_SQUARES), lambda i: (0, 0)),
            pl.BlockSpec((TAIL_SIZE, 2), lambda i: (0, 0)),
        ],
        out_specs=pl.BlockSpec((1, 8, 128), lambda i: (i, 0, 0)),
        compiler_params=pltpu.CompilerParams(
            dimension_semantics=("parallel",),
            # let XLA fold the slice/reshape/transpose relayout into the four
            # big operands instead of materializing extra HBM arrays.
            allow_input_fusion=[True, True, True, True, False, False],
            vmem_limit_bytes=40 * 1024 * 1024),
    )(po_t, pt_t, tail_o, tail_t, pw_norm_t, pvec)

    main = jnp.sum(partials[:, 0, 0])
    # weighted-mean EP cross entropy: sum(w*ce) / sum(w) across the full batch.
    # Precondition (as in the original module): sum of EP target weights != 0.
    ep_ce = jnp.sum(partials[:, 0, 1]) / jnp.sum(partials[:, 0, 2])
    return main + ep_ce


# --- pure-JAX reference (original formulation) for a correctness check ----------
def board_loss_ref(output, target, params):
    B = output.shape[0]
    po = output[:, :PIECE_RANGE].reshape(B, N_SQUARES, N_PIECE_CLASSES)
    pt = target[:, :PIECE_RANGE].reshape(B, N_SQUARES, N_PIECE_CLASSES)
    pw = params["pieces_weight"]

    lse = _logsumexp_last(po)
    oh = _argmax_onehot_last(pt)
    x_y = jnp.sum(po * oh, axis=-1)
    w = jnp.sum(pt * pw[None], axis=-1)
    norms = jnp.sum(pw, axis=-1)[None]
    piece_loss = jnp.sum((lse - x_y) * w / norms) / 64.0

    sm = _softmax_last(po)
    mask = (pt != 0.0).astype(po.dtype)
    tc = jnp.sum(pt, axis=1)
    cc = jnp.sum(sm * mask, axis=1)
    ic = jnp.sum(sm * (1.0 - mask), axis=1)
    count_loss = jnp.mean((tc - cc) ** 2 + ic ** 2 / (1.0 + tc))

    back = jnp.concatenate([po[:, 0:8, :], po[:, 56:64, :]], axis=0).reshape(-1, 13)
    smb = _softmax_last(back)
    pawn_loss = jnp.mean(jnp.concatenate(
        [smb[:, WHITE_PAWN_IDX], smb[:, BLACK_PAWN_IDX]]))

    def bce(x, y, pw_):
        return jnp.mean(pw_ * y * _softplus(-x) + (1.0 - y) * _softplus(x))

    turn_loss = bce(output[:, TURN_OFF:TURN_OFF + 1] + 1e-14,
                    target[:, TURN_OFF:TURN_OFF + 1], params["turn_w"])
    castling_loss = bce(output[:, CASTLE_OFF:CASTLE_OFF + 4] + 1e-14,
                        target[:, CASTLE_OFF:CASTLE_OFF + 4], params["cast_w"])

    ex = output[:, EP_OFF:EP_OFF + 65]
    et = target[:, EP_OFF:EP_OFF + 65]
    e_oh = _argmax_onehot_last(et)
    e_wy = jnp.sum(e_oh * params["ep_w"], axis=-1)
    ep_ce = jnp.sum(e_wy * (_logsumexp_last(ex) - jnp.sum(ex * e_oh, -1))) / jnp.sum(e_wy)
    ep_loss = ep_ce + jnp.mean(_softmax_last(ex) * params["ep_mask"])

    clock_loss = jnp.mean(jnp.abs(output[:, CLOCK_OFF:] - target[:, CLOCK_OFF:]))

    return (piece_loss + count_loss + pawn_loss + turn_loss
            + castling_loss + ep_loss + clock_loss)


# --- deterministic synthetic "trained" weights (replaces _generate_weights) -----
# TODO(synk): the dataset-scanning weight generation (_generate_weights) has no
# in-kernel equivalent; weights are precomputed inputs here.
def make_params(key):
    k1, k2, k3, k4 = jax.random.split(key, 4)
    pieces_weight = jax.random.uniform(k1, (N_SQUARES, N_PIECE_CLASSES),
                                       jnp.float32, 1.0, 50.0)
    turn_w = jax.random.uniform(k2, (1, 1), jnp.float32, 0.5, 3.0)
    cast_w = jax.random.uniform(k3, (1, 4), jnp.float32, 0.5, 5.0)
    ep_w = jax.random.uniform(k4, (1, 65), jnp.float32, 0.5, 10.0)
    ep_mask = (jnp.arange(65) % 3 == 0).astype(jnp.float32).reshape(1, 65)
    return {"pieces_weight": pieces_weight, "turn_w": turn_w,
            "cast_w": cast_w, "ep_w": ep_w, "ep_mask": ep_mask}


def make_inputs(key, B):
    ko, kp, kt, kc, ke, kk = jax.random.split(key, 6)
    output = jax.random.normal(ko, (B, SIZE), jnp.float32)
    # plausible one-hot target board encoding
    piece_labels = jax.random.randint(kp, (B, N_SQUARES), 0, N_PIECE_CLASSES)
    pieces = jax.nn.one_hot(piece_labels, N_PIECE_CLASSES, dtype=jnp.float32)
    turn = jax.random.bernoulli(kt, 0.5, (B, 1)).astype(jnp.float32)
    castling = jax.random.bernoulli(kc, 0.5, (B, 4)).astype(jnp.float32)
    ep_labels = jax.random.randint(ke, (B,), 0, 65)
    ep = jax.nn.one_hot(ep_labels, 65, dtype=jnp.float32)
    clocks = jax.random.uniform(kk, (B, 2), jnp.float32, 0.0, 50.0)
    target = jnp.concatenate(
        [pieces.reshape(B, PIECE_RANGE), turn, castling, ep, clocks], axis=1)
    return output, target


if __name__ == "__main__":
    key = jax.random.PRNGKey(0)
    kp, ki = jax.random.split(key)
    params = make_params(kp)

    loss_fn = jax.jit(board_loss)

    # B=8 exercises the padded single-block (validity-masked) path;
    # B=256 exercises the unpadded two-block path (multi-block partial sums).
    for B in (8, 256):
        output, target = make_inputs(jax.random.fold_in(ki, B), B)
        loss = loss_fn(output, target, params)
        jax.block_until_ready(loss)
        ref = board_loss_ref(output, target, params)
        # approx-reciprocal softmax denominators introduce ~1e-4 relative error
        np.testing.assert_allclose(float(loss), float(ref), rtol=5e-3, atol=1e-2)

    print("KERNEL_OK")
</pallas_src>

<mosaic_0001>
module attributes {stable_mosaic.version = 11 : i64} {
  func.func @board_loss_kernel(%arg0: i32, %arg1: memref<13x64x128xf32, #tpu.memory_space<vmem>>, %arg2: memref<13x64x128xf32, #tpu.memory_space<vmem>>, %arg3: memref<72x128xf32, #tpu.memory_space<vmem>>, %arg4: memref<72x128xf32, #tpu.memory_space<vmem>>, %arg5: memref<13x64xf32, #tpu.memory_space<vmem>>, %arg6: memref<72x2xf32, #tpu.memory_space<vmem>>, %arg7: memref<1x8x128xf32, #tpu.memory_space<vmem>>) attributes {dimension_semantics = [#tpu.dimension_semantics<parallel>], iteration_bounds = array<i64: 1>, scalar_prefetch = 0 : i64, scratch_operands = 0 : i64, tpu.core_type = #tpu.core_type<tc>, window_params = [{transform_indices = @transform_0, window_bounds = array<i64: 13, 64, 128>}, {transform_indices = @transform_1, window_bounds = array<i64: 13, 64, 128>}, {transform_indices = @transform_2, window_bounds = array<i64: 72, 128>}, {transform_indices = @transform_3, window_bounds = array<i64: 72, 128>}, {pipeline_mode = #tpu.pipeline_mode<synchronous>, transform_indices = @transform_4, window_bounds = array<i64: 13, 64>}, {pipeline_mode = #tpu.pipeline_mode<synchronous>, transform_indices = @transform_5, window_bounds = array<i64: 72, 2>}, {transform_indices = @transform_6, window_bounds = array<i64: 1, 8, 128>}]} {
    %c0 = arith.constant 0 : index
    %c0_0 = arith.constant 0 : index
    %c0_1 = arith.constant 0 : index
    %0 = vector.load %arg1[%c0, %c0_0, %c0_1] : memref<13x64x128xf32, #tpu.memory_space<vmem>>, vector<13x64x128xf32>
    %c0_2 = arith.constant 0 : index
    %c0_3 = arith.constant 0 : index
    %c0_4 = arith.constant 0 : index
    %1 = vector.load %arg2[%c0_2, %c0_3, %c0_4] : memref<13x64x128xf32, #tpu.memory_space<vmem>>, vector<13x64x128xf32>
    %c0_5 = arith.constant 0 : index
    %c0_6 = arith.constant 0 : index
    %2 = vector.load %arg3[%c0_5, %c0_6] : memref<72x128xf32, #tpu.memory_space<vmem>>, vector<72x128xf32>
    %c0_7 = arith.constant 0 : index
    %c0_8 = arith.constant 0 : index
    %3 = vector.load %arg4[%c0_7, %c0_8] : memref<72x128xf32, #tpu.memory_space<vmem>>, vector<72x128xf32>
    %c0_9 = arith.constant 0 : index
    %c0_10 = arith.constant 0 : index
    %4 = vector.load %arg5[%c0_9, %c0_10] : memref<13x64xf32, #tpu.memory_space<vmem>>, vector<13x64xf32>
    %c0_11 = arith.constant 0 : index
    %c0_12 = arith.constant 0 : index
    %5 = vector.load %arg6[%c0_11, %c0_12] : memref<72x2xf32, #tpu.memory_space<vmem>>, vector<72x2xf32>
    %6 = tpu.iota {dimensions = array<i32: 1>} : vector<1x128xi32>
    %c128_i32 = arith.constant 128 : i32
    %7 = arith.muli %arg0, %c128_i32 : i32
    %8 = vector.broadcast %7 : i32 to vector<1x128xi32>
    %9 = arith.addi %8, %6 : vector<1x128xi32>
    %c8_i32 = arith.constant 8 : i32
    %10 = vector.broadcast %c8_i32 : i32 to vector<1x128xi32>
    %11 = arith.cmpi slt, %9, %10 : vector<1x128xi32>
    %12 = arith.extui %11 : vector<1x128xi1> to vector<1x128xi32>
    %13 = arith.sitofp %12 : vector<1x128xi32> to vector<1x128xf32>
    %cst = arith.constant dense<0xFF800000> : vector<64x128xf32>
    %14 = vector.multi_reduction <maximumf>, %0, %cst [0] : vector<13x64x128xf32> to vector<64x128xf32>
    %15 = vector.shape_cast %14 : vector<64x128xf32> to vector<1x64x128xf32>
    %16 = vector.broadcast %15 : vector<1x64x128xf32> to vector<13x64x128xf32>
    %17 = arith.subf %0, %16 : vector<13x64x128xf32>
    %18 = math.exp %17 : vector<13x64x128xf32>
    %cst_13 = arith.constant dense<0.000000e+00> : vector<64x128xf32>
    %19 = vector.multi_reduction <add>, %18, %cst_13 [0] : vector<13x64x128xf32> to vector<64x128xf32>
    %20 = tpu.reciprocal %19 {approx = true} : vector<64x128xf32> -> vector<64x128xf32>
    %21 = vector.shape_cast %20 : vector<64x128xf32> to vector<1x64x128xf32>
    %22 = vector.broadcast %21 : vector<1x64x128xf32> to vector<13x64x128xf32>
    %23 = arith.mulf %18, %22 : vector<13x64x128xf32>
    %24 = math.log %19 : vector<64x128xf32>
    %25 = arith.addf %14, %24 : vector<64x128xf32>
    %26 = arith.mulf %0, %1 : vector<13x64x128xf32>
    %cst_14 = arith.constant dense<0.000000e+00> : vector<64x128xf32>
    %27 = vector.multi_reduction <add>, %26, %cst_14 [0] : vector<13x64x128xf32> to vector<64x128xf32>
    %28 = vector.shape_cast %4 : vector<13x64xf32> to vector<13x64x1xf32>
    %29 = vector.broadcast %28 : vector<13x64x1xf32> to vector<13x64x128xf32>
    %30 = arith.mulf %1, %29 : vector<13x64x128xf32>
    %cst_15 = arith.constant dense<0.000000e+00> : vector<64x128xf32>
    %31 = vector.multi_reduction <add>, %30, %cst_15 [0] : vector<13x64x128xf32> to vector<64x128xf32>
    %32 = arith.subf %25, %27 : vector<64x128xf32>
    %33 = arith.mulf %32, %31 : vector<64x128xf32>
    %34 = vector.shape_cast %33 : vector<64x128xf32> to vector<1x64x128xf32>
    %cst_16 = arith.constant dense<0.000000e+00> : vector<1xf32>
    %35 = vector.multi_reduction <add>, %34, %cst_16 [1, 2] : vector<1x64x128xf32> to vector<1xf32>
    %36 = vector.shape_cast %35 : vector<1xf32> to vector<1x1x1xf32>
    %37 = vector.extract %36[0, 0, 0] : f32 from vector<1x1x1xf32>
    %cst_17 = arith.constant 1.562500e-02 : f32
    %38 = arith.mulf %37, %cst_17 : f32
    %39 = arith.mulf %23, %1 : vector<13x64x128xf32>
    %cst_18 = arith.constant dense<0.000000e+00> : vector<13x128xf32>
    %40 = vector.multi_reduction <add>, %39, %cst_18 [1] : vector<13x64x128xf32> to vector<13x128xf32>
    %cst_19 = arith.constant dense<0.000000e+00> : vector<13x128xf32>
    %41 = vector.multi_reduction <add>, %1, %cst_19 [1] : vector<13x64x128xf32> to vector<13x128xf32>
    %cst_20 = arith.constant dense<0.000000e+00> : vector<13x128xf32>
    %42 = vector.multi_reduction <add>, %23, %cst_20 [1] : vector<13x64x128xf32> to vector<13x128xf32>
    %43 = arith.subf %42, %40 : vector<13x128xf32>
    %44 = arith.subf %41, %40 : vector<13x128xf32>
    %45 = arith.mulf %44, %44 : vector<13x128xf32>
    %46 = arith.mulf %43, %43 : vector<13x128xf32>
    %cst_21 = arith.constant 1.000000e+00 : f32
    %47 = vector.broadcast %cst_21 : f32 to vector<13x128xf32>
    %48 = arith.addf %47, %41 : vector<13x128xf32>
    %49 = tpu.reciprocal %48 {approx = true} : vector<13x128xf32> -> vector<13x128xf32>
    %50 = arith.mulf %46, %49 : vector<13x128xf32>
    %51 = arith.addf %45, %50 : vector<13x128xf32>
    %52 = vector.broadcast %13 : vector<1x128xf32> to vector<13x128xf32>
    %53 = arith.mulf %51, %52 : vector<13x128xf32>
    %54 = vector.shape_cast %53 : vector<13x128xf32> to vector<1x13x128xf32>
    %cst_22 = arith.constant dense<0.000000e+00> : vector<1xf32>
    %55 = vector.multi_reduction <add>, %54, %cst_22 [1, 2] : vector<1x13x128xf32> to vector<1xf32>
    %56 = vector.shape_cast %55 : vector<1xf32> to vector<1x1x1xf32>
    %57 = vector.extract %56[0, 0, 0] : f32 from vector<1x1x1xf32>
    %58 = vector.extract_strided_slice %23 {offsets = [1, 0, 0], sizes = [1, 64, 128], strides = [1, 1, 1]} : vector<13x64x128xf32> to vector<1x64x128xf32>
    %59 = vector.shape_cast %58 : vector<1x64x128xf32> to vector<64x128xf32>
    %60 = vector.extract_strided_slice %23 {offsets = [7, 0, 0], sizes = [1, 64, 128], strides = [1, 1, 1]} : vector<13x64x128xf32> to vector<1x64x128xf32>
    %61 = vector.shape_cast %60 : vector<1x64x128xf32> to vector<64x128xf32>
    %62 = arith.addf %59, %61 : vector<64x128xf32>
    %63 = vector.extract_strided_slice %62 {offsets = [0, 0], sizes = [8, 128], strides = [1, 1]} : vector<64x128xf32> to vector<8x128xf32>
    %64 = vector.extract_strided_slice %62 {offsets = [56, 0], sizes = [8, 128], strides = [1, 1]} : vector<64x128xf32> to vector<8x128xf32>
    %65 = arith.addf %63, %64 : vector<8x128xf32>
    %66 = vector.broadcast %13 : vector<1x128xf32> to vector<8x128xf32>
    %67 = arith.mulf %65, %66 : vector<8x128xf32>
    %68 = vector.shape_cast %67 : vector<8x128xf32> to vector<1x8x128xf32>
    %cst_23 = arith.constant dense<0.000000e+00> : vector<1xf32>
    %69 = vector.multi_reduction <add>, %68, %cst_23 [1, 2] : vector<1x8x128xf32> to vector<1xf32>
    %70 = vector.shape_cast %69 : vector<1xf32> to vector<1x1x1xf32>
    %71 = vector.extract %70[0, 0, 0] : f32 from vector<1x1x1xf32>
    %72 = vector.extract_strided_slice %2 {offsets = [65, 0], sizes = [1, 128], strides = [1, 1]} : vector<72x128xf32> to vector<1x128xf32>
    %cst_24 = arith.constant 9.99999982E-15 : f32
    %73 = vector.broadcast %cst_24 : f32 to vector<1x128xf32>
    %74 = arith.addf %72, %73 : vector<1x128xf32>
    %75 = vector.extract_strided_slice %3 {offsets = [65, 0], sizes = [1, 128], strides = [1, 1]} : vector<72x128xf32> to vector<1x128xf32>
    %76 = vector.extract_strided_slice %5 {offsets = [65, 0], sizes = [1, 1], strides = [1, 1]} : vector<72x2xf32> to vector<1x1xf32>
    %77 = vector.broadcast %76 : vector<1x1xf32> to vector<1x128xf32>
    %78 = arith.mulf %77, %75 : vector<1x128xf32>
    %cst_25 = arith.constant 0.000000e+00 : f32
    %79 = vector.broadcast %cst_25 : f32 to vector<1x128xf32>
    %80 = arith.subf %79, %74 : vector<1x128xf32>
    %cst_26 = arith.constant 0.000000e+00 : f32
    %81 = vector.broadcast %cst_26 : f32 to vector<1x128xf32>
    %82 = arith.maximumf %80, %81 : vector<1x128xf32>
    %83 = math.absf %80 : vector<1x128xf32>
    %cst_27 = arith.constant 0.000000e+00 : f32
    %84 = vector.broadcast %cst_27 : f32 to vector<1x128xf32>
    %85 = arith.subf %84, %83 : vector<1x128xf32>
    %86 = math.exp %85 : vector<1x128xf32>
    %cst_28 = arith.constant 1.000000e+00 : f32
    %87 = vector.broadcast %cst_28 : f32 to vector<1x128xf32>
    %88 = arith.addf %87, %86 : vector<1x128xf32>
    %89 = math.log %88 : vector<1x128xf32>
    %90 = arith.addf %82, %89 : vector<1x128xf32>
    %91 = arith.mulf %78, %90 : vector<1x128xf32>
    %cst_29 = arith.constant 1.000000e+00 : f32
    %92 = vector.broadcast %cst_29 : f32 to vector<1x128xf32>
    %93 = arith.subf %92, %75 : vector<1x128xf32>
    %cst_30 = arith.constant 0.000000e+00 : f32
    %94 = vector.broadcast %cst_30 : f32 to vector<1x128xf32>
    %95 = arith.maximumf %74, %94 : vector<1x128xf32>
    %96 = math.absf %74 : vector<1x128xf32>
    %cst_31 = arith.constant 0.000000e+00 : f32
    %97 = vector.broadcast %cst_31 : f32 to vector<1x128xf32>
    %98 = arith.subf %97, %96 : vector<1x128xf32>
    %99 = math.exp %98 : vector<1x128xf32>
    %cst_32 = arith.constant 1.000000e+00 : f32
    %100 = vector.broadcast %cst_32 : f32 to vector<1x128xf32>
    %101 = arith.addf %100, %99 : vector<1x128xf32>
    %102 = math.log %101 : vector<1x128xf32>
    %103 = arith.addf %95, %102 : vector<1x128xf32>
    %104 = arith.mulf %93, %103 : vector<1x128xf32>
    %105 = arith.addf %91, %104 : vector<1x128xf32>
    %106 = arith.mulf %105, %13 : vector<1x128xf32>
    %107 = vector.shape_cast %106 : vector<1x128xf32> to vector<1x1x128xf32>
    %cst_33 = arith.constant dense<0.000000e+00> : vector<1xf32>
    %108 = vector.multi_reduction <add>, %107, %cst_33 [1, 2] : vector<1x1x128xf32> to vector<1xf32>
    %109 = vector.shape_cast %108 : vector<1xf32> to vector<1x1x1xf32>
    %110 = vector.extract %109[0, 0, 0] : f32 from vector<1x1x1xf32>
    %111 = vector.extract_strided_slice %2 {offsets = [66, 0], sizes = [4, 128], strides = [1, 1]} : vector<72x128xf32> to vector<4x128xf32>
    %cst_34 = arith.constant 9.99999982E-15 : f32
    %112 = vector.broadcast %cst_34 : f32 to vector<4x128xf32>
    %113 = arith.addf %111, %112 : vector<4x128xf32>
    %114 = vector.extract_strided_slice %3 {offsets = [66, 0], sizes = [4, 128], strides = [1, 1]} : vector<72x128xf32> to vector<4x128xf32>
    %115 = vector.extract_strided_slice %5 {offsets = [66, 0], sizes = [4, 1], strides = [1, 1]} : vector<72x2xf32> to vector<4x1xf32>
    %116 = vector.broadcast %115 : vector<4x1xf32> to vector<4x128xf32>
    %117 = arith.mulf %116, %114 : vector<4x128xf32>
    %cst_35 = arith.constant 0.000000e+00 : f32
    %118 = vector.broadcast %cst_35 : f32 to vector<4x128xf32>
    %119 = arith.subf %118, %113 : vector<4x128xf32>
    %cst_36 = arith.constant 0.000000e+00 : f32
    %120 = vector.broadcast %cst_36 : f32 to vector<4x128xf32>
    %121 = arith.maximumf %119, %120 : vector<4x128xf32>
    %122 = math.absf %119 : vector<4x128xf32>
    %cst_37 = arith.constant 0.000000e+00 : f32
    %123 = vector.broadcast %cst_37 : f32 to vector<4x128xf32>
    %124 = arith.subf %123, %122 : vector<4x128xf32>
    %125 = math.exp %124 : vector<4x128xf32>
    %cst_38 = arith.constant 1.000000e+00 : f32
    %126 = vector.broadcast %cst_38 : f32 to vector<4x128xf32>
    %127 = arith.addf %126, %125 : vector<4x128xf32>
    %128 = math.log %127 : vector<4x128xf32>
    %129 = arith.addf %121, %128 : vector<4x128xf32>
    %130 = arith.mulf %117, %129 : vector<4x128xf32>
    %cst_39 = arith.constant 1.000000e+00 : f32
    %131 = vector.broadcast %cst_39 : f32 to vector<4x128xf32>
    %132 = arith.subf %131, %114 : vector<4x128xf32>
    %cst_40 = arith.constant 0.000000e+00 : f32
    %133 = vector.broadcast %cst_40 : f32 to vector<4x128xf32>
    %134 = arith.maximumf %113, %133 : vector<4x128xf32>
    %135 = math.absf %113 : vector<4x128xf32>
    %cst_41 = arith.constant 0.000000e+00 : f32
    %136 = vector.broadcast %cst_41 : f32 to vector<4x128xf32>
    %137 = arith.subf %136, %135 : vector<4x128xf32>
    %138 = math.exp %137 : vector<4x128xf32>
    %cst_42 = arith.constant 1.000000e+00 : f32
    %139 = vector.broadcast %cst_42 : f32 to vector<4x128xf32>
    %140 = arith.addf %139, %138 : vector<4x128xf32>
    %141 = math.log %140 : vector<4x128xf32>
    %142 = arith.addf %134, %141 : vector<4x128xf32>
    %143 = arith.mulf %132, %142 : vector<4x128xf32>
    %144 = arith.addf %130, %143 : vector<4x128xf32>
    %145 = vector.broadcast %13 : vector<1x128xf32> to vector<4x128xf32>
    %146 = arith.mulf %144, %145 : vector<4x128xf32>
    %147 = vector.shape_cast %146 : vector<4x128xf32> to vector<1x4x128xf32>
    %cst_43 = arith.constant dense<0.000000e+00> : vector<1xf32>
    %148 = vector.multi_reduction <add>, %147, %cst_43 [1, 2] : vector<1x4x128xf32> to vector<1xf32>
    %149 = vector.shape_cast %148 : vector<1xf32> to vector<1x1x1xf32>
    %150 = vector.extract %149[0, 0, 0] : f32 from vector<1x1x1xf32>
    %151 = vector.extract_strided_slice %2 {offsets = [0, 0], sizes = [65, 128], strides = [1, 1]} : vector<72x128xf32> to vector<65x128xf32>
    %152 = vector.extract_strided_slice %3 {offsets = [0, 0], sizes = [65, 128], strides = [1, 1]} : vector<72x128xf32> to vector<65x128xf32>
    %153 = vector.extract_strided_slice %5 {offsets = [0, 0], sizes = [65, 1], strides = [1, 1]} : vector<72x2xf32> to vector<65x1xf32>
    %154 = vector.extract_strided_slice %5 {offsets = [0, 1], sizes = [65, 1], strides = [1, 1]} : vector<72x2xf32> to vector<65x1xf32>
    %cst_44 = arith.constant dense<0xFF800000> : vector<128xf32>
    %155 = vector.multi_reduction <maximumf>, %151, %cst_44 [0] : vector<65x128xf32> to vector<128xf32>
    %156 = vector.shape_cast %155 : vector<128xf32> to vector<1x128xf32>
    %157 = vector.broadcast %156 : vector<1x128xf32> to vector<65x128xf32>
    %158 = arith.subf %151, %157 : vector<65x128xf32>
    %159 = math.exp %158 : vector<65x128xf32>
    %cst_45 = arith.constant dense<0.000000e+00> : vector<128xf32>
    %160 = vector.multi_reduction <add>, %159, %cst_45 [0] : vector<65x128xf32> to vector<128xf32>
    %161 = vector.shape_cast %160 : vector<128xf32> to vector<1x128xf32>
    %162 = math.log %161 : vector<1x128xf32>
    %163 = arith.addf %156, %162 : vector<1x128xf32>
    %164 = arith.mulf %151, %152 : vector<65x128xf32>
    %cst_46 = arith.constant dense<0.000000e+00> : vector<128xf32>
    %165 = vector.multi_reduction <add>, %164, %cst_46 [0] : vector<65x128xf32> to vector<128xf32>
    %166 = vector.shape_cast %165 : vector<128xf32> to vector<1x128xf32>
    %167 = vector.broadcast %153 : vector<65x1xf32> to vector<65x128xf32>
    %168 = arith.mulf %152, %167 : vector<65x128xf32>
    %cst_47 = arith.constant dense<0.000000e+00> : vector<128xf32>
    %169 = vector.multi_reduction <add>, %168, %cst_47 [0] : vector<65x128xf32> to vector<128xf32>
    %170 = vector.shape_cast %169 : vector<128xf32> to vector<1x128xf32>
    %171 = arith.subf %163, %166 : vector<1x128xf32>
    %172 = arith.mulf %170, %171 : vector<1x128xf32>
    %173 = vector.shape_cast %172 : vector<1x128xf32> to vector<1x1x128xf32>
    %cst_48 = arith.constant dense<0.000000e+00> : vector<1xf32>
    %174 = vector.multi_reduction <add>, %173, %cst_48 [1, 2] : vector<1x1x128xf32> to vector<1xf32>
    %175 = vector.shape_cast %174 : vector<1xf32> to vector<1x1x1xf32>
    %176 = vector.extract %175[0, 0, 0] : f32 from vector<1x1x1xf32>
    %177 = vector.shape_cast %170 : vector<1x128xf32> to vector<1x1x128xf32>
    %cst_49 = arith.constant dense<0.000000e+00> : vector<1xf32>
    %178 = vector.multi_reduction <add>, %177, %cst_49 [1, 2] : vector<1x1x128xf32> to vector<1xf32>
    %179 = vector.shape_cast %178 : vector<1xf32> to vector<1x1x1xf32>
    %180 = vector.extract %179[0, 0, 0] : f32 from vector<1x1x1xf32>
    %181 = vector.broadcast %154 : vector<65x1xf32> to vector<65x128xf32>
    %182 = arith.mulf %159, %181 : vector<65x128xf32>
    %cst_50 = arith.constant dense<0.000000e+00> : vector<128xf32>
    %183 = vector.multi_reduction <add>, %182, %cst_50 [0] : vector<65x128xf32> to vector<128xf32>
    %184 = vector.shape_cast %183 : vector<128xf32> to vector<1x128xf32>
    %185 = tpu.reciprocal %161 {approx = true} : vector<1x128xf32> -> vector<1x128xf32>
    %186 = arith.mulf %184, %185 : vector<1x128xf32>
    %187 = arith.mulf %186, %13 : vector<1x128xf32>
    %188 = vector.shape_cast %187 : vector<1x128xf32> to vector<1x1x128xf32>
    %cst_51 = arith.constant dense<0.000000e+00> : vector<1xf32>
    %189 = vector.multi_reduction <add>, %188, %cst_51 [1, 2] : vector<1x1x128xf32> to vector<1xf32>
    %190 = vector.shape_cast %189 : vector<1xf32> to vector<1x1x1xf32>
    %191 = vector.extract %190[0, 0, 0] : f32 from vector<1x1x1xf32>
    %192 = vector.extract_strided_slice %2 {offsets = [70, 0], sizes = [2, 128], strides = [1, 1]} : vector<72x128xf32> to vector<2x128xf32>
    %193 = vector.extract_strided_slice %3 {offsets = [70, 0], sizes = [2, 128], strides = [1, 1]} : vector<72x128xf32> to vector<2x128xf32>
    %194 = arith.subf %192, %193 : vector<2x128xf32>
    %195 = math.absf %194 : vector<2x128xf32>
    %196 = vector.shape_cast %195 : vector<2x128xf32> to vector<1x2x128xf32>
    %cst_52 = arith.constant dense<0.000000e+00> : vector<1xf32>
    %197 = vector.multi_reduction <add>, %196, %cst_52 [1, 2] : vector<1x2x128xf32> to vector<1xf32>
    %198 = vector.shape_cast %197 : vector<1xf32> to vector<1x1x1xf32>
    %199 = vector.extract %198[0, 0, 0] : f32 from vector<1x1x1xf32>
    %cst_53 = arith.constant 0.00961538497 : f32
    %200 = arith.mulf %57, %cst_53 : f32
    %201 = arith.addf %38, %200 : f32
    %cst_54 = arith.constant 3.906250e-03 : f32
    %202 = arith.mulf %71, %cst_54 : f32
    %203 = arith.addf %201, %202 : f32
    %cst_55 = arith.constant 1.250000e-01 : f32
    %204 = arith.mulf %110, %cst_55 : f32
    %205 = arith.addf %203, %204 : f32
    %cst_56 = arith.constant 3.125000e-02 : f32
    %206 = arith.mulf %150, %cst_56 : f32
    %207 = arith.addf %205, %206 : f32
    %cst_57 = arith.constant 0.00192307692 : f32
    %208 = arith.mulf %191, %cst_57 : f32
    %209 = arith.addf %207, %208 : f32
    %cst_58 = arith.constant 6.250000e-02 : f32
    %210 = arith.mulf %199, %cst_58 : f32
    %211 = arith.addf %209, %210 : f32
    %212 = tpu.iota {dimensions = array<i32: 1>} : vector<8x128xi32>
    %213 = tpu.iota {dimensions = array<i32: 0>} : vector<8x128xi32>
    %c0_i32 = arith.constant 0 : i32
    %214 = vector.broadcast %c0_i32 : i32 to vector<8x128xi32>
    %215 = arith.cmpi eq, %213, %214 : vector<8x128xi32>
    %c0_i32_59 = arith.constant 0 : i32
    %216 = vector.broadcast %c0_i32_59 : i32 to vector<8x128xi32>
    %217 = arith.cmpi eq, %212, %216 : vector<8x128xi32>
    %218 = arith.andi %215, %217 : vector<8x128xi1>
    %c1_i32 = arith.constant 1 : i32
    %219 = vector.broadcast %c1_i32 : i32 to vector<8x128xi32>
    %220 = arith.cmpi eq, %212, %219 : vector<8x128xi32>
    %221 = arith.andi %215, %220 : vector<8x128xi1>
    %c2_i32 = arith.constant 2 : i32
    %222 = vector.broadcast %c2_i32 : i32 to vector<8x128xi32>
    %223 = arith.cmpi eq, %212, %222 : vector<8x128xi32>
    %224 = arith.andi %215, %223 : vector<8x128xi1>
    %cst_60 = arith.constant 0.000000e+00 : f32
    %225 = vector.broadcast %180 : f32 to vector<8x128xf32>
    %226 = vector.broadcast %cst_60 : f32 to vector<8x128xf32>
    %227 = arith.select %224, %225, %226 : vector<8x128xi1>, vector<8x128xf32>
    %228 = vector.broadcast %176 : f32 to vector<8x128xf32>
    %229 = arith.select %221, %228, %227 : vector<8x128xi1>, vector<8x128xf32>
    %230 = vector.broadcast %211 : f32 to vector<8x128xf32>
    %231 = arith.select %218, %230, %229 : vector<8x128xi1>, vector<8x128xf32>
    %232 = vector.shape_cast %231 : vector<8x128xf32> to vector<1x8x128xf32>
    %c0_61 = arith.constant 0 : index
    %c0_62 = arith.constant 0 : index
    %c0_63 = arith.constant 0 : index
    %233 = vector.load %arg7[%c0_61, %c0_62, %c0_63] : memref<1x8x128xf32, #tpu.memory_space<vmem>>, vector<1x8x128xf32>
    tpu.vector_store %arg7[%c0_61, %c0_62, %c0_63], %232 {strides = array<i32>} : memref<1x8x128xf32, #tpu.memory_space<vmem>>, vector<1x8x128xf32>,
    return
  }
  func.func @transform_0(%arg0: i32) -> (i32, i32, i32) {
    %c0_i32 = arith.constant 0 : i32
    %c0_i32_0 = arith.constant 0 : i32
    %c0_i32_1 = arith.constant 0 : i32
    return %c0_i32, %c0_i32_0, %arg0 : i32, i32, i32
  }
  func.func @transform_1(%arg0: i32) -> (i32, i32, i32) {
    %c0_i32 = arith.constant 0 : i32
    %c0_i32_0 = arith.constant 0 : i32
    %c0_i32_1 = arith.constant 0 : i32
    return %c0_i32, %c0_i32_0, %arg0 : i32, i32, i32
  }
  func.func @transform_2(%arg0: i32) -> (i32, i32) {
    %c0_i32 = arith.constant 0 : i32
    %c0_i32_0 = arith.constant 0 : i32
    return %c0_i32, %arg0 : i32, i32
  }
  func.func @transform_3(%arg0: i32) -> (i32, i32) {
    %c0_i32 = arith.constant 0 : i32
    %c0_i32_0 = arith.constant 0 : i32
    return %c0_i32, %arg0 : i32, i32
  }
  func.func @transform_4(%arg0: i32) -> (i32, i32) {
    %c0_i32 = arith.constant 0 : i32
    %c0_i32_0 = arith.constant 0 : i32
    %c0_i32_1 = arith.constant 0 : i32
    return %c0_i32, %c0_i32_0 : i32, i32
  }
  func.func @transform_5(%arg0: i32) -> (i32, i32) {
    %c0_i32 = arith.constant 0 : i32
    %c0_i32_0 = arith.constant 0 : i32
    %c0_i32_1 = arith.constant 0 : i32
    return %c0_i32, %c0_i32_0 : i32, i32
  }
  func.func @transform_6(%arg0: i32) -> (i32, i32, i32) {
    %c0_i32 = arith.constant 0 : i32
    %c0_i32_0 = arith.constant 0 : i32
    %c0_i32_1 = arith.constant 0 : i32
    return %arg0, %c0_i32, %c0_i32_0 : i32, i32, i32
  }
}

</mosaic_0001>

<bundles_post_ra>
// kernel: board_loss.2
= control target key start
LH: loop header
LB: loop body
LE: loop exit
PB: predicated region body
PF: predicated region fallthrough
CT: control target
= control target key end

     0   :  { %s9336_s0 = inlined_call_operand.vmem [shape: f32[13,64], index: 0, kind: input, shape index: {}]   ;;  %s9337_s1 = inlined_call_operand.vmem [shape: f32[72,2], index: 1, kind: input, shape index: {}]   ;;  %s9338_s2 = inlined_call_operand.vmem [shape: f32[128,64,13], index: 2, kind: input, shape index: {}]   ;;  %s9339_s3 = inlined_call_operand.vmem [shape: f32[128,64,13], index: 3, kind: input, shape index: {}]   ;;  %s9340_s4 = inlined_call_operand.vmem [shape: f32[128,2], index: 4, kind: input, shape index: {}]   ;;  %s9341_s5 = inlined_call_operand.<no memory space> [shape: f32[], index: 5, kind: input, shape index: {}]   ;;  %s9342_s6 = inlined_call_operand.vmem [shape: f32[128,5], index: 6, kind: input, shape index: {}]   ;;  %s9343_s7 = inlined_call_operand.vmem [shape: f32[128,65], index: 7, kind: input, shape index: {}]   ;;  %s9344_s8 = inlined_call_operand.vmem [shape: f32[128,2], index: 8, kind: input, shape index: {}]   ;;  %s9345_s9 = inlined_call_operand.vmem [shape: f32[128,5], index: 9, kind: input, shape index: {}]   ;;  %s9346_s10 = inlined_call_operand.vmem [shape: f32[128,65], index: 10, kind: input, shape index: {}]   ;;  %s9347_s11 = inlined_call_operand.vmem [shape: f32[1,8,128], index: 11, kind: output, shape index: {}]  }
   0x1   :  { %v5218_v0 = vstv %s9341_s5 }
   0x2   :  { %9525 = vst [vmem:[#allocation36_spill] sm:$0xff] %v5218_v0 }
   0x3   :  { %v9348_v1 = vlaneseq  ;;  %v5223_v2 = vld [vmem:[%s9339_s3 + $0x10] sm:$0xff]  ;;  %v5243_v7 = vld [vmem:[%s9336_s0] sm:$0xff]  ;;  %v5293_v22 = vld [vmem:[%s9339_s3 + $0x18] sm:$0xff]  ;;  %vm1344_vm0 = vcmask 1041408   ;;  %vm1352_vm1 = vcmask 1046528   ;;  %vm4164_vm2 = vcmask 1040384  }
   0x4   :  { %v5228_v3 = vld [vmem:[%s9339_s3 + $0x50] sm:$0xff]  ;;  %v5255_v11 = vld [vmem:[%s9339_s3] sm:$0xff]  ;;  %v5298_v23 = vld [vmem:[%s9339_s3 + $0x58] sm:$0xff]  ;;  %vm4075_vm7 = vcmask 1041409   ;;  %vm4078_vm8 = vcmask 1042434   ;;  %vm4081_vm9 = vcmask 1043459  }
   0x5   :  { %v5233_v4 = vld [vmem:[%s9339_s3 + $0x90] sm:$0xff]  ;;  %v1829_v5 = vmax.f32 %v5223_v2, %v5228_v3  ;;  %v5238_v6 = vshrl.u32 %v9348_v1, 7  ;;  %v5263_v13 = vld [vmem:[%s9339_s3 + $0x40] sm:$0xff]  ;;  %v5313_v26 = vld [vmem:[%s9339_s3 + $0x98] sm:$0xff]  ;;  %v1841_v27 = vmax.f32 %v5293_v22, %v5298_v23  ;;  %vm4084_vm10 = vcmask 1044484  }
   0x6   :  { %v5250_v10 = vld [vmem:[%s9339_s3 + $0xd0] sm:$0xff]  ;;  %v5273_v15 = vld [vmem:[%s9339_s3 + $0x80] sm:$0xff]  ;;  %v1805_v17 = vmax.f32 %v5255_v11, %v5263_v13  ;;  %v5322_v30 = vld [vmem:[%s9339_s3 + $0xd8] sm:$0xff]  ;;  %vm4087_vm11 = vcmask 1045509   ;;  %vm4090_vm12 = vcmask 1046534   ;;  %vm4093_vm13 = vcmask 1047559  }
   0x7   :  { %9526 = vst [vmem:[#allocation37_spill] sm:$0xff] %v5238_v6  ;;  %v9353_v8 = vsub.s32 0, %v5238_v6  ;;  %v1830_v9 = vmax.f32 %v1829_v5, %v5233_v4  ;;  %v5268_v14 = vld [vmem:[%s9339_s3 + $0x110] sm:$0xff]  ;;  %v5286_v19 = vld [vmem:[%s9339_s3 + $0xc0] sm:$0xff]  ;;  %v1842_v33 = vmax.f32 %v1841_v27, %v5313_v26  ;;  %v5340_v36 = vld [vmem:[%s9339_s3 + $0x118] sm:$0xff]  ;;  %v9352_v40 = vsub.s32 1, %v5238_v6 }
   0x8   :  { %v5281_v18 = vld [vmem:[%s9339_s3 + $0x150] sm:$0xff]  ;;  %v1806_v21 = vmax.f32 %v1805_v17, %v5273_v15  ;;  %v5308_v25 = vld [vmem:[%s9339_s3 + $0x100] sm:$0xff]  ;;  %v5359_v43 = vld [vmem:[%s9339_s3 + $0x158] sm:$0xff]  ;;  %v9351_v61 = vsub.s32 2, %v5238_v6  ;;  %v9350_v62 = vsub.s32 3, %v5238_v6  ;;  %vm4105_vm14 = vcmask 1044480  }
   0x9   :  { %v2648_v12 = vrot.slane %v5243_v7, %v9353_v8  ;;  %v1831_v16 = vmax.f32 %v1830_v9, %v5250_v10  ;;  %v5303_v24 = vld [vmem:[%s9339_s3 + $0x190] sm:$0xff]  ;;  %v5332_v32 = vld [vmem:[%s9339_s3 + $0x140] sm:$0xff]  ;;  %v1843_v39 = vmax.f32 %v1842_v33, %v5322_v30  ;;  %v5377_v49 = vld [vmem:[%s9339_s3 + $0x8] sm:$0xff]  ;;  %v5398_v54 = vrot.slane %v5243_v7, %v9352_v40 }
   0xa   :  { %v1807_v29 = vmax.f32 %v1806_v21, %v5286_v19  ;;  %v5327_v31 = vld [vmem:[%s9339_s3 + $0x1d0] sm:$0xff]  ;;  %v5350_v38 = vld [vmem:[%s9339_s3 + $0x180] sm:$0xff]  ;;  %v5382_v50 = vld [vmem:[%s9339_s3 + $0x48] sm:$0xff]  ;;  %v2857_v33 = vsub.s32 6, %v5238_v6  ;;  %vm4177_vm15 = vcmask 1043456  }
   0xb   :  { %2658 = vbcast.lane.b32.xlu1 %v2648_v12, 272  ;;  %2650 = vbcast.lane.b32.xlu0 %v2648_v12, 256  ;;  %v1832_v20 = vmax.f32 %v1831_v16, %v5268_v14  ;;  %v5345_v37 = vld [vmem:[%s9339_s3 + $0x210] sm:$0xff]  ;;  %v5369_v45 = vld [vmem:[%s9339_s3 + $0x1c0] sm:$0xff]  ;;  %v1844_v46 = vmax.f32 %v1843_v39, %v5340_v36  ;;  %v5405_v57 = vld [vmem:[%s9339_s3 + $0x198] sm:$0xff]  ;;  %v1817_v60 = vmax.f32 %v5377_v49, %v5382_v50  ;;  %v2822_v16 = vsub.s32 5, %v5238_v6 }
   0xc   :  { %v1808_v35 = vmax.f32 %v1807_v29, %v5308_v25  ;;  %v5364_v44 = vld [vmem:[%s9339_s3 + $0x250] sm:$0xff]  ;;  %v5392_v52 = vld [vmem:[%s9339_s3 + $0x200] sm:$0xff]  ;;  %v5426_v9 = vld [vmem:[%s9339_s3 + $0x88] sm:$0xff]  ;;  %v5460_v39 = vrot.slane %v5243_v7, %v9350_v62 }
   0xd   :  { %v1833_v28 = vmax.f32 %v1832_v20, %v5281_v18  ;;  %v5387_v51 = vld [vmem:[%s9339_s3 + $0x290] sm:$0xff]  ;;  %v1845_v53 = vmax.f32 %v1844_v46, %v5359_v43  ;;  %v5415_v59 = vld [vmem:[%s9339_s3 + $0x240] sm:$0xff]  ;;  %v5448_v29 = vld [vmem:[%s9339_s3 + $0x1d8] sm:$0xff] }
   0xe   :  { %v1809_v42 = vmax.f32 %v1808_v35, %v5332_v32  ;;  %v5410_v58 = vld [vmem:[%s9339_s3 + $0x2d0] sm:$0xff]  ;;  %v5442_v27 = vld [vmem:[%s9339_s3 + $0x280] sm:$0xff]  ;;  %v5455_v35 = vrot.slane %v5243_v7, %v9351_v61  ;;  %v5469_v46 = vld [vmem:[%s9339_s3 + $0xc8] sm:$0xff] }
   0xf   :  { %2662 = vbcast.lane.b32.xlu1 %v2648_v12, 280  ;;  %2654 = vbcast.lane.b32.xlu0 %v2648_v12, 264  ;;  %v1834_v34 = vmax.f32 %v1833_v28, %v5303_v24  ;;  %v5433_v17 = vld [vmem:[%s9339_s3 + $0x310] sm:$0xff]  ;;  %v1846_v20 = vmax.f32 %v1845_v53, %v5405_v57  ;;  %v5537_v8 = vld [vmem:[%s9339_s3 + $0x108] sm:$0xff]  ;;  %v5555_v0 = vld [vmem:[%s9338_s2 + $0x18] sm:$0xff] }
  0x10   :  { %v1810_v48 = vmax.f32 %v1809_v42, %v5350_v38 }
  0x11   :  { %v1835_v41 = vmax.f32 %v1834_v34, %v5327_v31  ;;  %v1818_v34 = vmax.f32 %v1817_v60, %v5426_v9  ;;  %v1847_v60 = vmax.f32 %v1846_v20, %v5448_v29  ;;  %v5505_v20 = vrot.slane %v5243_v7, %v2857_v33 }
  0x12   :  { %v1811_v56 = vmax.f32 %v1810_v48, %v5369_v45  ;;  %v5479_v48 = vld [vmem:[%s9339_s3 + $0x68] sm:$0xff] }
  0x13   :  { %2670 = vbcast.lane.b32.xlu1 %v2648_v12, 296  ;;  %2666 = vbcast.lane.b32.xlu0 %v2648_v12, 288  ;;  %v1836_v47 = vmax.f32 %v1835_v41, %v5345_v37  ;;  %v2892_v41 = vsub.s32 7, %v5238_v6  ;;  %9529 = vst [vmem:[#allocation40_spill] sm:$0xff] %v5505_v20  ;;  %v5566_v20 = vld [vmem:[%s9339_s3 + $0x300] sm:$0xff] }
  0x14   :  { %v1812_v5 = vmax.f32 %v1811_v56, %v5392_v52 }
  0x15   :  { %v1837_v55 = vmax.f32 %v1836_v47, %v5364_v44  ;;  %v5474_v47 = vld [vmem:[%s9339_s3 + $0x28] sm:$0xff]  ;;  %v5524_v62 = vrot.slane %v5243_v7, %v2892_v41  ;;  %v5550_v41 = vld [vmem:[%s9339_s3 + $0x258] sm:$0xff] }
  0x16   :  { %v1813_v28 = vmax.f32 %v1812_v5, %v5415_v59  ;;  %v1865_v33 = vmax.f32 %v5474_v47, %v5479_v48 }
  0x17   :  { %2678 = vbcast.lane.b32.xlu1 %v2648_v12, 312  ;;  %2674 = vbcast.lane.b32.xlu0 %v2648_v12, 304  ;;  %v1838_v63 = vmax.f32 %v1837_v55, %v5387_v51  ;;  %v9349_v12 = vsub.s32 4, %v5238_v6  ;;  %v5487_v55 = vrot.slane %v5243_v7, %v2822_v16  ;;  %v5502_v16 = vld [vmem:[%s9339_s3 + $0x218] sm:$0xff]  ;;  %9530 = vst [vmem:[#allocation41_spill] sm:$0xff] %v5524_v62 }
  0x18   :  { %v1814_v56 = vmax.f32 %v1813_v28, %v5442_v27  ;;  %v4606_v28 = vld [vmem:[%s9338_s2 + $0x10] sm:$0xff] }
  0x19   :  { %v1839_v21 = vmax.f32 %v1838_v63, %v5410_v58  ;;  %v5484_v53 = vrot.slane %v5243_v7, %v9349_v12  ;;  %9528 = vst [vmem:[#allocation39_spill] sm:$0xff] %v5487_v55  ;;  %v1819_v12 = vmax.f32 %v1818_v34, %v5469_v46  ;;  %v5529_v61 = vmul.f32 %v4606_v28, %v5223_v2  ;;  %v4605_v34 = vld [vmem:[%s9338_s2 + $0x8] sm:$0xff] }
  0x1a   :  { %v5545_v7 = vld [vmem:[%s9339_s3 + $0xa8] sm:$0xff] }
  0x1b   :  { %2689 = vbcast.lane.b32.xlu1 %v5398_v54, 264  ;;  %2685 = vbcast.lane.b32.xlu0 %v5398_v54, 256  ;;  %v5464_v42 = vmax.f32 %v1839_v21, %v5433_v17  ;;  %9531 = vst [vmem:[#allocation42_spill] sm:$0xff] %v5529_v61  ;;  %v1848_v61 = vmax.f32 %v1847_v60, %v5502_v16 }
  0x1c   :  { %v5570_v60 = vmul.f32 %v5555_v0, %v5293_v22  ;;  %v1866_v55 = vmax.f32 %v1865_v33, %v5545_v7 }
  0x1d   :  { %9527 = vst [vmem:[#allocation38_spill] sm:$0xff] %v5464_v42  ;;  %v1903_v63 = vsub.f32 %v5223_v2, %v5464_v42  ;;  %v1911_v5 = vsub.f32 %v5228_v3, %v5464_v42  ;;  %v1919_v21 = vsub.f32 %v5233_v4, %v5464_v42  ;;  %v1927_v1 = vsub.f32 %v5250_v10, %v5464_v42  ;;  %v5515_v3 = vld [vmem:[%s9339_s3 + $0x2c0] sm:$0xff] }
  0x1e   :  { %v668_v4 = vld [vmem:[%s9338_s2] sm:$0xff]  ;;  %v1935_v10 = vsub.f32 %v5268_v14, %v5464_v42  ;;  %v1815_v62 = vmax.f32 %v1814_v56, %v5515_v3  ;;  %9533 = vst [vmem:[#allocation44_spill] sm:$0xff] %v5570_v60  ;;  %v5579_v56 = vld [vmem:[%s9339_s3 + $0x148] sm:$0xff]  ;;  %v1849_v33 = vmax.f32 %v1848_v61, %v5550_v41 }
  0x1f   :  { %2697 = vbcast.lane.b32.xlu1 %v5398_v54, 280  ;;  %2693 = vbcast.lane.b32.xlu0 %v5398_v54, 272  ;;  %v5532_v40 = vmul.f32 %v668_v4, %v5255_v11  ;;  %v2009_v14 = vmul.f32 1.442695, %v1903_v63  ;;  %v2025_v2 = vmul.f32 1.442695, %v1911_v5  ;;  %v1943_v63 = vsub.f32 %v5281_v18, %v5464_v42 }
  0x20   :  { %v2041_v5 = vmul.f32 1.442695, %v1919_v21  ;;  %v2057_v6 = vmul.f32 1.442695, %v1927_v1  ;;  %v1951_v18 = vsub.f32 %v5303_v24, %v5464_v42  ;;  %v2073_v1 = vmul.f32 1.442695, %v1935_v10 }
  0x21   :  { %9532 = vst [vmem:[#allocation43_spill] sm:$0xff] %v5532_v40  ;;  %v3606_v40 = vadd.f32 %v4605_v34, %v668_v4  ;;  %4753 = vpow2.f32 %v2009_v14  ;;  %v1820_v4 = vmax.f32 %v1819_v12, %v5537_v8  ;;  %v5582_v21 = vmul.f32 %v4605_v34, %v5377_v49  ;;  %v5587_v14 = vld [vmem:[%s9339_s3 + $0xe8] sm:$0xff]  ;;  %v5594_v24 = vld [vmem:[%s9339_s3 + $0x298] sm:$0xff]  ;;  %v5619_v61 = vld [vmem:[%s9339_s3 + $0x60] sm:$0xff] }
  0x22   :  { %4755 = vpow2.f32 %v2025_v2  ;;  %9535 = vst [vmem:[#allocation46_spill] sm:$0xff] %v5587_v14  ;;  %v1959_v12 = vsub.f32 %v5327_v31, %v5464_v42  ;;  %v5602_v34 = vld [vmem:[%s9338_s2 + $0x28] sm:$0xff]  ;;  %v1967_v31 = vsub.f32 %v5345_v37, %v5464_v42  ;;  %v2089_v2 = vmul.f32 1.442695, %v1943_v63  ;;  %9538 = vst [vmem:[#allocation49_spill] sm:$0xff] %v5619_v61 }
  0x23   :  { %2705 = vbcast.lane.b32.xlu1 %v5398_v54, 296  ;;  %2701 = vbcast.lane.b32.xlu0 %v5398_v54, 288  ;;  %9534 = vst [vmem:[#allocation45_spill] sm:$0xff] %v5582_v21  ;;  %4757 = vpow2.f32 %v2041_v5  ;;  %v5597_v10 = vadd.f32 %v4606_v28, %v3606_v40  ;;  %9536 = vst [vmem:[#allocation47_spill] sm:$0xff] %v5602_v34  ;;  %v5609_v5 = vmax.f32 %v1815_v62, %v5566_v20  ;;  %v5614_v40 = vld [vmem:[%s9339_s3 + $0x20] sm:$0xff] }
  0x24   :  { %4759 = vpow2.f32 %v2057_v6  ;;  %v1821_v37 = vmax.f32 %v1820_v4, %v5579_v56  ;;  %v1867_v6 = vmax.f32 %v1866_v55, %v5587_v14  ;;  %v5627_v62 = vmul.f32 %v5602_v34, %v5474_v47  ;;  %v5641_v55 = vld [vmem:[%s9339_s3 + $0x128] sm:$0xff] }
  0x25   :  { %9537 = vst [vmem:[#allocation48_spill] sm:$0xff] %v5609_v5  ;;  %v1983_v28 = vsub.f32 %v5387_v51, %v5464_v42  ;;  %4761 = vpow2.f32 %v2073_v1  ;;  %v2105_v63 = vmul.f32 1.442695, %v1951_v18  ;;  %v1901_v60 = vsub.f32 %v5255_v11, %v5609_v5  ;;  %9540 = vst [vmem:[#allocation51_spill] sm:$0xff] %v5641_v55  ;;  %v5705_v14 = vld [vmem:[%s9339_s3 + $0x168] sm:$0xff] }
  0x26   :  { %9539 = vst [vmem:[#allocation50_spill] sm:$0xff] %v5627_v62  ;;  %v2121_v4 = vmul.f32 1.442695, %v1959_v12  ;;  %v1909_v62 = vsub.f32 %v5263_v13, %v5609_v5  ;;  %v1850_v51 = vmax.f32 %v1849_v33, %v5594_v24  ;;  %v1853_v18 = vmax.f32 %v5614_v40, %v5619_v61  ;;  %v5657_v13 = vld [vmem:[%s9339_s3 + $0x2d8] sm:$0xff] }
  0x27   :  { %2713 = vbcast.lane.b32.xlu1 %v5398_v54, 312  ;;  %2709 = vbcast.lane.b32.xlu0 %v5398_v54, 304  ;;  %v1975_v54 = vsub.f32 %v5364_v44, %v5464_v42  ;;  %v5636_v44 = vld [vmem:[%s9339_s3 + $0x188] sm:$0xff]  ;;  %v1991_v11 = vsub.f32 %v5410_v58, %v5464_v42  ;;  %4763 = vpow2.f32 %v2089_v2  ;;  %v2137_v1 = vmul.f32 1.442695, %v1967_v31  ;;  %v5670_v58 = vld [vmem:[%s9339_s3 + $0xa0] sm:$0xff] }
  0x28   :  { %v1917_v12 = vsub.f32 %v5273_v15, %v5609_v5  ;;  %v1925_v21 = vsub.f32 %v5286_v19, %v5609_v5  ;;  %v5662_v34 = vmax.f32 %v1821_v37, %v5636_v44  ;;  %v5665_v61 = vmax.f32 %v1867_v6, %v5641_v55  ;;  %9541 = vst [vmem:[#allocation52_spill] sm:$0xff] %v5670_v58  ;;  %v5681_v6 = vld [vmem:[%s9339_s3 + $0x318] sm:$0xff] }
  0x29   :  { %v2153_v33 = vmul.f32 1.442695, %v1975_v54  ;;  %v1999_v15 = vsub.f32 %v5433_v17, %v5464_v42  ;;  %4765 = vpow2.f32 %v2105_v63  ;;  %v2169_v31 = vmul.f32 1.442695, %v1983_v28  ;;  %v5687_v17 = vld [vmem:[%s9339_s3 + $0x1c8] sm:$0xff] }
  0x2a   :  { %v2005_v2 = vmul.f32 1.442695, %v1901_v60  ;;  %4767 = vpow2.f32 %v2121_v4  ;;  %v1933_v19 = vsub.f32 %v5308_v25, %v5609_v5  ;;  %v2021_v37 = vmul.f32 1.442695, %v1909_v62 }
  0x2b   :  { %2724 = vbcast.lane.b32.xlu1 %v5455_v35, 264  ;;  %2720 = vbcast.lane.b32.xlu0 %v5455_v35, 256  ;;  %v5674_v54 = vpop.eup %4753  ;;  %v1851_v55 = vmax.f32 %v1850_v51, %v5657_v13  ;;  %4769 = vpow2.f32 %v2137_v1  ;;  %v2185_v25 = vmul.f32 1.442695, %v1991_v11  ;;  %v2037_v62 = vmul.f32 1.442695, %v1917_v12 }
  0x2c   :  { %v5689_v60 = vpop.eup %4755  ;;  %v5694_v28 = vmax.f32 %v1853_v18, %v5670_v58  ;;  %4771 = vpow2.f32 %v2153_v33  ;;  %v1941_v51 = vsub.f32 %v5332_v32, %v5609_v5  ;;  %v2053_v42 = vmul.f32 1.442695, %v1925_v21  ;;  %v5710_v18 = vld [vmem:[%s9339_s3 + $0xe0] sm:$0xff] }
  0x2d   :  { %9542 = vst [vmem:[#allocation53_spill] sm:$0xff] %v5689_v60  ;;  %v5696_v63 = vpop.eup %4757  ;;  %v2237_v4 = vadd.f32 %v5689_v60, %v5674_v54  ;;  %v2201_v1 = vmul.f32 1.442695, %v1999_v15  ;;  %v1949_v12 = vsub.f32 %v5350_v38, %v5609_v5  ;;  %4773 = vpow2.f32 %v2005_v2  ;;  %v5725_v58 = vld [vmem:[%s9338_s2 + $0x20] sm:$0xff] }
  0x2e   :  { %9543 = vst [vmem:[#allocation54_spill] sm:$0xff] %v5696_v63  ;;  %v5712_v11 = vpop.eup %4759  ;;  %v1823_v32 = vmax.f32 %v5662_v34, %v5687_v17  ;;  %4775 = vpow2.f32 %v2021_v37  ;;  %v2069_v33 = vmul.f32 1.442695, %v1933_v19  ;;  %v5720_v60 = vmax.f32 %v1851_v55, %v5681_v6 }
  0x2f   :  { %2732 = vbcast.lane.b32.xlu1 %v5455_v35, 280  ;;  %2728 = vbcast.lane.b32.xlu0 %v5455_v35, 272  ;;  %9544 = vst [vmem:[#allocation55_spill] sm:$0xff] %v5712_v11  ;;  %v2238_v21 = vadd.f32 %v5696_v63, %v2237_v4  ;;  %v5727_v15 = vpop.eup %4761  ;;  %4777 = vpow2.f32 %v2037_v62  ;;  %v5737_v55 = vmul.f32 %v5725_v58, %v5614_v40  ;;  %v2085_v37 = vmul.f32 1.442695, %v1941_v51 }
  0x30   :  { %9545 = vst [vmem:[#allocation56_spill] sm:$0xff] %v5720_v60  ;;  %9546 = vst [vmem:[#allocation57_spill] sm:$0xff] %v5727_v15  ;;  %v1957_v19 = vsub.f32 %v5369_v45, %v5609_v5  ;;  %4779 = vpow2.f32 %v2053_v42  ;;  %v1965_v62 = vsub.f32 %v5392_v52, %v5609_v5  ;;  %v1973_v34 = vsub.f32 %v5415_v59, %v5609_v5 }
  0x31   :  { %9547 = vst [vmem:[#allocation58_spill] sm:$0xff] %v5737_v55  ;;  %v2239_v2 = vadd.f32 %v5712_v11, %v2238_v21  ;;  %v5742_v4 = vpop.eup %4763  ;;  %4781 = vpow2.f32 %v2169_v31  ;;  %v1981_v38 = vsub.f32 %v5442_v27, %v5609_v5  ;;  %v2101_v21 = vmul.f32 1.442695, %v1949_v12 }
  0x32   :  { %9548 = vst [vmem:[#allocation59_spill] sm:$0xff] %v5742_v4  ;;  %4783 = vpow2.f32 %v2069_v33  ;;  %v1904_v45 = vsub.f32 %v5293_v22, %v5720_v60  ;;  %v1989_v52 = vsub.f32 %v5515_v3, %v5609_v5  ;;  %v1997_v59 = vsub.f32 %v5566_v20, %v5609_v5 }
  0x33   :  { %2740 = vbcast.lane.b32.xlu1 %v5455_v35, 296  ;;  %2736 = vbcast.lane.b32.xlu0 %v5455_v35, 288  ;;  %v2240_v63 = vadd.f32 %v5727_v15, %v2239_v2  ;;  %v5753_v42 = vpop.eup %4765  ;;  %4785 = vpow2.f32 %v2185_v25  ;;  %v1912_v27 = vsub.f32 %v5298_v23, %v5720_v60  ;;  %v2117_v51 = vmul.f32 1.442695, %v1957_v19  ;;  %v5783_v19 = vld [vmem:[%s9339_s3 + $0x248] sm:$0xff] }
  0x34   :  { %9549 = vst [vmem:[#allocation60_spill] sm:$0xff] %v5753_v42  ;;  %v5763_v31 = vpop.eup %4767  ;;  %4787 = vpow2.f32 %v2085_v37  ;;  %v1920_v12 = vsub.f32 %v5313_v26, %v5720_v60  ;;  %v2133_v20 = vmul.f32 1.442695, %v1965_v62  ;;  %v2149_v25 = vmul.f32 1.442695, %v1973_v34 }
  0x35   :  { %9550 = vst [vmem:[#allocation61_spill] sm:$0xff] %v5763_v31  ;;  %v2241_v22 = vadd.f32 %v5742_v4, %v2240_v63  ;;  %v5773_v3 = vpop.eup %4769  ;;  %4789 = vpow2.f32 %v2201_v1  ;;  %v1928_v23 = vsub.f32 %v5322_v30, %v5720_v60  ;;  %v2165_v2 = vmul.f32 1.442695, %v1981_v38  ;;  %v5839_v4 = vld [vmem:[%s9339_s3 + $0x308] sm:$0xff] }
  0x36   :  { %9551 = vst [vmem:[#allocation62_spill] sm:$0xff] %v5773_v3  ;;  %v5777_v33 = vpop.eup %4771  ;;  %4791 = vpow2.f32 %v2101_v21  ;;  %v2011_v26 = vmul.f32 1.442695, %v1904_v45  ;;  %v5789_v1 = vmul.f32 1.442695, %v1989_v52  ;;  %v1936_v30 = vsub.f32 %v5340_v36, %v5720_v60  ;;  %v5802_v52 = vld [vmem:[%s9339_s3 + $0x288] sm:$0xff] }
  0x37   :  { %2748 = vbcast.lane.b32.xlu1 %v5455_v35, 312  ;;  %2744 = vbcast.lane.b32.xlu0 %v5455_v35, 304  ;;  %v5771_v35 = vld [vmem:[%s9339_s3 + $0x208] sm:$0xff]  ;;  %9552 = vst [vmem:[#allocation63_spill] sm:$0xff] %v5777_v33  ;;  %v2242_v63 = vadd.f32 %v5753_v42, %v2241_v22  ;;  %v5785_v37 = vpop.eup %4773  ;;  %v2027_v34 = vmul.f32 1.442695, %v1912_v27  ;;  %4793 = vpow2.f32 %v2117_v51  ;;  %v1944_v45 = vsub.f32 %v5359_v43, %v5720_v60 }
  0x38   :  { %v1824_v38 = vmax.f32 %v1823_v32, %v5771_v35  ;;  %v5794_v62 = vpop.eup %4775  ;;  %v2043_v22 = vmul.f32 1.442695, %v1920_v12  ;;  %4795 = vpow2.f32 %v2133_v20  ;;  %v2059_v32 = vmul.f32 1.442695, %v1928_v23  ;;  %v5822_v20 = vld [vmem:[%s9339_s3 + $0x1a8] sm:$0xff] }
  0x39   :  { %v2243_v21 = vadd.f32 %v5763_v31, %v2242_v63  ;;  %v5804_v5 = vpop.eup %4777  ;;  %v2213_v36 = vadd.f32 %v5794_v62, %v5785_v37  ;;  %v2197_v43 = vmul.f32 1.442695, %v1997_v59  ;;  %v1952_v12 = vsub.f32 %v5405_v57, %v5720_v60  ;;  %v5817_v31 = vld [vmem:[%s9339_s3 + $0x2c8] sm:$0xff] }
  0x3a   :  { %9553 = vst [vmem:[#allocation64_spill] sm:$0xff] %v5804_v5  ;;  %v1825_v27 = vmax.f32 %v1824_v38, %v5783_v19  ;;  %v5809_v63 = vpop.eup %4779  ;;  %4797 = vpow2.f32 %v2011_v26  ;;  %v2075_v57 = vmul.f32 1.442695, %v1936_v30  ;;  %v2091_v42 = vmul.f32 1.442695, %v1944_v45 }
  0x3b   :  { %2759 = vbcast.lane.b32.xlu1 %v5460_v39, 264  ;;  %2755 = vbcast.lane.b32.xlu0 %v5460_v39, 256  ;;  %9554 = vst [vmem:[#allocation65_spill] sm:$0xff] %v5809_v63  ;;  %v2244_v51 = vadd.f32 %v5773_v3, %v2243_v21  ;;  %v5824_v23 = vpop.eup %4781  ;;  %v2214_v59 = vadd.f32 %v5804_v5, %v2213_v36  ;;  %4799 = vpow2.f32 %v2027_v34  ;;  %v6437_v5 = vld [vmem:[%s9336_s0 + $0x8] sm:$0x1f] }
  0x3c   :  { %9555 = vst [vmem:[#allocation66_spill] sm:$0xff] %v5824_v23  ;;  %v1826_v26 = vmax.f32 %v1825_v27, %v5802_v52  ;;  %v5830_v38 = vpop.eup %4783  ;;  %v1960_v21 = vsub.f32 %v5448_v29, %v5720_v60  ;;  %v1968_v3 = vsub.f32 %v5502_v16, %v5720_v60  ;;  %4801 = vpow2.f32 %v2043_v22  ;;  %9630 = vst [vmem:[#allocation121_spill] sm:$0xff] %v6437_v5 }
  0x3d   :  { %9556 = vst [vmem:[#allocation67_spill] sm:$0xff] %v5830_v38  ;;  %v5841_v36 = vpop.eup %4785  ;;  %v2215_v30 = vadd.f32 %v5809_v63, %v2214_v59  ;;  %4803 = vpow2.f32 %v2059_v32  ;;  %v9558_v29 = vmax.f32 %v5665_v61, %v5705_v14  ;;  %v2245_v45 = vadd.f32 %v5777_v33, %v2244_v51  ;;  %v5859_v32 = vld [vmem:[%s9339_s3 + $0x1e8] sm:$0xff]  ;;  %v5864_v61 = vld [vmem:[%s9339_s3 + $0x120] sm:$0xff] }
  0x3e   :  { %9557 = vst [vmem:[#allocation68_spill] sm:$0xff] %v5841_v36  ;;  %v1827_v34 = vmax.f32 %v1826_v26, %v5817_v31  ;;  %v5849_v16 = vpop.eup %4787  ;;  %4805 = vpow2.f32 %v2149_v25  ;;  %v1976_v22 = vsub.f32 %v5550_v41, %v5720_v60  ;;  %v1984_v15 = vsub.f32 %v5594_v24, %v5720_v60 }
  0x3f   :  { %2767 = vbcast.lane.b32.xlu1 %v5460_v39, 280  ;;  %2763 = vbcast.lane.b32.xlu0 %v5460_v39, 272  ;;  %v1870_v27 = vmax.f32 %v9558_v29, %v5822_v20  ;;  %9559 = vst [vmem:[#allocation69_spill] sm:$0xff] %v5849_v16  ;;  %v5866_v59 = vpop.eup %4789  ;;  %v2216_v41 = vadd.f32 %v5830_v38, %v2215_v30  ;;  %4807 = vpow2.f32 %v2075_v57  ;;  %v2107_v24 = vmul.f32 1.442695, %v1952_v12 }
  0x40   :  { %9560 = vst [vmem:[#allocation70_spill] sm:$0xff] %v5866_v59  ;;  %v5872_v25 = vmax.f32 %v1827_v34, %v5839_v4  ;;  %v5874_v51 = vpop.eup %4791  ;;  %4809 = vpow2.f32 %v2165_v2  ;;  %v1992_v26 = vsub.f32 %v5657_v13, %v5720_v60  ;;  %v2000_v29 = vsub.f32 %v5681_v6, %v5720_v60 }
  0x41   :  { %9562 = vst [vmem:[#allocation72_spill] sm:$0xff] %v5874_v51  ;;  %v2123_v33 = vmul.f32 1.442695, %v1960_v21  ;;  %v2217_v11 = vadd.f32 %v5849_v16, %v2216_v41  ;;  %4811 = vpow2.f32 %v2091_v42  ;;  %v1871_v30 = vmax.f32 %v1870_v27, %v5859_v32  ;;  %v5888_v34 = vpop.eup %4793  ;;  %v5895_v42 = vld [vmem:[%s9339_s3 + $0x228] sm:$0xff]  ;;  %v5900_v21 = vld [vmem:[%s9339_s3 + $0x160] sm:$0xff] }
  0x42   :  { %9561 = vst [vmem:[#allocation71_spill] sm:$0xff] %v5872_v25  ;;  %v9563_v12 = vmax.f32 %v5694_v28, %v5710_v18  ;;  %9564 = vst [vmem:[#allocation73_spill] sm:$0xff] %v5888_v34  ;;  %v2246_v2 = vadd.f32 %v5824_v23, %v2245_v45  ;;  %4813 = vpow2.f32 %v5789_v1  ;;  %v2139_v13 = vmul.f32 1.442695, %v1968_v3  ;;  %v5902_v28 = vpop.eup %4795 }
  0x43   :  { %2775 = vbcast.lane.b32.xlu1 %v5460_v39, 296  ;;  %2771 = vbcast.lane.b32.xlu0 %v5460_v39, 288  ;;  %v2155_v6 = vmul.f32 1.442695, %v1976_v22  ;;  %9565 = vst [vmem:[#allocation74_spill] sm:$0xff] %v5902_v28  ;;  %v2218_v1 = vadd.f32 %v5874_v51, %v2217_v11  ;;  %4815 = vpow2.f32 %v2107_v24  ;;  %v1902_v3 = vsub.f32 %v5377_v49, %v5872_v25 }
  0x44   :  { %v5886_v57 = vmax.f32 %v9563_v12, %v5864_v61  ;;  %v1910_v27 = vsub.f32 %v5382_v50, %v5872_v25  ;;  %v5911_v45 = vpop.eup %4797  ;;  %4817 = vpow2.f32 %v2197_v43  ;;  %v2171_v22 = vmul.f32 1.442695, %v1984_v15 }
  0x45   :  { %v1918_v41 = vsub.f32 %v5426_v9, %v5872_v25  ;;  %v1926_v12 = vsub.f32 %v5469_v46, %v5872_v25  ;;  %4819 = vpow2.f32 %v2123_v33  ;;  %v5919_v11 = vmul.f32 1.442695, %v1992_v26  ;;  %v5934_v33 = vld [vmem:[%s9339_s3 + $0x268] sm:$0xff] }
  0x46   :  { %v1872_v49 = vmax.f32 %v1871_v30, %v5895_v42  ;;  %v1857_v50 = vmax.f32 %v5886_v57, %v5900_v21  ;;  %v2219_v15 = vadd.f32 %v5888_v34, %v2218_v1  ;;  %4821 = vpow2.f32 %v2139_v13  ;;  %v5949_v34 = vld [vmem:[%s9339_s3 + $0x1a0] sm:$0xff] }
  0x47   :  { %2783 = vbcast.lane.b32.xlu1 %v5460_v39, 312  ;;  %2779 = vbcast.lane.b32.xlu0 %v5460_v39, 304  ;;  %v5917_v39 = vpop.eup %4799  ;;  %v1934_v46 = vsub.f32 %v5537_v8, %v5872_v25  ;;  %v2247_v26 = vadd.f32 %v5841_v36, %v2246_v2  ;;  %4823 = vpow2.f32 %v2155_v6  ;;  %v2007_v30 = vmul.f32 1.442695, %v1902_v3 }
  0x48   :  { %v5924_v24 = vpop.eup %4801  ;;  %v2249_v9 = vadd.f32 %v5917_v39, %v5911_v45  ;;  %v2023_v57 = vmul.f32 1.442695, %v1910_v27  ;;  %v1942_v1 = vsub.f32 %v5579_v56, %v5872_v25  ;;  %v2039_v60 = vmul.f32 1.442695, %v1918_v41 }
  0x49   :  { %9566 = vst [vmem:[#allocation75_spill] sm:$0xff] %v5924_v24  ;;  %v5936_v43 = vpop.eup %4803  ;;  %v2055_v23 = vmul.f32 1.442695, %v1926_v12  ;;  %v2203_v2 = vmul.f32 1.442695, %v2000_v29  ;;  %v1950_v6 = vsub.f32 %v5636_v44, %v5872_v25  ;;  %4825 = vpow2.f32 %v2007_v30  ;;  %v5968_v44 = vld [vmem:[%s9339_s3 + $0x38] sm:$0xff] }
  0x4a   :  { %9567 = vst [vmem:[#allocation76_spill] sm:$0xff] %v5936_v43  ;;  %v5941_v13 = vpop.eup %4805  ;;  %v2250_v8 = vadd.f32 %v5924_v24, %v2249_v9  ;;  %v1873_v3 = vmax.f32 %v1872_v49, %v5934_v33  ;;  %v2220_v56 = vadd.f32 %v5902_v28, %v2219_v15  ;;  %4827 = vpow2.f32 %v2023_v57  ;;  %v5963_v9 = vld [vmem:[%s9339_s3 + $0x2a8] sm:$0xff]  ;;  %v5973_v29 = vld [vmem:[%s9339_s3 + $0x78] sm:$0xff] }
  0x4b   :  { %2794 = vbcast.lane.b32.xlu1 %v5484_v53, 264  ;;  %2790 = vbcast.lane.b32.xlu0 %v5484_v53, 256  ;;  %9568 = vst [vmem:[#allocation77_spill] sm:$0xff] %v5941_v13  ;;  %v5951_v51 = vpop.eup %4807  ;;  %v2071_v12 = vmul.f32 1.442695, %v1934_v46  ;;  %v5980_v15 = vadd.f32 %v5866_v59, %v2247_v26  ;;  %4829 = vpow2.f32 %v2039_v60  ;;  %v1858_v46 = vmax.f32 %v1857_v50, %v5949_v34  ;;  %v5995_v26 = vld [vmem:[%s9339_s3 + $0x2e8] sm:$0xff] }
  0x4c   :  { %9569 = vst [vmem:[#allocation78_spill] sm:$0xff] %v5951_v51  ;;  %v5956_v27 = vpop.eup %4809  ;;  %v2251_v41 = vadd.f32 %v5936_v43, %v2250_v8  ;;  %v5985_v30 = vadd.f32 %v5555_v0, %v5597_v10  ;;  %v1958_v36 = vsub.f32 %v5687_v17, %v5872_v25  ;;  %4831 = vpow2.f32 %v2055_v23  ;;  %v6000_v60 = vld [vmem:[%s9339_s3 + $0x1e0] sm:$0xff]  ;;  %v9611_v24 = vld [vmem:[#allocation47_spill] sm:$0xff] }
  0x4d   :  { %9570 = vst [vmem:[#allocation79_spill] sm:$0xff] %v5956_v27  ;;  %v5975_v49 = vpop.eup %4811  ;;  %9572 = vst [vmem:[#allocation81_spill] sm:$0xff] %v5980_v15  ;;  %v2087_v28 = vmul.f32 1.442695, %v1942_v1  ;;  %4833 = vpow2.f32 %v2171_v22  ;;  %v1966_v10 = vsub.f32 %v5771_v35, %v5872_v25  ;;  %v1874_v17 = vmax.f32 %v1873_v3, %v5963_v9  ;;  %v6016_v22 = vld [vmem:[%s9339_s3 + $0x328] sm:$0xff] }
  0x4e   :  { %9571 = vst [vmem:[#allocation80_spill] sm:$0xff] %v5975_v49  ;;  %v5987_v57 = vpop.eup %4813  ;;  %v2252_v8 = vadd.f32 %v5951_v51, %v2251_v41  ;;  %v2221_v1 = vadd.f32 %v5941_v13, %v2220_v56  ;;  %4835 = vpow2.f32 %v2071_v12  ;;  %v2103_v59 = vmul.f32 1.442695, %v1950_v6 }
  0x4f   :  { %2802 = vbcast.lane.b32.xlu1 %v5484_v53, 280  ;;  %2798 = vbcast.lane.b32.xlu0 %v5484_v53, 272  ;;  %9573 = vst [vmem:[#allocation82_spill] sm:$0xff] %v5987_v57  ;;  %v6002_v0 = vpop.eup %4815  ;;  %4837 = vrcp.f32 %v5980_v15  ;;  %v1974_v35 = vsub.f32 %v5783_v19, %v5872_v25  ;;  %v1875_v3 = vmax.f32 %v1874_v17, %v5995_v26  ;;  %v2119_v23 = vmul.f32 1.442695, %v1958_v36  ;;  %v6035_v15 = vld [vmem:[%s9339_s3 + $0x220] sm:$0xff] }
  0x50   :  { %9574 = vst [vmem:[#allocation83_spill] sm:$0xff] %v6002_v0  ;;  %v6009_v50 = vpop.eup %4817  ;;  %v2253_v41 = vadd.f32 %v5975_v49, %v2252_v8  ;;  %v1859_v6 = vmax.f32 %v1858_v46, %v6000_v60  ;;  %v1982_v8 = vsub.f32 %v5802_v52, %v5872_v25  ;;  %4839 = vpow2.f32 %v2087_v28 }
  0x51   :  { %9575 = vst [vmem:[#allocation84_spill] sm:$0xff] %v6009_v50  ;;  %v6018_v16 = vpop.eup %4819  ;;  %4841 = vpow2.f32 %v5919_v11  ;;  %v1990_v19 = vsub.f32 %v5817_v31, %v5872_v25  ;;  %v6045_v17 = vmax.f32 %v1875_v3, %v6016_v22  ;;  %v2222_v52 = vadd.f32 %v5956_v27, %v2221_v1  ;;  %v9583_v27 = vld [vmem:[#allocation51_spill] sm:$0xff] }
  0x52   :  { %9576 = vst [vmem:[#allocation85_spill] sm:$0xff] %v6018_v16  ;;  %v6027_v56 = vpop.eup %4821  ;;  %v2254_v12 = vadd.f32 %v6002_v0, %v2253_v41  ;;  %4843 = vpow2.f32 %v2103_v59  ;;  %v2135_v28 = vmul.f32 1.442695, %v1966_v10  ;;  %v2151_v31 = vmul.f32 1.442695, %v1974_v35 }
  0x53   :  { %2810 = vbcast.lane.b32.xlu1 %v5484_v53, 296  ;;  %2806 = vbcast.lane.b32.xlu0 %v5484_v53, 288  ;;  %9577 = vst [vmem:[#allocation86_spill] sm:$0xff] %v6027_v56  ;;  %v6037_v13 = vpop.eup %4823  ;;  %9579 = vst [vmem:[#allocation88_spill] sm:$0xff] %v6045_v17  ;;  %4845 = vpow2.f32 %v2203_v2  ;;  %v1906_v11 = vsub.f32 %v5474_v47, %v6045_v17  ;;  %v1860_v3 = vmax.f32 %v1859_v6, %v6035_v15 }
  0x54   :  { %9578 = vst [vmem:[#allocation87_spill] sm:$0xff] %v6037_v13  ;;  %v2255_v36 = vadd.f32 %v6018_v16, %v2254_v12  ;;  %v6049_v41 = vpop.eup %4825  ;;  %4847 = vpow2.f32 %v2119_v23  ;;  %v2167_v59 = vmul.f32 1.442695, %v1982_v8  ;;  %v1914_v10 = vsub.f32 %v5479_v48, %v6045_v17  ;;  %v9581_v23 = vld [vmem:[#allocation46_spill] sm:$0xff]  ;;  %v6077_v48 = vld [vmem:[%s9339_s3 + $0xb8] sm:$0xff] }
  0x55   :  { %v6056_v46 = vpop.eup %4827  ;;  %v2183_v35 = vmul.f32 1.442695, %v1990_v19  ;;  %v1922_v6 = vsub.f32 %v5545_v7, %v6045_v17  ;;  %v1930_v12 = vsub.f32 %v9581_v23, %v6045_v17  ;;  %4849 = vpow2.f32 %v2135_v28  ;;  %v9585_v7 = vld [vmem:[#allocation39_spill] sm:$0xff] }
  0x56   :  { %v2256_v1 = vadd.f32 %v6027_v56, %v2255_v36  ;;  %v6066_v2 = vpop.eup %4829  ;;  %v2225_v47 = vadd.f32 %v6056_v46, %v6049_v41  ;;  %v2223_v36 = vadd.f32 %v5987_v57, %v2222_v52  ;;  %v1938_v56 = vsub.f32 %v9583_v27, %v6045_v17  ;;  %v6098_v27 = vld [vmem:[%s9339_s3 + $0x2a0] sm:$0xff] }
  0x57   :  { %2818 = vbcast.lane.b32.xlu1 %v5484_v53, 312  ;;  %2814 = vbcast.lane.b32.xlu0 %v5484_v53, 304  ;;  %v6064_v53 = vld [vmem:[%s9339_s3 + $0x260] sm:$0xff]  ;;  %9580 = vst [vmem:[#allocation89_spill] sm:$0xff] %v6066_v2  ;;  %v6079_v8 = vpop.eup %4831  ;;  %4851 = vpow2.f32 %v2151_v31  ;;  %v2015_v0 = vmul.f32 1.442695, %v1906_v11  ;;  %v1946_v52 = vsub.f32 %v5705_v14, %v6045_v17  ;;  %v9587_v31 = vmax.f32 %v5968_v44, %v5973_v29 }
  0x58   :  { %9582 = vst [vmem:[#allocation46_spill] sm:$0xff] %v6079_v8  ;;  %v2257_v19 = vadd.f32 %v6037_v13, %v2256_v1  ;;  %v6085_v16 = vpop.eup %4833  ;;  %v2226_v23 = vadd.f32 %v6066_v2, %v2225_v47  ;;  %v1861_v49 = vmax.f32 %v1860_v3, %v6064_v53  ;;  %4853 = vpow2.f32 %v2167_v59  ;;  %v5051_v2 = vld [vmem:[%s9339_s3 + $0x48] sm:$0xff] }
  0x59   :  { %9584 = vst [vmem:[#allocation51_spill] sm:$0xff] %v6085_v16  ;;  %v6091_v51 = vpop.eup %4835  ;;  %v2031_v28 = vmul.f32 1.442695, %v1914_v10  ;;  %v1890_v1 = vmax.f32 %v9587_v31, %v6077_v48  ;;  %4855 = vpow2.f32 %v2015_v0  ;;  %v2047_v59 = vmul.f32 1.442695, %v1922_v6  ;;  %v6115_v31 = vld [vmem:[%s9339_s3 + $0xf8] sm:$0xff] }
  0x5a   :  { %9586 = vst [vmem:[#allocation39_spill] sm:$0xff] %v6091_v51  ;;  %v6104_v11 = vpop.eup %4837  ;;  %v2227_v3 = vadd.f32 %v6079_v8, %v2226_v23  ;;  %v2063_v47 = vmul.f32 1.442695, %v1930_v12  ;;  %v2258_v14 = vadd.f32 %v6085_v16, %v2257_v19  ;;  %v1954_v10 = vsub.f32 %v5822_v20, %v6045_v17  ;;  %v6125_v20 = vld [vmem:[%s9339_s3 + $0x2e0] sm:$0xff]  ;;  %v6135_v12 = vld [vmem:[%s9338_s2 + $0x38] sm:$0xff] }
  0x5b   :  { %2829 = vbcast.lane.b32.xlu1 %v9585_v7, 264  ;;  %2825 = vbcast.lane.b32.xlu0 %v9585_v7, 256  ;;  %9588 = vst [vmem:[#allocation90_spill] sm:$0xff] %v6104_v11  ;;  %v6107_v57 = vpop.eup %4839  ;;  %4857 = vpow2.f32 %v2031_v28  ;;  %v2079_v13 = vmul.f32 1.442695, %v1938_v56  ;;  %v1862_v56 = vmax.f32 %v1861_v49, %v6098_v27  ;;  %v6130_v6 = vadd.f32 %v5725_v58, %v5985_v30  ;;  %v6147_v58 = vld [vmem:[%s9339_s3 + $0x30] sm:$0xff] }
  0x5c   :  { %9589 = vst [vmem:[#allocation91_spill] sm:$0xff] %v6107_v57  ;;  %v6117_v38 = vpop.eup %4841  ;;  %v2228_v0 = vadd.f32 %v6091_v51, %v2227_v3  ;;  %4859 = vpow2.f32 %v2047_v59  ;;  %v9592_v23 = vsub.f32 %v5839_v4, %v5872_v25  ;;  %v1962_v3 = vsub.f32 %v5859_v32, %v6045_v17  ;;  %v6152_v30 = vld [vmem:[%s9339_s3 + $0x70] sm:$0xff] }
  0x5d   :  { %9590 = vst [vmem:[#allocation92_spill] sm:$0xff] %v6117_v38  ;;  %v6137_v19 = vpop.eup %4843  ;;  %4861 = vpow2.f32 %v2063_v47  ;;  %v2095_v49 = vmul.f32 1.442695, %v1946_v52  ;;  %v6160_v32 = vmul.f32 %v6135_v12, %v5968_v44  ;;  %v6165_v47 = vadd.f32 %v6009_v50, %v2223_v36 }
  0x5e   :  { %9591 = vst [vmem:[#allocation93_spill] sm:$0xff] %v6137_v19  ;;  %v2199_v28 = vmul.f32 1.442695, %v9592_v23  ;;  %v6154_v59 = vpop.eup %4845  ;;  %4863 = vpow2.f32 %v2183_v35  ;;  %v2229_v4 = vadd.f32 %v6107_v57, %v2228_v0  ;;  %v1891_v23 = vmax.f32 %v1890_v1, %v6115_v31  ;;  %v6171_v35 = vld [vmem:[%s9339_s3 + $0x320] sm:$0xff]  ;;  %v6176_v1 = vld [vmem:[%s9339_s3 + $0x138] sm:$0xff] }
  0x5f   :  { %2837 = vbcast.lane.b32.xlu1 %v9585_v7, 280  ;;  %2833 = vbcast.lane.b32.xlu0 %v9585_v7, 272  ;;  %9593 = vst [vmem:[#allocation94_spill] sm:$0xff] %v6154_v59  ;;  %9594 = vst [vmem:[#allocation95_spill] sm:$0xff] %v6160_v32  ;;  %v6162_v52 = vpop.eup %4847  ;;  %v2259_v25 = vadd.f32 %v6117_v38, %v2258_v14  ;;  %4865 = vpow2.f32 %v2079_v13  ;;  %v2111_v16 = vmul.f32 1.442695, %v1954_v10 }
  0x60   :  { %9595 = vst [vmem:[#allocation96_spill] sm:$0xff] %v6162_v52  ;;  %9596 = vst [vmem:[#allocation97_spill] sm:$0xff] %v6165_v47  ;;  %v2230_v36 = vadd.f32 %v6137_v19, %v2229_v4  ;;  %v1863_v14 = vmax.f32 %v1862_v56, %v6125_v20  ;;  %v1877_v13 = vmax.f32 %v6147_v58, %v6152_v30  ;;  %v6184_v10 = vpop.eup %4849  ;;  %4867 = vpow2.f32 %v2095_v49  ;;  %v6216_v49 = vld [vmem:[%s9339_s3 + $0xb0] sm:$0xff] }
  0x61   :  { %9597 = vst [vmem:[#allocation98_spill] sm:$0xff] %v6184_v10  ;;  %v1970_v0 = vsub.f32 %v5895_v42, %v6045_v17  ;;  %v1978_v38 = vsub.f32 %v5934_v33, %v6045_v17  ;;  %v2127_v50 = vmul.f32 1.442695, %v1962_v3  ;;  %v6190_v57 = vpop.eup %4851  ;;  %4869 = vpow2.f32 %v2199_v28  ;;  %v6211_v28 = vld [vmem:[%s9339_s3 + $0x178] sm:$0xff] }
  0x62   :  { %9598 = vst [vmem:[#allocation99_spill] sm:$0xff] %v6190_v57  ;;  %v2231_v4 = vadd.f32 %v6162_v52, %v2230_v36  ;;  %v6194_v56 = vmax.f32 %v1863_v14, %v6171_v35  ;;  %v1892_v19 = vmax.f32 %v1891_v23, %v6176_v1  ;;  %v6197_v51 = vpop.eup %4853  ;;  %v6201_v42 = vmul.f32 %v6104_v11, %v5674_v54 }
  0x63   :  { %2845 = vbcast.lane.b32.xlu1 %v9585_v7, 296  ;;  %2841 = vbcast.lane.b32.xlu0 %v9585_v7, 288  ;;  %9600 = vst [vmem:[#allocation101_spill] sm:$0xff] %v6197_v51  ;;  %v6204_v33 = vadd.f32 %v6154_v59, %v2259_v25  ;;  %v1986_v3 = vsub.f32 %v5963_v9, %v6045_v17  ;;  %4871 = vpow2.f32 %v2111_v16  ;;  %v6218_v23 = vpop.eup %4855  ;;  %v2143_v36 = vmul.f32 1.442695, %v1970_v0  ;;  %v9604_v59 = vld [vmem:[#allocation49_spill] sm:$0xff] }
  0x64   :  { %9599 = vst [vmem:[#allocation100_spill] sm:$0xff] %v6194_v56  ;;  %9602 = vst [vmem:[#allocation103_spill] sm:$0xff] %v6218_v23  ;;  %4873 = vrcp.f32 %v6165_v47  ;;  %v2232_v54 = vadd.f32 %v6184_v10, %v2231_v4  ;;  %v1994_v16 = vsub.f32 %v5995_v26, %v6045_v17  ;;  %v1905_v25 = vsub.f32 %v5614_v40, %v6194_v56 }
  0x65   :  { %9601 = vst [vmem:[#allocation102_spill] sm:$0xff] %v6204_v33  ;;  %v6228_v9 = vpop.eup %4857  ;;  %4875 = vpow2.f32 %v2127_v50  ;;  %v2159_v14 = vmul.f32 1.442695, %v1978_v38  ;;  %v1913_v52 = vsub.f32 %v9604_v59, %v6194_v56  ;;  %v1893_v26 = vmax.f32 %v1892_v19, %v6211_v28  ;;  %v9607_v50 = vld [vmem:[#allocation52_spill] sm:$0xff]  ;;  %v6256_v19 = vld [vmem:[%s9339_s3 + $0xf0] sm:$0xff] }
  0x66   :  { %9603 = vst [vmem:[#allocation104_spill] sm:$0xff] %v6228_v9  ;;  %v6232_v43 = vpop.eup %4859  ;;  %v2273_v4 = vadd.f32 %v6228_v9, %v6218_v23  ;;  %v6239_v47 = vmax.f32 %v1877_v13, %v6216_v49  ;;  %4877 = vrcp.f32 %v6204_v33  ;;  %v2175_v38 = vmul.f32 1.442695, %v1986_v3  ;;  %v9609_v33 = vld [vmem:[#allocation40_spill] sm:$0xff] }
  0x67   :  { %2853 = vbcast.lane.b32.xlu1 %v9585_v7, 312  ;;  %2849 = vbcast.lane.b32.xlu0 %v9585_v7, 304  ;;  %9605 = vst [vmem:[#allocation49_spill] sm:$0xff] %v6232_v43  ;;  %v2233_v7 = vadd.f32 %v6190_v57, %v2232_v54  ;;  %v6241_v40 = vpop.eup %4861  ;;  %v1921_v59 = vsub.f32 %v9607_v50, %v6194_v56  ;;  %v6251_v54 = vld [vmem:[%s9339_s3 + $0x1b8] sm:$0xff]  ;;  %v2013_v57 = vmul.f32 1.442695, %v1905_v25  ;;  %4879 = vpow2.f32 %v2143_v36 }
  0x68   :  { %9606 = vst [vmem:[#allocation105_spill] sm:$0xff] %v6241_v40  ;;  %v1929_v0 = vsub.f32 %v5710_v18, %v6194_v56  ;;  %v6258_v13 = vpop.eup %4863  ;;  %v2274_v18 = vadd.f32 %v6232_v43, %v2273_v4  ;;  %v1937_v50 = vsub.f32 %v5864_v61, %v6194_v56  ;;  %v1945_v63 = vsub.f32 %v5900_v21, %v6194_v56  ;;  %v6464_v9 = vld [vmem:[%s9338_s2 + $0x40] sm:$0xff] }
  0x69   :  { %9608 = vst [vmem:[#allocation52_spill] sm:$0xff] %v6258_v13  ;;  %v2234_v3 = vadd.f32 %v6197_v51, %v2233_v7  ;;  %v6266_v10 = vpop.eup %4865  ;;  %v2029_v8 = vmul.f32 1.442695, %v1913_v52  ;;  %v3610_v32 = vadd.f32 %v9611_v24, %v6130_v6  ;;  %4881 = vpow2.f32 %v2013_v57  ;;  %9633 = vst [vmem:[#allocation124_spill] sm:$0xff] %v6464_v9 }
  0x6a   :  { %9610 = vst [vmem:[#allocation40_spill] sm:$0xff] %v6266_v10  ;;  %v2275_v55 = vadd.f32 %v6241_v40, %v2274_v18  ;;  %v1894_v7 = vmax.f32 %v1893_v26, %v6251_v54  ;;  %v1879_v4 = vmax.f32 %v6239_v47, %v6256_v19  ;;  %v6276_v61 = vpop.eup %4867  ;;  %v1953_v25 = vsub.f32 %v5949_v34, %v6194_v56  ;;  %v6289_v47 = vld [vmem:[%s9339_s3 + $0x1f8] sm:$0xff] }
  0x6b   :  { %2864 = vbcast.lane.b32.xlu1 %v9609_v33, 264  ;;  %2860 = vbcast.lane.b32.xlu0 %v9609_v33, 256  ;;  %9612 = vst [vmem:[#allocation47_spill] sm:$0xff] %v6276_v61  ;;  %4883 = vpow2.f32 %v2029_v8  ;;  %v2045_v36 = vmul.f32 1.442695, %v1921_v59  ;;  %v6280_v52 = vpop.eup %4869  ;;  %v2235_v24 = vadd.f32 %v6258_v13, %v2234_v3  ;;  %v2002_v8 = vsub.f32 %v6016_v22, %v6045_v17 }
  0x6c   :  { %v2061_v21 = vmul.f32 1.442695, %v1929_v0  ;;  %9613 = vst [vmem:[#allocation106_spill] sm:$0xff] %v6280_v52  ;;  %4885 = vpow2.f32 %v2159_v14  ;;  %v2276_v57 = vadd.f32 %v6266_v10, %v2275_v55  ;;  %v2077_v6 = vmul.f32 1.442695, %v1937_v50  ;;  %v6300_v55 = vld [vmem:[%s9339_s3 + $0x130] sm:$0xff] }
  0x6d   :  { %v6291_v34 = vpop.eup %4871  ;;  %v1961_v26 = vsub.f32 %v6000_v60, %v6194_v56  ;;  %4887 = vpow2.f32 %v2045_v36  ;;  %v2093_v59 = vmul.f32 1.442695, %v1945_v63  ;;  %v6305_v14 = vld [vmem:[%s9338_s2 + $0x30] sm:$0xff]  ;;  %v2191_v3 = vmul.f32 1.442695, %v1994_v16  ;;  %v6313_v63 = vld [vmem:[%s9339_s3 + $0x238] sm:$0xff] }
  0x6e   :  { %9614 = vst [vmem:[#allocation107_spill] sm:$0xff] %v6291_v34  ;;  %9615 = vst [vmem:[#allocation108_spill] sm:$0xff] %v6305_v14  ;;  %v6307_v0 = vpop.eup %4873  ;;  %4889 = vpow2.f32 %v2175_v38  ;;  %v2277_v22 = vadd.f32 %v6276_v61, %v2276_v57  ;;  %v3611_v60 = vadd.f32 %v6305_v14, %v3610_v32  ;;  %v1969_v50 = vsub.f32 %v6035_v15, %v6194_v56  ;;  %v6324_v16 = vld [vmem:[%s9339_s3 + $0x170] sm:$0xff]  ;;  %v6335_v15 = vld [vmem:[%s9339_s3 + $0x278] sm:$0xff] }
  0x6f   :  { %2872 = vbcast.lane.b32.xlu1 %v9609_v33, 280  ;;  %2868 = vbcast.lane.b32.xlu0 %v9609_v33, 272  ;;  %9616 = vst [vmem:[#allocation109_spill] sm:$0xff] %v6307_v0  ;;  %v6316_v18 = vpop.eup %4875  ;;  %4891 = vpow2.f32 %v2061_v21  ;;  %v2109_v36 = vmul.f32 1.442695, %v1953_v25  ;;  %v1895_v17 = vmax.f32 %v1894_v7, %v6289_v47  ;;  %v6329_v32 = vadd.f32 %v6280_v52, %v2235_v24  ;;  %v9627_v61 = vld [vmem:[#allocation41_spill] sm:$0xff] }
  0x70   :  { %9617 = vst [vmem:[#allocation110_spill] sm:$0xff] %v6316_v18  ;;  %v2278_v38 = vadd.f32 %v6291_v34, %v2277_v22  ;;  %4893 = vpow2.f32 %v2077_v6  ;;  %v1880_v7 = vmax.f32 %v1879_v4, %v6300_v55  ;;  %v6338_v25 = vpop.eup %4877  ;;  %v1977_v21 = vsub.f32 %v6064_v53, %v6194_v56  ;;  %v6347_v6 = vld [vmem:[%s9339_s3 + $0x2b8] sm:$0xff]  ;;  %v6352_v4 = vld [vmem:[%s9339_s3 + $0x1b0] sm:$0xff]  ;;  %v6417_v10 = vld [vmem:[%s9338_s2] sm:$0xff] }
  0x71   :  { %9618 = vst [vmem:[#allocation111_spill] sm:$0xff] %v6329_v32  ;;  %9619 = vst [vmem:[#allocation112_spill] sm:$0xff] %v6338_v25  ;;  %4895 = vpow2.f32 %v2093_v59  ;;  %v2125_v57 = vmul.f32 1.442695, %v1961_v26  ;;  %v1896_v24 = vmax.f32 %v1895_v17, %v6313_v63  ;;  %v3612_v53 = vadd.f32 %v6135_v12, %v3611_v60  ;;  %v6356_v26 = vpop.eup %4879 }
  0x72   :  { %4897 = vpow2.f32 %v2191_v3  ;;  %v2279_v22 = vadd.f32 %v6316_v18, %v2278_v38  ;;  %v1881_v52 = vmax.f32 %v1880_v7, %v6324_v16  ;;  %9620 = vst [vmem:[#allocation113_spill] sm:$0xff] %v6356_v26  ;;  %v1985_v17 = vsub.f32 %v6098_v27, %v6194_v56 }
  0x73   :  { %2880 = vbcast.lane.b32.xlu1 %v9609_v33, 296  ;;  %2876 = vbcast.lane.b32.xlu0 %v9609_v33, 288  ;;  %4899 = vpow2.f32 %v2109_v36  ;;  %v2141_v59 = vmul.f32 1.442695, %v1969_v50  ;;  %v1897_v3 = vmax.f32 %v1896_v24, %v6335_v15  ;;  %v6361_v38 = vpop.eup %4881  ;;  %v6367_v7 = vmul.f32 %v6307_v0, %v5785_v37  ;;  %v6375_v50 = vld [vmem:[%s9339_s3 + $0x2f8] sm:$0xff] }
  0x74   :  { %9621 = vst [vmem:[#allocation114_spill] sm:$0xff] %v6361_v38  ;;  %4901 = vrcp.f32 %v6329_v32  ;;  %v2207_v60 = vmul.f32 1.442695, %v2002_v8  ;;  %v1993_v27 = vsub.f32 %v6125_v20, %v6194_v56  ;;  %v2157_v24 = vmul.f32 1.442695, %v1977_v21  ;;  %v6386_v8 = vld [vmem:[%s9338_s2 + $0x10] sm:$0xff] }
  0x75   :  { %v6377_v36 = vpop.eup %4883  ;;  %4903 = vpow2.f32 %v2125_v57  ;;  %v1882_v37 = vmax.f32 %v1881_v52, %v6352_v4  ;;  %v6390_v20 = vmul.f32 %v6386_v8, %v6201_v42  ;;  %v2280_v32 = vadd.f32 %v6356_v26, %v2279_v22  ;;  %v6398_v52 = vld [vmem:[%s9339_s3 + $0x338] sm:$0xff]  ;;  %v6403_v57 = vld [vmem:[%s9339_s3 + $0x1f0] sm:$0xff] }
  0x76   :  { %9622 = vst [vmem:[#allocation115_spill] sm:$0xff] %v6377_v36  ;;  %v6381_v13 = vpop.eup %4885  ;;  %v2261_v21 = vadd.f32 %v6377_v36, %v6361_v38  ;;  %9624 = vst [vmem:[#allocation117_spill] sm:$0xff] %v6403_v57  ;;  %v2001_v18 = vsub.f32 %v6171_v35, %v6194_v56  ;;  %4905 = vpow2.f32 %v2141_v59  ;;  %v2173_v22 = vmul.f32 1.442695, %v1985_v17 }
  0x77   :  { %2888 = vbcast.lane.b32.xlu1 %v9609_v33, 312  ;;  %2884 = vbcast.lane.b32.xlu0 %v9609_v33, 304  ;;  %v1898_v33 = vmax.f32 %v1897_v3, %v6347_v6  ;;  %9623 = vst [vmem:[#allocation116_spill] sm:$0xff] %v6381_v13  ;;  %v3613_v3 = vrot.slane %v3612_v53, 4  ;;  %v6405_v51 = vpop.eup %4887  ;;  %v6421_v40 = vmul.f32 %v6417_v10, %v6367_v7  ;;  %4907 = vpow2.f32 %v2207_v60 }
  0x78   :  { %9625 = vst [vmem:[#allocation118_spill] sm:$0xff] %v6405_v51  ;;  %v6410_v34 = vpop.eup %4889  ;;  %v6425_v35 = vmul.f32 %v6338_v25, %v5911_v45  ;;  %v2262_v17 = vadd.f32 %v6405_v51, %v2261_v21  ;;  %4909 = vpow2.f32 %v2157_v24  ;;  %v1883_v43 = vmax.f32 %v1882_v37, %v6403_v57  ;;  %v6442_v45 = vld [vmem:[%s9338_s2 + $0x48] sm:$0xff]  ;;  %v6455_v37 = vld [vmem:[%s9339_s3 + $0x230] sm:$0xff] }
  0x79   :  { %v1899_v26 = vmax.f32 %v1898_v33, %v6375_v50  ;;  %9626 = vst [vmem:[#allocation119_spill] sm:$0xff] %v6410_v34  ;;  %v6428_v59 = vpop.eup %4891  ;;  %v2189_v33 = vmul.f32 1.442695, %v1993_v27  ;;  %9632 = vst [vmem:[#allocation123_spill] sm:$0xff] %v6455_v37  ;;  %v3614_v51 = vadd.f32 %v3613_v3, %v3612_v53  ;;  %v2454_v36 = vmul.f32 %v5051_v2, %v6442_v45  ;;  %v5052_v53 = vld [vmem:[%s9339_s3 + $0x40] sm:$0xff] }
  0x7a   :  { %9628 = vst [vmem:[#allocation41_spill] sm:$0xff] %v6428_v59  ;;  %v6444_v60 = vpop.eup %4893  ;;  %v2263_v24 = vadd.f32 %v6428_v59, %v2262_v17  ;;  %4911 = vpow2.f32 %v2173_v22  ;;  %v2205_v17 = vmul.f32 1.442695, %v2001_v18  ;;  %v2453_v3 = vmul.f32 %v5052_v53, %v6464_v9  ;;  %v9637_v22 = vld [vmem:[#allocation37_spill] sm:$0xff]  ;;  %v6493_v53 = vld [vmem:[%s9338_s2 + $0x18] sm:$0xff] }
  0x7b   :  { %2899 = vbcast.lane.b32.xlu1 %v9627_v61, 264  ;;  %2895 = vbcast.lane.b32.xlu0 %v9627_v61, 256  ;;  %v6431_v56 = vmax.f32 %v1899_v26, %v6398_v52  ;;  %9631 = vst [vmem:[#allocation122_spill] sm:$0xff] %v6444_v60  ;;  %v2281_v26 = vadd.f32 %v6381_v13, %v2280_v32  ;;  %v6466_v32 = vpop.eup %4895  ;;  %v9638_v11 = vsub.s32 0, %v9637_v22  ;;  %4913 = vpow2.f32 %v2189_v33  ;;  %v6515_v33 = vld [vmem:[%s9339_s3 + $0x270] sm:$0xff] }
  0x7c   :  { %9634 = vst [vmem:[#allocation125_spill] sm:$0xff] %v6466_v32  ;;  %v6470_v13 = vmul.f32 %v6305_v14, %v6147_v58  ;;  %v6476_v2 = vpop.eup %4897  ;;  %v2264_v59 = vadd.f32 %v6444_v60, %v2263_v24  ;;  %v6497_v14 = vmul.f32 %v6493_v53, %v6425_v35  ;;  %v1884_v24 = vmax.f32 %v1883_v43, %v6455_v37  ;;  %v9642_v37 = vld [vmem:[#allocation45_spill] sm:$0xff] }
  0x7d   :  { %9629 = vst [vmem:[#allocation120_spill] sm:$0xff] %v6431_v56  ;;  %v6446_v21 = vpop.permute.xlu1 %2658  ;;  %v6448_v27 = vpop.permute.xlu0 %2650  ;;  %9636 = vst [vmem:[#allocation127_spill] sm:$0xff] %v6476_v2  ;;  %v1908_v18 = vsub.f32 %v5968_v44, %v6431_v56  ;;  %v6502_v44 = vmul.f32 %v6307_v0, %v5794_v62  ;;  %v2282_v22 = vadd.f32 %v6410_v34, %v2281_v26  ;;  %v3615_v43 = vrot.slane %v3614_v51, 2  ;;  %v9645_v34 = vld [vmem:[#allocation43_spill] sm:$0xff] }
  0x7e   :  { %9635 = vst [vmem:[#allocation126_spill] sm:$0xff] %v6470_v13  ;;  %v6486_v13 = vrot.slane %v6437_v5, %v9638_v11  ;;  %v6488_v38 = vpop.eup %4899  ;;  %v2265_v23 = vadd.f32 %v6466_v32, %v2264_v59  ;;  %v6518_v57 = vadd.f32 %v2454_v36, %v9642_v37  ;;  %4915 = vpow2.f32 %v2205_v17 }
  0x7f   :  { %2907 = vbcast.lane.b32.xlu1 %v9627_v61, 280  ;;  %2903 = vbcast.lane.b32.xlu0 %v9627_v61, 272  ;;  %9639 = vst [vmem:[#allocation128_spill] sm:$0xff] %v6488_v38  ;;  %9640 = vst [vmem:[#allocation129_spill] sm:$0xff] %v6502_v44  ;;  %v6504_v11 = vpop.eup %4901  ;;  %v1916_v26 = vsub.f32 %v5973_v29, %v6431_v56  ;;  %v6527_v59 = vadd.f32 %v2453_v3, %v9645_v34 }
  0x80   :  { %9641 = vst [vmem:[#allocation130_spill] sm:$0xff] %v6504_v11  ;;  %9643 = vst [vmem:[#allocation45_spill] sm:$0xff] %v6518_v57  ;;  %v6520_v62 = vpop.eup %4903  ;;  %v2318_v0 = vmul.f32 %v6504_v11, %v6049_v41  ;;  %v2266_v32 = vadd.f32 %v6488_v38, %v2265_v23  ;;  %v1924_v36 = vsub.f32 %v6077_v48, %v6431_v56  ;;  %v2019_v41 = vmul.f32 1.442695, %v1908_v18 }
  0x81   :  { %v6506_v60 = vpop.permute.xlu1 %2662  ;;  %v6508_v5 = vpop.permute.xlu0 %2654  ;;  %9644 = vst [vmem:[#allocation131_spill] sm:$0xff] %v6520_v62  ;;  %9646 = vst [vmem:[#allocation43_spill] sm:$0xff] %v6527_v59  ;;  %v1932_v37 = vsub.f32 %v6115_v31, %v6431_v56  ;;  %v1940_v29 = vsub.f32 %v6176_v1, %v6431_v56  ;;  %v1885_v34 = vmax.f32 %v1884_v24, %v6515_v33  ;;  %v6560_v24 = vld [vmem:[%s9339_s3 + $0x2b0] sm:$0xff] }
  0x82   :  { %v6536_v17 = vpop.eup %4905  ;;  %v6543_v3 = vmul.f32 %v6464_v9, %v6502_v44  ;;  %v6547_v23 = vadd.f32 %v6442_v45, %v6464_v9  ;;  %v2283_v31 = vadd.f32 %v6476_v2, %v2282_v22  ;;  %v2267_v1 = vadd.f32 %v6520_v62, %v2266_v32  ;;  %v6573_v22 = vld [vmem:[%s9338_s2 + $0x8] sm:$0xff] }
  0x83   :  { %2915 = vbcast.lane.b32.xlu1 %v9627_v61, 296  ;;  %2911 = vbcast.lane.b32.xlu0 %v9627_v61, 288  ;;  %9647 = vst [vmem:[#allocation132_spill] sm:$0xff] %v6536_v17  ;;  %v6549_v48 = vpop.eup %4907  ;;  %v6562_v59 = vadd.f32 %v3615_v43, %v3614_v51  ;;  %v6566_v57 = vmul.f32 %v6504_v11, %v6056_v46  ;;  %4917 = vpow2.f32 %v2019_v41  ;;  %v2035_v62 = vmul.f32 1.442695, %v1916_v26 }
  0x84   :  { %9648 = vst [vmem:[#allocation133_spill] sm:$0xff] %v6543_v3  ;;  %9649 = vst [vmem:[#allocation134_spill] sm:$0xff] %v6547_v23  ;;  %v6568_v23 = vpop.eup %4909  ;;  %v3334_v32 = vmul.f32 %v6573_v22, %v2318_v0  ;;  %v1948_v2 = vsub.f32 %v6211_v28, %v6431_v56  ;;  %v2268_v51 = vadd.f32 %v6536_v17, %v2267_v1  ;;  %v2051_v43 = vmul.f32 1.442695, %v1924_v36 }
  0x85   :  { %9650 = vst [vmem:[#allocation135_spill] sm:$0xff] %v6549_v48  ;;  %v6551_v38 = vpop.permute.xlu1 %2670  ;;  %v6554_v18 = vpop.permute.xlu0 %2666  ;;  %9651 = vst [vmem:[#allocation136_spill] sm:$0xff] %v6568_v23  ;;  %v1956_v46 = vsub.f32 %v6251_v54, %v6431_v56  ;;  %v2067_v11 = vmul.f32 1.442695, %v1932_v37  ;;  %v1964_v9 = vsub.f32 %v6289_v47, %v6431_v56  ;;  %4919 = vpow2.f32 %v2035_v62  ;;  %v6601_v47 = vld [vmem:[%s9339_s3 + $0x2f0] sm:$0xff] }
  0x86   :  { %v6583_v3 = vpop.eup %4911  ;;  %v2083_v28 = vmul.f32 1.442695, %v1940_v29  ;;  %v1886_v26 = vmax.f32 %v1885_v34, %v6560_v24  ;;  %v6589_v41 = vadd.f32 %v6549_v48, %v2283_v31  ;;  %v2269_v1 = vadd.f32 %v6568_v23, %v2268_v51 }
  0x87   :  { %2923 = vbcast.lane.b32.xlu1 %v9627_v61, 312  ;;  %2919 = vbcast.lane.b32.xlu0 %v9627_v61, 304  ;;  %9652 = vst [vmem:[#allocation137_spill] sm:$0xff] %v6583_v3  ;;  %v1972_v54 = vsub.f32 %v6313_v63, %v6431_v56  ;;  %4921 = vpow2.f32 %v2051_v43  ;;  %v6603_v62 = vpop.eup %4913  ;;  %v3775_v37 = vadd.f32 %v2318_v0, %v6367_v7  ;;  %v2099_v34 = vmul.f32 1.442695, %v1948_v2  ;;  %v6616_v43 = vld [vmem:[%s9339_s3 + $0x330] sm:$0xff] }
  0x88   :  { %9653 = vst [vmem:[#allocation138_spill] sm:$0xff] %v6589_v41  ;;  %9654 = vst [vmem:[#allocation139_spill] sm:$0xff] %v6603_v62  ;;  %v1980_v29 = vsub.f32 %v6335_v15, %v6431_v56  ;;  %4923 = vpow2.f32 %v2067_v11  ;;  %v6610_v63 = vmul.f32 %v6386_v8, %v6446_v21  ;;  %v2270_v31 = vadd.f32 %v6583_v3, %v2269_v1  ;;  %v6624_v15 = vpop.eup %4915 }
  0x89   :  { %v6592_v61 = vpop.permute.xlu1 %2678  ;;  %v6596_v36 = vpop.permute.xlu0 %2674  ;;  %v2115_v51 = vmul.f32 1.442695, %v1956_v46  ;;  %v6622_v0 = vmul.f32 %v6338_v25, %v5917_v39  ;;  %9655 = vst [vmem:[#allocation140_spill] sm:$0xff] %v6624_v15  ;;  %v1988_v7 = vsub.f32 %v6347_v6, %v6431_v56  ;;  %4925 = vpow2.f32 %v2083_v28 }
  0x8a   :  { %v2131_v8 = vmul.f32 1.442695, %v1964_v9  ;;  %v1887_v21 = vmax.f32 %v1886_v26, %v6601_v47  ;;  %v3437_v2 = vadd.f32 %v3334_v32, %v6421_v40  ;;  %4927 = vrcp.f32 %v6589_v41 }
  0x8b   :  { %2934 = vbcast.lane.b32.xlu1 %v6486_v13, 264  ;;  %2930 = vbcast.lane.b32.xlu0 %v6486_v13, 256  ;;  %v2271_v11 = vadd.f32 %v6603_v62, %v2270_v31  ;;  %v2147_v46 = vmul.f32 1.442695, %v1972_v54  ;;  %v3776_v48 = vadd.f32 %v3775_v37, %v6201_v42  ;;  %4929 = vpow2.f32 %v2099_v34 }
  0x8c   :  { %v2163_v3 = vmul.f32 1.442695, %v1980_v29  ;;  %v6638_v6 = vmax.f32 %v1887_v21, %v6616_v43  ;;  %v6642_v9 = vmul.f32 %v6417_v10, %v6448_v27  ;;  %4931 = vpow2.f32 %v2115_v51 }
  0x8d   :  { %v6632_v1 = vpop.permute.xlu1 %2689  ;;  %v6634_v39 = vpop.permute.xlu0 %2685  ;;  %v6645_v40 = vadd.f32 %v6624_v15, %v2271_v11  ;;  %v3617_v32 = vrot.slane %v6562_v59, 1  ;;  %v6654_v28 = vmul.f32 %v6493_v53, %v6506_v60  ;;  %4933 = vpow2.f32 %v2131_v8  ;;  %v4615_v15 = vld [vmem:[%s9338_s2 + $0x58] sm:$0xff] }
  0x8e   :  { %9656 = vst [vmem:[#allocation141_spill] sm:$0xff] %v6638_v6  ;;  %v6650_v42 = vpop.eup %4917  ;;  %v2179_v26 = vmul.f32 1.442695, %v1988_v7  ;;  %v1907_v10 = vsub.f32 %v6147_v58, %v6638_v6  ;;  %4935 = vpow2.f32 %v2147_v46  ;;  %v1915_v27 = vsub.f32 %v6152_v30, %v6638_v6 }
  0x8f   :  { %9657 = vst [vmem:[#allocation142_spill] sm:$0xff] %v6645_v40  ;;  %2942 = vbcast.lane.b32.xlu1 %v6486_v13, 280  ;;  %2938 = vbcast.lane.b32.xlu0 %v6486_v13, 272  ;;  %v1923_v54 = vsub.f32 %v6216_v49, %v6638_v6  ;;  %v1931_v37 = vsub.f32 %v6256_v19, %v6638_v6  ;;  %v6668_v60 = vpop.eup %4919  ;;  %4937 = vpow2.f32 %v2163_v3 }
  0x90   :  { %v6672_v53 = vmul.f32 %v6573_v22, %v6508_v5  ;;  %v3438_v58 = vadd.f32 %v3437_v2, %v6390_v20  ;;  %v6676_v31 = vadd.f32 %v3776_v48, %v6425_v35  ;;  %4939 = vrcp.f32 %v6645_v40 }
  0x91   :  { %v6664_v29 = vpop.permute.xlu1 %2697  ;;  %v6666_v34 = vpop.permute.xlu0 %2693  ;;  %v1996_v19 = vsub.f32 %v6375_v50, %v6431_v56  ;;  %v2297_v51 = vadd.f32 %v6668_v60, %v6650_v42  ;;  %v1939_v5 = vsub.f32 %v6300_v55, %v6638_v6  ;;  %v2004_v35 = vsub.f32 %v6398_v52, %v6431_v56  ;;  %v5055_v52 = vld [vmem:[%s9338_s2 + $0x28] sm:$0xff]  ;;  %v9669_v56 = vld [vmem:[#allocation123_spill] sm:$0xff] }
  0x92   :  { %v6678_v49 = vpop.eup %4921  ;;  %4941 = vpow2.f32 %v2179_v26  ;;  %v1947_v3 = vsub.f32 %v6324_v16, %v6638_v6  ;;  %v2017_v50 = vmul.f32 1.442695, %v1907_v10  ;;  %v2033_v22 = vmul.f32 1.442695, %v1915_v27  ;;  %v6711_v16 = vld [vmem:[%s9338_s2 + $0x20] sm:$0xff] }
  0x93   :  { %2950 = vbcast.lane.b32.xlu1 %v6486_v13, 296  ;;  %2946 = vbcast.lane.b32.xlu0 %v6486_v13, 288  ;;  %v6689_v20 = vpop.eup %4923  ;;  %v2298_v48 = vadd.f32 %v6678_v49, %v2297_v51  ;;  %v2049_v7 = vmul.f32 1.442695, %v1923_v54  ;;  %v2065_v8 = vmul.f32 1.442695, %v1931_v37  ;;  %v6706_v11 = vmul.f32 %v5055_v52, %v6551_v38 }
  0x94   :  { %9658 = vst [vmem:[#allocation143_spill] sm:$0xff] %v6689_v20  ;;  %v6700_v2 = vpop.eup %4925  ;;  %v6715_v46 = vmul.f32 %v6711_v16, %v6554_v18  ;;  %v6718_v26 = vadd.f32 %v3438_v58, %v6497_v14  ;;  %4943 = vpow2.f32 %v2017_v50  ;;  %v1955_v38 = vsub.f32 %v6352_v4, %v6638_v6  ;;  %v9663_v4 = vld [vmem:[#allocation117_spill] sm:$0xff] }
  0x95   :  { %v6696_v55 = vpop.permute.xlu1 %2705  ;;  %v6698_v21 = vpop.permute.xlu0 %2701  ;;  %9659 = vst [vmem:[#allocation144_spill] sm:$0xff] %v6700_v2  ;;  %v2299_v27 = vadd.f32 %v6689_v20, %v2298_v48  ;;  %4945 = vpow2.f32 %v2033_v22  ;;  %v2081_v54 = vmul.f32 1.442695, %v1939_v5  ;;  %v2195_v18 = vmul.f32 1.442695, %v1996_v19  ;;  %v9680_v20 = vld [vmem:[#allocation134_spill] sm:$0xff] }
  0x96   :  { %v6720_v10 = vpop.eup %4927  ;;  %v2211_v51 = vmul.f32 1.442695, %v2004_v35  ;;  %v6731_v14 = vmul.f32 %v6135_v12, %v6592_v61  ;;  %4947 = vpow2.f32 %v2049_v7  ;;  %v1963_v5 = vsub.f32 %v9663_v4, %v6638_v6  ;;  %v9665_v35 = vld [vmem:[#allocation103_spill] sm:$0xff]  ;;  %v9666_v61 = vld [vmem:[#allocation108_spill] sm:$0xff] }
  0x97   :  { %9660 = vst [vmem:[#allocation145_spill] sm:$0xff] %v6720_v10  ;;  %2958 = vbcast.lane.b32.xlu1 %v6486_v13, 312  ;;  %2954 = vbcast.lane.b32.xlu0 %v6486_v13, 304  ;;  %v6727_v37 = vpop.eup %4929  ;;  %v2300_v50 = vadd.f32 %v6700_v2, %v2299_v27  ;;  %4949 = vpow2.f32 %v2065_v8  ;;  %v2097_v48 = vmul.f32 1.442695, %v1947_v3  ;;  %v6746_v12 = vmul.f32 %v6720_v10, %v9665_v35 }
  0x98   :  { %9661 = vst [vmem:[#allocation146_spill] sm:$0xff] %v6727_v37  ;;  %v6733_v58 = vpop.eup %4931  ;;  %v6750_v7 = vmul.f32 %v9666_v61, %v6596_v36  ;;  %v6755_v27 = vadd.f32 %v3617_v32, %v6562_v59  ;;  %v3109_v3 = vmul.f32 %v6442_v45, %v6632_v1  ;;  %v1971_v35 = vsub.f32 %v9669_v56, %v6638_v6 }
  0x99   :  { %9662 = vst [vmem:[#allocation147_spill] sm:$0xff] %v6733_v58  ;;  %v6738_v22 = vpop.permute.xlu1 %2713  ;;  %v6740_v13 = vpop.permute.xlu0 %2709  ;;  %v2301_v4 = vadd.f32 %v6727_v37, %v2300_v50  ;;  %4951 = vpow2.f32 %v2081_v54  ;;  %v2113_v40 = vmul.f32 1.442695, %v1955_v38  ;;  %v1979_v36 = vsub.f32 %v6515_v33, %v6638_v6  ;;  %v9679_v37 = vld [vmem:[#allocation133_spill] sm:$0xff] }
  0x9a   :  { %v6742_v19 = vpop.eup %4933  ;;  %9667 = vst [vmem:[#allocation103_spill] sm:$0xff] %v6755_v27  ;;  %4953 = vpow2.f32 %v2195_v18  ;;  %v1987_v59 = vsub.f32 %v6560_v24, %v6638_v6  ;;  %v1995_v1 = vsub.f32 %v6601_v47, %v6638_v6  ;;  %v2003_v56 = vsub.f32 %v6616_v43, %v6638_v6 }
  0x9b   :  { %9664 = vst [vmem:[#allocation117_spill] sm:$0xff] %v6742_v19  ;;  %v6759_v8 = vpop.eup %4935  ;;  %v2302_v50 = vadd.f32 %v6733_v58, %v2301_v4  ;;  %4955 = vpow2.f32 %v2097_v48  ;;  %v2129_v38 = vmul.f32 1.442695, %v1963_v5  ;;  %v6782_v33 = vmul.f32 %v5055_v52, %v6746_v12  ;;  %v9673_v5 = vld [vmem:[#allocation114_spill] sm:$0xff] }
  0x9c   :  { %9668 = vst [vmem:[#allocation148_spill] sm:$0xff] %v6759_v8  ;;  %v6764_v41 = vpop.eup %4937  ;;  %v6785_v24 = vadd.f32 1.0, %v6755_v27  ;;  %v3342_v47 = vmul.f32 %v6442_v45, %v6566_v57  ;;  %v6791_v4 = vadd.f32 %v6566_v57, %v6502_v44  ;;  %4957 = vpow2.f32 %v2113_v40 }
  0x9d   :  { %9670 = vst [vmem:[#allocation123_spill] sm:$0xff] %v6764_v41  ;;  %v6772_v32 = vpop.eup %4939  ;;  %v6777_v54 = vpop.permute.xlu0 %2720  ;;  %v2303_v6 = vadd.f32 %v6742_v19, %v2302_v50  ;;  %v2145_v52 = vmul.f32 1.442695, %v1971_v35  ;;  %4959 = vpow2.f32 %v2211_v51  ;;  %v2161_v45 = vmul.f32 1.442695, %v1979_v36  ;;  %v9675_v51 = vld [vmem:[#allocation124_spill] sm:$0xff] }
  0x9e   :  { %9671 = vst [vmem:[#allocation149_spill] sm:$0xff] %v6772_v32  ;;  %v6779_v18 = vpop.eup %4941  ;;  %v6793_v43 = vpop.permute.xlu1 %2724  ;;  %v2321_v48 = vmul.f32 %v6772_v32, %v9673_v5  ;;  %v2177_v23 = vmul.f32 1.442695, %v1987_v59  ;;  %v2193_v57 = vmul.f32 1.442695, %v1995_v1  ;;  %4961 = vpow2.f32 %v2129_v38  ;;  %v5057_v59 = vld [vmem:[%s9339_s3 + $0x58] sm:$0xff] }
  0x9f   :  { %9672 = vst [vmem:[#allocation150_spill] sm:$0xff] %v6779_v18  ;;  %v6801_v62 = vpop.eup %4943  ;;  %v2304_v17 = vadd.f32 %v6759_v8, %v2303_v6  ;;  %v2209_v5 = vmul.f32 1.442695, %v2003_v56  ;;  %v6807_v50 = vadd.f32 %v3109_v3, %v6672_v53  ;;  %v3108_v36 = vmul.f32 %v9675_v51, %v6634_v39  ;;  %v4614_v53 = vld [vmem:[%s9338_s2 + $0x50] sm:$0xff]  ;;  %v9676_v3 = vld [vmem:[#allocation53_spill] sm:$0xff] }
  0xa0   :  { %v6803_v44 = vpop.eup %4945  ;;  %v2456_v6 = vmul.f32 %v5057_v59, %v4615_v15  ;;  %v9677_v1 = vld [vmem:[#allocation90_spill] sm:$0xff]  ;;  %v3337_v8 = vmul.f32 %v6711_v16, %v2321_v48  ;;  %4963 = vpow2.f32 %v2145_v52  ;;  %v3111_v39 = vmul.f32 %v4615_v15, %v6664_v29 }
  0xa1   :  { %9674 = vst [vmem:[#allocation114_spill] sm:$0xff] %v6803_v44  ;;  %v6809_v40 = vpop.permute.xlu0 %2728  ;;  %v6811_v35 = vpop.eup %4947  ;;  %v2285_v19 = vadd.f32 %v6803_v44, %v6801_v62  ;;  %v2327_v56 = vmul.f32 %v9677_v1, %v9676_v3  ;;  %v2305_v58 = vadd.f32 %v6764_v41, %v2304_v17  ;;  %v3778_v51 = vadd.f32 %v6676_v31, %v2321_v48  ;;  %v5058_v17 = vld [vmem:[%s9339_s3 + $0x50] sm:$0xff] }
  0xa2   :  { %v6825_v38 = vpop.eup %4949  ;;  %v3450_v2 = vadd.f32 %v3342_v47, %v9679_v37  ;;  %v3620_v27 = vadd.f32 %v4614_v53, %v9680_v20  ;;  %v6834_v61 = vpop.permute.xlu1 %2732  ;;  %4965 = vpow2.f32 %v2161_v45  ;;  %v2455_v29 = vmul.f32 %v5058_v17, %v4614_v53  ;;  %v9684_v45 = vld [vmem:[#allocation44_spill] sm:$0xff] }
  0xa3   :  { %9678 = vst [vmem:[#allocation124_spill] sm:$0xff] %v6825_v38  ;;  %v2286_v59 = vadd.f32 %v6811_v35, %v2285_v19  ;;  %v6836_v3 = vpop.eup %4951  ;;  %v2306_v44 = vadd.f32 %v6779_v18, %v2305_v58  ;;  %v3110_v31 = vmul.f32 %v4614_v53, %v6666_v34  ;;  %v6847_v20 = vadd.f32 %v3108_v36, %v6642_v9  ;;  %v9686_v36 = vld [vmem:[#allocation104_spill] sm:$0xff] }
  0xa4   :  { %9681 = vst [vmem:[#allocation53_spill] sm:$0xff] %v6836_v3  ;;  %v6843_v16 = vpop.eup %4953  ;;  %v3344_v19 = vmul.f32 %v4615_v15, %v6622_v0  ;;  %v3343_v47 = vmul.f32 %v4614_v53, %v2327_v56  ;;  %v3440_v52 = vadd.f32 %v6718_v26, %v3337_v8  ;;  %4967 = vpow2.f32 %v2177_v23  ;;  %v9688_v26 = vld [vmem:[#allocation42_spill] sm:$0xff] }
  0xa5   :  { %9682 = vst [vmem:[#allocation133_spill] sm:$0xff] %v6843_v16  ;;  %v2287_v37 = vadd.f32 %v6825_v38, %v2286_v59  ;;  %v6850_v48 = vpop.permute.xlu0 %2736  ;;  %v6852_v58 = vpop.eup %4955  ;;  %v6856_v17 = vadd.f32 %v2456_v6, %v9684_v45  ;;  %v6859_v34 = vadd.f32 %v3111_v39, %v6654_v28  ;;  %v6863_v9 = vadd.f32 %v3778_v51, %v6746_v12  ;;  %v4617_v12 = vld [vmem:[%s9338_s2 + $0x68] sm:$0xff]  ;;  %v4616_v6 = vld [vmem:[%s9338_s2 + $0x60] sm:$0xff]  ;;  %v9692_v45 = vld [vmem:[#allocation115_spill] sm:$0xff] }
  0xa6   :  { %9683 = vst [vmem:[#allocation134_spill] sm:$0xff] %v6852_v58  ;;  %v6867_v53 = vmul.f32 %v6720_v10, %v9686_v36  ;;  %v3621_v18 = vadd.f32 %v4615_v15, %v3620_v27  ;;  %v6869_v41 = vpop.eup %4957  ;;  %v2307_v23 = vadd.f32 %v6843_v16, %v2306_v44  ;;  %4969 = vpow2.f32 %v2193_v57  ;;  %v6887_v39 = vpop.permute.xlu1 %2740 }
  0xa7   :  { %v2288_v59 = vadd.f32 %v6836_v3, %v2287_v37  ;;  %9685 = vst [vmem:[#allocation44_spill] sm:$0xff] %v6863_v9  ;;  %9687 = vst [vmem:[#allocation104_spill] sm:$0xff] %v6869_v41  ;;  %v6873_v8 = vadd.f32 %v2455_v29, %v9688_v26  ;;  %v6876_v28 = vadd.f32 %v3110_v31, %v6610_v63  ;;  %v6884_v15 = vpop.eup %4959  ;;  %4971 = vpow2.f32 %v2209_v5  ;;  %v5059_v31 = vld [vmem:[%s9339_s3 + $0x68] sm:$0xff]  ;;  %v9714_v9 = vld [vmem:[#allocation54_spill] sm:$0xff] }
  0xa8   :  { %9689 = vst [vmem:[#allocation42_spill] sm:$0xff] %v6884_v15  ;;  %v3451_v27 = vadd.f32 %v3450_v2, %v3343_v47  ;;  %v3622_v57 = vadd.f32 %v4616_v6, %v3621_v18  ;;  %v6889_v51 = vpop.eup %4961  ;;  %v6892_v63 = vadd.f32 %v3440_v52, %v6782_v33  ;;  %v3789_v29 = vadd.f32 %v6791_v4, %v2327_v56  ;;  %v5060_v56 = vld [vmem:[%s9339_s3 + $0x60] sm:$0xff] }
  0xa9   :  { %v2289_v44 = vadd.f32 %v6852_v58, %v2288_v59  ;;  %9690 = vst [vmem:[#allocation151_spill] sm:$0xff] %v6889_v51  ;;  %v2458_v37 = vmul.f32 %v5059_v31, %v4617_v12  ;;  %v2329_v5 = vmul.f32 %v6772_v32, %v9692_v45  ;;  %v3113_v18 = vmul.f32 %v4617_v12, %v6696_v55  ;;  %v6905_v33 = vpop.permute.xlu0 %2744  ;;  %v6919_v55 = vld [vmem:[%s9338_s2 + $0x70] sm:$0xff]  ;;  %v6930_v45 = vld [vmem:[%s9338_s2 + $0x78] sm:$0xff]  ;;  %v9702_v58 = vld [vmem:[#allocation109_spill] sm:$0xff] }
  0xaa   :  { %9691 = vst [vmem:[#allocation152_spill] sm:$0xff] %v6892_v63  ;;  %v6903_v47 = vmul.f32 %v4617_v12, %v6867_v53  ;;  %v3623_v59 = vadd.f32 %v4617_v12, %v3622_v57  ;;  %9693 = vst [vmem:[#allocation115_spill] sm:$0xff] %v6905_v33  ;;  %v6907_v52 = vpop.eup %4963  ;;  %v6910_v4 = vadd.f32 %v6884_v15, %v2307_v23  ;;  %v9696_v12 = vld [vmem:[#allocation37_spill] sm:$0xff]  ;;  %v9700_v15 = vld [vmem:[#allocation130_spill] sm:$0xff] }
  0xab   :  { %v2290_v2 = vadd.f32 %v6869_v41, %v2289_v44  ;;  %9694 = vst [vmem:[#allocation153_spill] sm:$0xff] %v6907_v52  ;;  %v2457_v36 = vmul.f32 %v5060_v56, %v4616_v6  ;;  %v3112_v26 = vmul.f32 %v4616_v6, %v6698_v21  ;;  %v9697_v44 = vsub.s32 1, %v9696_v12  ;;  %v9698_v57 = vld [vmem:[#allocation121_spill] sm:$0xff]  ;;  %v9701_v41 = vld [vmem:[#allocation64_spill] sm:$0xff]  ;;  %v9704_v33 = vld [vmem:[#allocation50_spill] sm:$0xff] }
  0xac   :  { %9695 = vst [vmem:[#allocation154_spill] sm:$0xff] %v6910_v4  ;;  %v3624_v56 = vadd.f32 %v6919_v55, %v3623_v59  ;;  %v9699_v21 = vld [vmem:[#allocation89_spill] sm:$0xff]  ;;  %v2333_v3 = vmul.f32 %v9702_v58, %v9701_v41  ;;  %v6937_v38 = vpop.eup %4965  ;;  %v3345_v63 = vmul.f32 %v4616_v6, %v2329_v5  ;;  %v6946_v59 = vadd.f32 %v3113_v18, %v6706_v11  ;;  %v6950_v58 = vpop.permute.xlu1 %2748 }
  0xad   :  { %v6924_v31 = vrot.slane %v9698_v57, %v9697_v44  ;;  %v2291_v23 = vadd.f32 %v6889_v51, %v2290_v2  ;;  %v2334_v16 = vmul.f32 %v9700_v15, %v9699_v21  ;;  %9703 = vst [vmem:[#allocation121_spill] sm:$0xff] %v6937_v38  ;;  %v6940_v44 = vadd.f32 %v2458_v37, %v9704_v33  ;;  %v4620_v37 = vld [vmem:[%s9338_s2 + $0x80] sm:$0xff] }
  0xae   :  { %v3452_v2 = vadd.f32 %v3451_v27, %v3344_v19  ;;  %9705 = vst [vmem:[#allocation89_spill] sm:$0xff] %v6946_v59  ;;  %v3790_v21 = vadd.f32 %v3789_v29, %v6622_v0  ;;  %v3625_v41 = vadd.f32 %v6930_v45, %v3624_v56  ;;  %9706 = vst [vmem:[#allocation64_spill] sm:$0xff] %v6950_v58  ;;  %v9483_v15 = vmov 1   ;;  %v6953_v6 = vpop.eup %4967  ;;  %v5061_v19 = vld [vmem:[%s9339_s3 + $0x78] sm:$0xff]  ;;  %v4621_v29 = vld [vmem:[%s9338_s2 + $0x88] sm:$0xff] }
  0xaf   :  { %2969 = vbcast.lane.b32.xlu1 %v6924_v31, 264  ;;  %2965 = vbcast.lane.b32.xlu0 %v6924_v31, 256  ;;  %v2292_v51 = vadd.f32 %v6907_v52, %v2291_v23  ;;  %9707 = vst [vmem:[#allocation50_spill] sm:$0xff] %v6953_v6  ;;  %4973 = vrcp.f32 %v6910_v4  ;;  %v2460_v11 = vmul.f32 %v5061_v19, %v6930_v45  ;;  %v6972_v19 = vpop.permute.xlu0 %2755  ;;  %v9715_v59 = vld [vmem:[#allocation95_spill] sm:$0xff] }
  0xb0   :  { %4746 = vset.pattern.permute.xlu1 %v9483_v15  ;;  %v3115_v0 = vmul.f32 %v6930_v45, %v6738_v22  ;;  %v2459_v27 = vmul.f32 %v6919_v55, %v6152_v30  ;;  %4747 = vset.pattern.permute.xlu0 %v9483_v15  ;;  %v3626_v33 = vrot.slane %v3625_v41, 4  ;;  %v3350_v23 = vmul.f32 %v4621_v29, %v2334_v16  ;;  %v6974_v22 = vpop.eup %4969  ;;  %v9710_v30 = vld [vmem:[#allocation58_spill] sm:$0xff] }
  0xb1   :  { %v2293_v18 = vadd.f32 %v6937_v38, %v2292_v51  ;;  %v3349_v56 = vmul.f32 %v4620_v37, %v2333_v3  ;;  %9708 = vst [vmem:[#allocation155_spill] sm:$0xff] %v6972_v19  ;;  %9709 = vst [vmem:[#allocation156_spill] sm:$0xff] %v6974_v22  ;;  %4975 = vrcp.f32 %v6785_v24  ;;  %v6978_v4 = vadd.f32 %v2457_v36, %v9710_v30  ;;  %v6985_v51 = vpop.eup %4971  ;;  %v9716_v30 = vld [vmem:[#allocation126_spill] sm:$0xff] }
  0xb2   :  { %v6981_v52 = vadd.f32 %v3112_v26, %v6715_v46  ;;  %v3453_v58 = vadd.f32 %v3452_v2, %v3345_v63  ;;  %9713 = vst [vmem:[#allocation158_spill] sm:$0xff] %v6985_v51  ;;  %v3791_v38 = vadd.f32 %v3790_v21, %v2329_v5  ;;  %v3627_v19 = vadd.f32 %v3626_v33, %v3625_v41  ;;  %v4623_v33 = vld [vmem:[%s9338_s2 + $0x98] sm:$0xff] }
  0xb3   :  { %9711 = vst [vmem:[#allocation58_spill] sm:$0xff] %v6978_v4  ;;  %2977 = vbcast.lane.b32.xlu1 %v6924_v31, 280  ;;  %2973 = vbcast.lane.b32.xlu0 %v6924_v31, 272  ;;  %v2294_v15 = vadd.f32 %v6953_v6, %v2293_v18  ;;  %v2335_v24 = vmul.f32 %v9677_v1, %v9714_v9  ;;  %v9717_v18 = vld [vmem:[#allocation75_spill] sm:$0xff]  ;;  %v4622_v9 = vld [vmem:[%s9338_s2 + $0x90] sm:$0xff] }
  0xb4   :  { %9712 = vst [vmem:[#allocation157_spill] sm:$0xff] %v6981_v52  ;;  %v6991_v36 = vadd.f32 %v2460_v11, %v9715_v59  ;;  %v6994_v46 = vadd.f32 %v3115_v0, %v6731_v14  ;;  %v3632_v63 = vadd.f32 %v4621_v29, %v4620_v37  ;;  %v3801_v26 = vadd.f32 %v2334_v16, %v2333_v3  ;;  %v7005_v59 = vpop.permute.xlu1 %2759  ;;  %v5062_v3 = vld [vmem:[%s9339_s3 + $0x88] sm:$0xff] }
  0xb5   :  { %v2295_v2 = vadd.f32 %v6974_v22, %v2294_v15  ;;  %v6998_v52 = vadd.f32 %v2459_v27, %v9716_v30  ;;  %v3463_v4 = vadd.f32 %v3350_v23, %v3349_v56  ;;  %v2336_v5 = vmul.f32 %v6338_v25, %v9717_v18  ;;  %v9719_v18 = vld [vmem:[#allocation118_spill] sm:$0xff] }
  0xb6   :  { %v3114_v14 = vmul.f32 %v6919_v55, %v6740_v13  ;;  %v2462_v16 = vmul.f32 %v5062_v3, %v4621_v29  ;;  %v3117_v15 = vmul.f32 %v4621_v29, %v6793_v43  ;;  %v3351_v21 = vmul.f32 %v4622_v9, %v2335_v24  ;;  %v5063_v13 = vld [vmem:[%s9339_s3 + $0x80] sm:$0xff]  ;;  %v7027_v43 = vpop.permute.xlu0 %2763 }
  0xb7   :  { %2985 = vbcast.lane.b32.xlu1 %v6924_v31, 296  ;;  %v7015_v41 = vadd.f32 %v6985_v51, %v2295_v2  ;;  %v7018_v11 = vadd.f32 %v3453_v58, %v6903_v47  ;;  %v3628_v0 = vrot.slane %v3627_v19, 2  ;;  %v2461_v27 = vmul.f32 %v5063_v13, %v4620_v37  ;;  %2981 = vbcast.lane.b32.xlu0 %v6924_v31, 288  ;;  %v5064_v58 = vld [vmem:[%s9339_s3 + $0x98] sm:$0xff] }
  0xb8   :  { %v3116_v29 = vmul.f32 %v4620_v37, %v6777_v54  ;;  %v2464_v47 = vmul.f32 %v5064_v58, %v4623_v33  ;;  %v3633_v23 = vadd.f32 %v4622_v9, %v3632_v63  ;;  %v3802_v56 = vadd.f32 %v3801_v26, %v2335_v24  ;;  %v9721_v37 = vld [vmem:[#allocation45_spill] sm:$0xff]  ;;  %v9722_v63 = vld [vmem:[#allocation43_spill] sm:$0xff] }
  0xb9   :  { %9718 = vst [vmem:[#allocation54_spill] sm:$0xff] %v7015_v41  ;;  %4977 = vrcp.f32 %v7015_v41  ;;  %v3352_v2 = vmul.f32 %v4623_v33, %v2336_v5  ;;  %v3464_v30 = vadd.f32 %v3463_v4, %v3351_v21  ;;  %v2337_v3 = vmul.f32 %v6772_v32, %v9719_v18  ;;  %v7036_v13 = vpop.eup %4973  ;;  %v4625_v58 = vld [vmem:[%s9338_s2 + $0xa8] sm:$0xff] }
  0xba   :  { %9720 = vst [vmem:[#allocation95_spill] sm:$0xff] %v7036_v13  ;;  %v7039_v51 = vadd.f32 %v3114_v14, %v6750_v7  ;;  %v7042_v54 = vadd.f32 %v3791_v38, %v6867_v53  ;;  %v7045_v6 = vadd.f32 %v9721_v37, %v2462_v16  ;;  %v7048_v24 = vadd.f32 %v6807_v50, %v3117_v15  ;;  %v5065_v7 = vld [vmem:[%s9339_s3 + $0x90] sm:$0xff]  ;;  %v7059_v53 = vpop.permute.xlu1 %2767  ;;  %v9723_v16 = vld [vmem:[#allocation49_spill] sm:$0xff]  ;;  %v7078_v18 = vpop.permute.xlu0 %2771 }
  0xbb   :  { %2993 = vbcast.lane.b32.xlu1 %v6924_v31, 312  ;;  %v3629_v4 = vadd.f32 %v3628_v0, %v3627_v19  ;;  %v7052_v26 = vadd.f32 %v9722_v63, %v2461_v27  ;;  %v3119_v21 = vmul.f32 %v4623_v33, %v6834_v61  ;;  %v2463_v38 = vmul.f32 %v5065_v7, %v4622_v9  ;;  %v7061_v14 = vpop.eup %4975  ;;  %v4624_v61 = vld [vmem:[%s9338_s2 + $0xa0] sm:$0xff] }
  0xbc   :  { %2989 = vbcast.lane.b32.xlu0 %v6924_v31, 304  ;;  %v3118_v50 = vmul.f32 %v4622_v9, %v6809_v40  ;;  %v2338_v19 = vmul.f32 %v6720_v10, %v9723_v16  ;;  %v3634_v15 = vadd.f32 %v4623_v33, %v3633_v23  ;;  %v3803_v0 = vadd.f32 %v3802_v56, %v2336_v5  ;;  %v5067_v63 = vld [vmem:[%s9339_s3 + $0xa0] sm:$0xff] }
  0xbd   :  { %v7070_v27 = vadd.f32 %v6847_v20, %v3116_v29  ;;  %v7073_v31 = vadd.f32 %v6856_v17, %v2464_v47  ;;  %v3353_v40 = vmul.f32 %v4624_v61, %v2337_v3  ;;  %v3465_v9 = vadd.f32 %v3464_v30, %v3352_v2  ;;  %v5066_v20 = vld [vmem:[%s9339_s3 + $0xa8] sm:$0xff] }
  0xbe   :  { %v2324_v37 = vmul.f32 %v7036_v13, %v6650_v42  ;;  %v7084_v5 = vmul.f32 %v7036_v13, %v6668_v60  ;;  %v2466_v17 = vmul.f32 %v5066_v20, %v4625_v58  ;;  %v3635_v33 = vadd.f32 %v4624_v61, %v3634_v15 }
  0xbf   :  { %v3630_v29 = vrot.slane %v3629_v4, 1  ;;  %v7090_v47 = vadd.f32 %v6859_v34, %v3119_v21  ;;  %v7093_v23 = vadd.f32 %v6873_v8, %v2463_v38  ;;  %v3804_v56 = vadd.f32 %v3803_v0, %v2337_v3  ;;  %v7106_v8 = vld [vmem:[%s9338_s2 + $0xb0] sm:$0xff]  ;;  %v5068_v21 = vld [vmem:[%s9338_s2 + $0x38] sm:$0xff] }
  0xc0   :  { %9724 = vst [vmem:[#allocation126_spill] sm:$0xff] %v7084_v5  ;;  %v7096_v42 = vadd.f32 %v6876_v28, %v3118_v50  ;;  %v3121_v60 = vmul.f32 %v4625_v58, %v6887_v39  ;;  %v3354_v2 = vmul.f32 %v4625_v58, %v2338_v19  ;;  %v3636_v30 = vadd.f32 %v4625_v58, %v3635_v33  ;;  %v7113_v39 = vpop.permute.xlu1 %2775 }
  0xc1   :  { %v2465_v7 = vmul.f32 %v5067_v63, %v4624_v61  ;;  %v3120_v16 = vmul.f32 %v4624_v61, %v6850_v48  ;;  %v3466_v34 = vadd.f32 %v3465_v9, %v3353_v40  ;;  %v9725_v28 = vsub.s32 2, %v9696_v12  ;;  %v9729_v9 = vld [vmem:[#allocation114_spill] sm:$0xff] }
  0xc2   :  { %v3340_v38 = vmul.f32 %v5068_v21, %v2324_v37  ;;  %v3348_v48 = vmul.f32 %v6930_v45, %v7084_v5  ;;  %v7121_v50 = vadd.f32 %v6940_v44, %v2466_v17  ;;  %v3637_v61 = vadd.f32 %v7106_v8, %v3636_v30  ;;  %v7135_v45 = vpop.permute.xlu0 %2779  ;;  %v9732_v30 = vld [vmem:[#allocation157_spill] sm:$0xff] }
  0xc3   :  { %v7111_v3 = vrot.slane %v9698_v57, %v9725_v28  ;;  %v7124_v15 = vpop.eup %4977  ;;  %v7126_v0 = vadd.f32 %v3630_v29, %v3629_v4  ;;  %v4627_v57 = vld [vmem:[%s9338_s2 + $0xb8] sm:$0xff]  ;;  %v2340_v58 = vmul.f32 %v7036_v13, %v6678_v49  ;;  %v3805_v40 = vadd.f32 %v3804_v56, %v2338_v19  ;;  %9728 = vst [vmem:[#allocation45_spill] sm:$0xff] %v7135_v45  ;;  %v1788_v49 = vld [vmem:[%s9337_s1] sm:$0xff]  ;;  %v9730_v19 = vld [vmem:[#allocation89_spill] sm:$0xff] }
  0xc4   :  { %9727 = vst [vmem:[#allocation118_spill] sm:$0xff] %v7124_v15  ;;  %v2323_v44 = vmul.f32 %v7124_v15, %v6801_v62  ;;  %v2331_v4 = vmul.f32 %v7124_v15, %v9729_v9  ;;  %v2339_v20 = vmul.f32 %v7124_v15, %v6811_v35  ;;  %v3638_v17 = vadd.f32 %v4627_v57, %v3637_v61  ;;  %v9731_v29 = vld [vmem:[#allocation58_spill] sm:$0xff]  ;;  %v9734_v28 = vld [vmem:[#allocation108_spill] sm:$0xff] }
  0xc5   :  { %9726 = vst [vmem:[#allocation75_spill] sm:$0xff] %v7111_v3  ;;  %3004 = vbcast.lane.b32.xlu1 %v7111_v3, 264  ;;  %3000 = vbcast.lane.b32.xlu0 %v7111_v3, 256  ;;  %v7147_v33 = vadd.f32 %v9730_v19, %v3121_v60  ;;  %v7150_v56 = vadd.f32 %v9731_v29, %v2465_v7  ;;  %v9735_v9 = vld [vmem:[#allocation44_spill] sm:$0xff]  ;;  %v7161_v7 = vpop.permute.xlu1 %2783 }
  0xc6   :  { %v7153_v63 = vadd.f32 %v9732_v30, %v3120_v16  ;;  %v3467_v62 = vadd.f32 %v3466_v34, %v3354_v2  ;;  %v3339_v21 = vmul.f32 %v9734_v28, %v2323_v44  ;;  %v3780_v41 = vadd.f32 %v9735_v9, %v2323_v44  ;;  %9736 = vst [vmem:[#allocation49_spill] sm:$0xff] %v7161_v7  ;;  %v9737_v16 = vld [vmem:[#allocation152_spill] sm:$0xff]  ;;  %v7173_v28 = vpop.permute.xlu0 %2790 }
  0xc7   :  { %v3347_v35 = vmul.f32 %v6919_v55, %v2331_v4  ;;  %v3793_v61 = vadd.f32 %v7042_v54, %v2331_v4  ;;  %v3356_v22 = vmul.f32 %v4627_v57, %v2340_v58  ;;  %v3355_v12 = vmul.f32 %v7106_v8, %v2339_v20  ;;  %v1789_v55 = vld [vmem:[%s9337_s1 + $0x8] sm:$0xff]  ;;  %9738 = vst [vmem:[#allocation114_spill] sm:$0xff] %v7173_v28  ;;  %v9739_v9 = vld [vmem:[#allocation64_spill] sm:$0xff] }
  0xc8   :  { %9733 = vst [vmem:[#allocation43_spill] sm:$0xff] %v7153_v63  ;;  %v3639_v60 = vrot.slane %v3638_v17, 4  ;;  %v3806_v19 = vadd.f32 %v3805_v40, %v2339_v20  ;;  %v3442_v2 = vadd.f32 %v9737_v16, %v3339_v21  ;;  %v3781_v34 = vadd.f32 %v3780_v41, %v2324_v37  ;;  %v5069_v40 = vld [vmem:[%s9339_s3 + $0xb8] sm:$0xff] }
  0xc9   :  { %4358 = vperm.xlu1 %4746, %v1788_v49   ;;  %3008 = vbcast.lane.b32.xlu0 %v7111_v3, 272  ;;  %v3455_v29 = vadd.f32 %v7018_v11, %v3347_v35  ;;  %v3794_v44 = vadd.f32 %v3793_v61, %v7084_v5  ;;  %v3997_v54 = vadd.f32 1.0, %v7126_v0  ;;  %v2468_v4 = vmul.f32 %v5069_v40, %v4627_v57 }
  0xca   :  { %v3468_v20 = vadd.f32 %v3467_v62, %v3355_v12  ;;  %v3807_v30 = vadd.f32 %v3806_v19, %v2340_v58  ;;  %v3443_v41 = vadd.f32 %v3442_v2, %v3340_v38  ;;  %v3782_v37 = vrot.slane %v3781_v34, 4  ;;  %v1790_v38 = vld [vmem:[%s9337_s1 + $0x10] sm:$0xff] }
  0xcb   :  { %v3456_v11 = vadd.f32 %v3455_v29, %v3348_v48  ;;  %v3795_v21 = vrot.slane %v3794_v44, 4  ;;  %v3123_v35 = vmul.f32 %v4627_v57, %v9739_v9  ;;  %v3640_v16 = vadd.f32 %v3639_v60, %v3638_v17  ;;  %v7184_v17 = vpop.permute.xlu1 %2794  ;;  %v9746_v9 = vld [vmem:[#allocation109_spill] sm:$0xff] }
  0xcc   :  { %v3469_v61 = vadd.f32 %v3468_v20, %v3356_v22  ;;  %v3808_v5 = vrot.slane %v3807_v30, 4  ;;  %v9494_v3 = vmov 0   ;;  %v3444_v45 = vrot.slane %v3443_v41, 4  ;;  %v5070_v22 = vld [vmem:[%s9339_s3 + $0xb0] sm:$0xff]  ;;  %9740 = vst [vmem:[#allocation89_spill] sm:$0xff] %v7184_v17  ;;  %v4629_v20 = vld [vmem:[%s9338_s2 + $0xc8] sm:$0xff] }
  0xcd   :  { %4748 = vset.pattern.permute.xlu1 %v9494_v3  ;;  %4362 = vperm.xlu0 %4747, %v1789_v55   ;;  %v3783_v7 = vadd.f32 %v3782_v37, %v3781_v34  ;;  %v3457_v40 = vrot.slane %v3456_v11, 4  ;;  %v3796_v12 = vadd.f32 %v3795_v21, %v3794_v44  ;;  %4979 = vrcp.f32 %v3997_v54  ;;  %v7191_v37 = vpop.permute.xlu0 %2798  ;;  %v9743_v21 = vld [vmem:[#allocation46_spill] sm:$0xff] }
  0xce   :  { %4274 = vperm.xlu1 %4748, %v1788_v49   ;;  %v2467_v48 = vmul.f32 %v5070_v22, %v7106_v8  ;;  %v3470_v57 = vrot.slane %v3469_v61, 4  ;;  %v3809_v58 = vadd.f32 %v3808_v5, %v3807_v30  ;;  %v3445_v62 = vadd.f32 %v3444_v45, %v3443_v41  ;;  %v9741_v49 = vld [vmem:[#allocation115_spill] sm:$0xff]  ;;  %9742 = vst [vmem:[#allocation58_spill] sm:$0xff] %v7191_v37  ;;  %v9744_v45 = vld [vmem:[#allocation130_spill] sm:$0xff] }
  0xcf   :  { %v3784_v60 = vrot.slane %v3783_v7, 2  ;;  %v3458_v19 = vadd.f32 %v3457_v40, %v3456_v11  ;;  %v3797_v2 = vrot.slane %v3796_v12, 2  ;;  %v3122_v34 = vmul.f32 %v7106_v8, %v9741_v49  ;;  %v9745_v11 = vld [vmem:[#allocation65_spill] sm:$0xff]  ;;  %v1791_v8 = vld [vmem:[%s9337_s1 + $0x18] sm:$0xff] }
  0xd0   :  { %v3471_v29 = vadd.f32 %v3470_v57, %v3469_v61  ;;  %v3641_v44 = vrot.slane %v3640_v16, 2  ;;  %v3810_v54 = vrot.slane %v3809_v58, 2  ;;  %v3446_v5 = vrot.slane %v3445_v62, 2 }
  0xd1   :  { %4366 = vperm.xlu0 %4747, %v1790_v38   ;;  %v3459_v30 = vrot.slane %v3458_v19, 2  ;;  %v2342_v41 = vmul.f32 %v9744_v45, %v9743_v21  ;;  %v2341_v40 = vmul.f32 %v9746_v9, %v9745_v11  ;;  %v3785_v61 = vadd.f32 %v3784_v60, %v3783_v7  ;;  %v5071_v21 = vld [vmem:[%s9339_s3 + $0xc8] sm:$0xff] }
  0xd2   :  { %4279 = vperm.xlu1 %4748, %v1789_v55   ;;  %v3798_v22 = vadd.f32 %v3797_v2, %v3796_v12  ;;  %v7201_v57 = vadd.f32 %v6991_v36, %v2468_v4  ;;  %v3472_v49 = vrot.slane %v3471_v29, 2  ;;  %v3447_v3 = vadd.f32 %v3446_v5, %v3445_v62  ;;  %v4628_v36 = vld [vmem:[%s9338_s2 + $0xc0] sm:$0xff]  ;;  %v7213_v4 = vpop.permute.xlu1 %2802  ;;  %v7224_v2 = vpop.permute.xlu0 %2806 }
  0xd3   :  { %v3460_v37 = vadd.f32 %v3459_v30, %v3458_v19  ;;  %v2470_v28 = vmul.f32 %v5071_v21, %v4629_v20  ;;  %v3125_v11 = vmul.f32 %v4629_v20, %v7005_v59  ;;  %v7208_v55 = vadd.f32 %v6994_v46, %v3123_v35  ;;  %9747 = vst [vmem:[#allocation157_spill] sm:$0xff] %v7213_v4  ;;  %v1792_v46 = vld [vmem:[%s9337_s1 + $0x20] sm:$0xff] }
  0xd4   :  { %v3473_v17 = vadd.f32 %v3472_v49, %v3471_v29  ;;  %v3642_v63 = vadd.f32 %v3641_v44, %v3640_v16  ;;  %v3811_v7 = vadd.f32 %v3810_v54, %v3809_v58  ;;  %v7216_v12 = vadd.f32 %v6998_v52, %v2467_v48  ;;  %9750 = vst [vmem:[#allocation152_spill] sm:$0xff] %v7224_v2  ;;  %v9753_v48 = vld [vmem:[#allocation155_spill] sm:$0xff]  ;;  %v9755_v2 = vld [vmem:[#allocation76_spill] sm:$0xff] }
  0xd5   :  { %4370 = vperm.xlu0 %4747, %v1791_v8   ;;  %v7219_v62 = vadd.f32 %v7039_v51, %v3122_v34  ;;  %v3358_v59 = vmul.f32 %v4629_v20, %v2342_v41  ;;  %v3357_v60 = vmul.f32 %v4628_v36, %v2341_v40  ;;  %v3448_v35 = vrot.slane %v3447_v3, 1  ;;  %v5072_v51 = vld [vmem:[%s9339_s3 + $0xc0] sm:$0xff] }
  0xd6   :  { %9748 = vst [vmem:[#allocation108_spill] sm:$0xff] %v7216_v12  ;;  %4284 = vperm.xlu1 %4748, %v1790_v38   ;;  %v3786_v16 = vrot.slane %v3785_v61, 1  ;;  %v3461_v58 = vrot.slane %v3460_v37, 1  ;;  %v3799_v19 = vrot.slane %v3798_v22, 1  ;;  %v7227_v29 = vadd.f32 %v7045_v6, %v2470_v28  ;;  %v4631_v6 = vld [vmem:[%s9338_s2 + $0xd8] sm:$0xff]  ;;  %v7248_v12 = vpop.permute.xlu1 %2810 }
  0xd7   :  { %9749 = vst [vmem:[#allocation44_spill] sm:$0xff] %v7219_v62  ;;  %v7230_v52 = vadd.f32 %v7048_v24, %v3125_v11  ;;  %v2469_v38 = vmul.f32 %v5072_v51, %v4628_v36  ;;  %v3124_v34 = vmul.f32 %v4628_v36, %v9753_v48  ;;  %v7236_v44 = vpop.eup %4979  ;;  %v3474_v54 = vrot.slane %v3473_v17, 1  ;;  %v9754_v28 = vld [vmem:[#allocation55_spill] sm:$0xff]  ;;  %v1793_v48 = vld [vmem:[%s9337_s1 + $0x28] sm:$0xff] }
  0xd8   :  { %9751 = vst [vmem:[#allocation64_spill] sm:$0xff] %v7227_v29  ;;  %v3643_v5 = vrot.slane %v3642_v63, 1  ;;  %v3812_v30 = vrot.slane %v3811_v7, 1  ;;  %v2343_v24 = vmul.f32 %v9677_v1, %v9754_v28  ;;  %v3476_v49 = vadd.f32 %v3358_v59, %v3357_v60 }
  0xd9   :  { %9752 = vst [vmem:[#allocation115_spill] sm:$0xff] %v7230_v52  ;;  %4374 = vperm.xlu0 %4747, %v1792_v46   ;;  %v3645_v21 = vadd.f32 %v4629_v20, %v4628_v36  ;;  %v3814_v11 = vadd.f32 %v2342_v41, %v2341_v40  ;;  %v2344_v51 = vmul.f32 %v6338_v25, %v9755_v2  ;;  %v5073_v41 = vld [vmem:[%s9339_s3 + $0xd8] sm:$0xff]  ;;  %v7265_v36 = vpop.permute.xlu0 %2814 }
  0xda   :  { %4289 = vperm.xlu1 %4748, %v1791_v8   ;;  %v3449_v4 = vadd.f32 %v3448_v35, %v3447_v3  ;;  %v3787_v52 = vadd.f32 %v3786_v16, %v3785_v61  ;;  %v3462_v29 = vadd.f32 %v3461_v58, %v3460_v37  ;;  %v3800_v62 = vadd.f32 %v3799_v19, %v3798_v22  ;;  %v4630_v3 = vld [vmem:[%s9338_s2 + $0xd0] sm:$0xff]  ;;  %v9756_v35 = vld [vmem:[#allocation105_spill] sm:$0xff] }
  0xdb   :  { %v7251_v28 = vadd.f32 %v7052_v26, %v2469_v38  ;;  %v7254_v20 = vadd.f32 %v7070_v27, %v3124_v34  ;;  %v2472_v40 = vmul.f32 %v5073_v41, %v4631_v6  ;;  %v3127_v8 = vmul.f32 %v4631_v6, %v7059_v53  ;;  %v7272_v53 = vld [vmem:[%s9337_s1 + $0x30] sm:$0xff] }
  0xdc   :  { %v3475_v37 = vadd.f32 %v3474_v54, %v3473_v17  ;;  %v7263_v61 = vadd.f32 %v3643_v5, %v3642_v63  ;;  %v3813_v22 = vadd.f32 %v3812_v30, %v3811_v7  ;;  %v3359_v26 = vmul.f32 %v4630_v3, %v2343_v24  ;;  %v9757_v7 = vld [vmem:[#allocation41_spill] sm:$0xff] }
  0xdd   :  { %4378 = vperm.xlu0 %4747, %v1793_v48   ;;  %v3360_v27 = vmul.f32 %v4631_v6, %v2344_v51  ;;  %v3646_v59 = vadd.f32 %v4630_v3, %v3645_v21  ;;  %v3815_v60 = vadd.f32 %v3814_v11, %v2343_v24  ;;  %v2346_v16 = vmul.f32 %v6720_v10, %v9756_v35 }
  0xde   :  { %4294 = vperm.xlu1 %4748, %v1792_v46   ;;  %v3944_v17 = vsub.f32 %v3787_v52, %v3449_v4  ;;  %v3945_v63 = vsub.f32 %v3800_v62, %v3462_v29  ;;  %v3477_v58 = vadd.f32 %v3476_v49, %v3359_v26  ;;  %v2345_v19 = vmul.f32 %v6772_v32, %v9757_v7  ;;  %v5074_v46 = vld [vmem:[%s9339_s3 + $0xd0] sm:$0xff]  ;;  %v4632_v62 = vld [vmem:[%s9338_s2 + $0xe0] sm:$0xff]  ;;  %v9758_v52 = vld [vmem:[#allocation103_spill] sm:$0xff]  ;;  %v7295_v49 = vpop.permute.xlu1 %2818 }
  0xdf   :  { %v7277_v2 = vadd.f32 %v7073_v31, %v2472_v40  ;;  %v7280_v38 = vadd.f32 %v7090_v47, %v3127_v8  ;;  %v2471_v34 = vmul.f32 %v5074_v46, %v4630_v3  ;;  %v3126_v54 = vmul.f32 %v4630_v3, %v7027_v43  ;;  %v4633_v47 = vld [vmem:[%s9338_s2 + $0xe8] sm:$0xff]  ;;  %v7300_v3 = vpop.permute.xlu0 %2825  ;;  %v9760_v7 = vld [vmem:[#allocation124_spill] sm:$0xff] }
  0xe0   :  { %v3957_v5 = vsub.f32 %v9758_v52, %v3449_v4  ;;  %v3958_v30 = vsub.f32 %v7126_v0, %v3462_v29  ;;  %v3946_v31 = vsub.f32 %v3813_v22, %v3475_v37  ;;  %v3361_v24 = vmul.f32 %v4632_v62, %v2345_v19  ;;  %v9759_v0 = vld [vmem:[#allocation143_spill] sm:$0xff] }
  0xe1   :  { %4382 = vperm.xlu0 %4747, %v7272_v53   ;;  %v3362_v21 = vmul.f32 %v4633_v47, %v2346_v16  ;;  %v3478_v43 = vadd.f32 %v3477_v58, %v3360_v27  ;;  %v3647_v11 = vadd.f32 %v4631_v6, %v3646_v59  ;;  %v3816_v41 = vadd.f32 %v3815_v60, %v2344_v51 }
  0xe2   :  { %4299 = vperm.xlu1 %4748, %v1793_v48   ;;  %v3983_v40 = vmul.f32 %v3944_v17, %v3944_v17  ;;  %v3984_v8 = vmul.f32 %v3945_v63, %v3945_v63  ;;  %v3959_v4 = vsub.f32 %v7263_v61, %v3475_v37  ;;  %v2348_v29 = vmul.f32 %v7036_v13, %v9759_v0  ;;  %v4635_v48 = vld [vmem:[%s9338_s2 + $0xf8] sm:$0xff]  ;;  %v4634_v37 = vld [vmem:[%s9338_s2 + $0xf0] sm:$0xff] }
  0xe3   :  { %v3479_v22 = vadd.f32 %v3478_v43, %v3361_v24  ;;  %v3648_v26 = vadd.f32 %v4632_v62, %v3647_v11  ;;  %v3817_v35 = vadd.f32 %v3816_v41, %v2345_v19  ;;  %v2347_v46 = vmul.f32 %v7124_v15, %v9760_v7  ;;  %v9763_v43 = vld [vmem:[#allocation39_spill] sm:$0xff] }
  0xe4   :  { %v3970_v52 = vmul.f32 %v3957_v5, %v3957_v5  ;;  %v3971_v27 = vmul.f32 %v3958_v30, %v3958_v30  ;;  %v7305_v6 = vadd.f32 %v7093_v23, %v2471_v34  ;;  %v7308_v51 = vadd.f32 %v7096_v42, %v3126_v54  ;;  %v5075_v42 = vld [vmem:[%s9339_s3 + $0xe8] sm:$0xff]  ;;  %v7321_v54 = vpop.permute.xlu1 %2829 }
  0xe5   :  { %v3364_v59 = vmul.f32 %v4635_v48, %v2348_v29  ;;  %v3363_v60 = vmul.f32 %v4634_v37, %v2347_v46  ;;  %v3480_v17 = vadd.f32 %v3479_v22, %v3362_v21  ;;  %v3649_v63 = vadd.f32 %v4633_v47, %v3648_v26  ;;  %9761 = vst [vmem:[#allocation46_spill] sm:$0xff] %v7321_v54  ;;  %v9782_v54 = vld [vmem:[#allocation115_spill] sm:$0xff] }
  0xe6   :  { %v4022_v58 = vmul.f32 %v7061_v14, %v3983_v40  ;;  %v4023_v23 = vmul.f32 %v7236_v44, %v3984_v8  ;;  %v2474_v19 = vmul.f32 %v5075_v42, %v4633_v47  ;;  %v3818_v34 = vadd.f32 %v3817_v35, %v2346_v16  ;;  %v5076_v14 = vld [vmem:[%s9339_s3 + $0xe0] sm:$0xff]  ;;  %v9764_v40 = vld [vmem:[#allocation67_spill] sm:$0xff]  ;;  %v7333_v8 = vpop.permute.xlu0 %2833  ;;  %v9769_v42 = vld [vmem:[#allocation49_spill] sm:$0xff] }
  0xe7   :  { %v7323_v5 = vmul.f32 %v3959_v4, %v3959_v4  ;;  %v3481_v30 = vadd.f32 %v3480_v17, %v3363_v60  ;;  %v3650_v24 = vadd.f32 %v4634_v37, %v3649_v63  ;;  %v2350_v21 = vmul.f32 %v9744_v45, %v9763_v43 }
  0xe8   :  { %v3129_v11 = vmul.f32 %v4633_v47, %v7113_v39  ;;  %v2473_v44 = vmul.f32 %v5076_v14, %v4632_v62  ;;  %v3819_v41 = vadd.f32 %v3818_v34, %v2347_v46  ;;  %v2349_v16 = vmul.f32 %v9746_v9, %v9764_v40  ;;  %v4637_v46 = vld [vmem:[%s9338_s2 + $0x108] sm:$0xff]  ;;  %v7360_v63 = vpop.permute.xlu1 %2837 }
  0xe9   :  { %9762 = vst [vmem:[#allocation65_spill] sm:$0xff] %v7323_v5  ;;  %v7335_v4 = vmul.f32 %v3946_v31, %v3946_v31  ;;  %v3128_v0 = vmul.f32 %v4632_v62, %v7078_v18  ;;  %v3482_v22 = vadd.f32 %v3481_v30, %v3364_v59  ;;  %v3651_v26 = vadd.f32 %v4635_v48, %v3650_v24  ;;  %v4636_v31 = vld [vmem:[%s9338_s2 + $0x100] sm:$0xff]  ;;  %v9770_v24 = vld [vmem:[#allocation45_spill] sm:$0xff] }
  0xea   :  { %v7338_v35 = vadd.f32 %v4022_v58, %v3970_v52  ;;  %v7340_v39 = vadd.f32 %v4023_v23, %v3971_v27  ;;  %v7343_v47 = vadd.f32 %v7121_v50, %v2474_v19  ;;  %v3820_v7 = vadd.f32 %v3819_v41, %v2348_v29  ;;  %v5077_v50 = vld [vmem:[%s9339_s3 + $0xf8] sm:$0xff]  ;;  %v9771_v14 = vld [vmem:[#allocation57_spill] sm:$0xff]  ;;  %v7372_v41 = vpop.permute.xlu0 %2841 }
  0xeb   :  { %9765 = vst [vmem:[#allocation109_spill] sm:$0xff] %v7335_v4  ;;  %v3483_v60 = vrot.slane %v3482_v22, 4  ;;  %v3652_v18 = vrot.slane %v3651_v26, 4  ;;  %v3366_v62 = vmul.f32 %v4637_v46, %v2350_v21  ;;  %v3365_v59 = vmul.f32 %v4636_v31, %v2349_v16  ;;  %v9768_v58 = vld [vmem:[#allocation43_spill] sm:$0xff]  ;;  %9772 = vst [vmem:[#allocation76_spill] sm:$0xff] %v7372_v41  ;;  %v9779_v4 = vld [vmem:[#allocation40_spill] sm:$0xff] }
  0xec   :  { %9766 = vst [vmem:[#allocation155_spill] sm:$0xff] %v7338_v35  ;;  %9767 = vst [vmem:[#allocation55_spill] sm:$0xff] %v7340_v39  ;;  %v7352_v52 = vadd.f32 %v7147_v33, %v3129_v11  ;;  %v7355_v27 = vadd.f32 %v7150_v56, %v2473_v44  ;;  %v2476_v29 = vmul.f32 %v5077_v50, %v4635_v48  ;;  %v3821_v17 = vrot.slane %v3820_v7, 4  ;;  %v5078_v33 = vld [vmem:[%s9339_s3 + $0xf0] sm:$0xff] }
  0xed   :  { %v7363_v23 = vadd.f32 %v9768_v58, %v3128_v0  ;;  %v3131_v19 = vmul.f32 %v4635_v48, %v9769_v42  ;;  %v3484_v34 = vadd.f32 %v3483_v60, %v3482_v22  ;;  %v3653_v30 = vadd.f32 %v3652_v18, %v3651_v26  ;;  %v9773_v58 = vld [vmem:[#allocation78_spill] sm:$0xff] }
  0xee   :  { %v2475_v56 = vmul.f32 %v5078_v33, %v4634_v37  ;;  %v3130_v43 = vmul.f32 %v4634_v37, %v9770_v24  ;;  %v3822_v11 = vadd.f32 %v3821_v17, %v3820_v7  ;;  %v2351_v44 = vmul.f32 %v9677_v1, %v9771_v14  ;;  %v4638_v22 = vld [vmem:[%s9338_s2 + $0x110] sm:$0xff]  ;;  %v5079_v17 = vld [vmem:[%s9339_s3 + $0x108] sm:$0xff]  ;;  %v5080_v33 = vld [vmem:[%s9339_s3 + $0x100] sm:$0xff] }
  0xef   :  { %v3485_v40 = vrot.slane %v3484_v34, 2  ;;  %v3489_v0 = vadd.f32 %v3366_v62, %v3365_v59  ;;  %v3658_v50 = vadd.f32 %v4637_v46, %v4636_v31  ;;  %v2352_v48 = vmul.f32 %v6338_v25, %v9773_v58  ;;  %v9774_v59 = vld [vmem:[#allocation89_spill] sm:$0xff]  ;;  %v9778_v58 = vld [vmem:[#allocation114_spill] sm:$0xff] }
  0xf0   :  { %v7380_v26 = vadd.f32 %v7201_v57, %v2476_v29  ;;  %v3654_v37 = vrot.slane %v3653_v30, 2  ;;  %v3827_v7 = vadd.f32 %v2350_v21, %v2349_v16  ;;  %v3367_v60 = vmul.f32 %v4638_v22, %v2351_v44  ;;  %v9775_v57 = vld [vmem:[#allocation108_spill] sm:$0xff] }
  0xf1   :  { %v3823_v18 = vrot.slane %v3822_v11, 2  ;;  %v2478_v62 = vmul.f32 %v5079_v17, %v4637_v46  ;;  %v3133_v42 = vmul.f32 %v4637_v46, %v9774_v59  ;;  %v2477_v24 = vmul.f32 %v5080_v33, %v4636_v31  ;;  %v9776_v21 = vld [vmem:[#allocation44_spill] sm:$0xff]  ;;  %v4639_v46 = vld [vmem:[%s9338_s2 + $0x118] sm:$0xff]  ;;  %v7402_v17 = vpop.permute.xlu1 %2845 }
  0xf2   :  { %v7390_v14 = vadd.f32 %v7208_v55, %v3131_v19  ;;  %v7393_v29 = vadd.f32 %v9775_v57, %v2475_v56  ;;  %v7396_v16 = vadd.f32 %v9776_v21, %v3130_v43  ;;  %v3132_v39 = vmul.f32 %v4636_v31, %v9778_v58  ;;  %v9780_v57 = vld [vmem:[#allocation122_spill] sm:$0xff]  ;;  %v7408_v21 = vpop.permute.xlu0 %2849  ;;  %v9781_v58 = vld [vmem:[#allocation64_spill] sm:$0xff] }
  0xf3   :  { %v3486_v59 = vadd.f32 %v3485_v40, %v3484_v34  ;;  %v3368_v35 = vmul.f32 %v4639_v46, %v2352_v48  ;;  %v3490_v33 = vadd.f32 %v3489_v0, %v3367_v60  ;;  %v3659_v5 = vadd.f32 %v4638_v22, %v3658_v50  ;;  %v9784_v40 = vld [vmem:[#allocation157_spill] sm:$0xff] }
  0xf4   :  { %9777 = vst [vmem:[#allocation105_spill] sm:$0xff] %v7396_v16  ;;  %v3655_v55 = vadd.f32 %v3654_v37, %v3653_v30  ;;  %v3828_v19 = vadd.f32 %v3827_v7, %v2351_v44  ;;  %v2354_v56 = vmul.f32 %v6720_v10, %v9779_v4  ;;  %v2353_v43 = vmul.f32 %v6772_v32, %v9780_v57  ;;  %v4640_v30 = vld [vmem:[%s9338_s2 + $0x120] sm:$0xff]  ;;  %v9785_v37 = vld [vmem:[#allocation58_spill] sm:$0xff] }
  0xf5   :  { %v3824_v31 = vadd.f32 %v3823_v18, %v3822_v11  ;;  %v7411_v41 = vadd.f32 %v9781_v58, %v2478_v62  ;;  %v7414_v16 = vadd.f32 %v9782_v54, %v3133_v42  ;;  %v7417_v34 = vadd.f32 %v7251_v28, %v2477_v24  ;;  %v5081_v11 = vld [vmem:[%s9339_s3 + $0x118] sm:$0xff]  ;;  %v5082_v28 = vld [vmem:[%s9339_s3 + $0x110] sm:$0xff]  ;;  %v7436_v57 = vpop.permute.xlu1 %2853 }
  0xf6   :  { %v7423_v4 = vadd.f32 %v7254_v20, %v3132_v39  ;;  %v2480_v44 = vmul.f32 %v5081_v11, %v4639_v46  ;;  %v3135_v0 = vmul.f32 %v4639_v46, %v9784_v40  ;;  %v3369_v50 = vmul.f32 %v4640_v30, %v2353_v43  ;;  %v4641_v20 = vld [vmem:[%s9338_s2 + $0x128] sm:$0xff] }
  0xf7   :  { %9783 = vst [vmem:[#allocation41_spill] sm:$0xff] %v7417_v34  ;;  %v2479_v54 = vmul.f32 %v5082_v28, %v4638_v22  ;;  %v3134_v7 = vmul.f32 %v4638_v22, %v9785_v37  ;;  %v3491_v39 = vadd.f32 %v3490_v33, %v3368_v35  ;;  %v3660_v60 = vadd.f32 %v4639_v46, %v3659_v5  ;;  %v9786_v34 = vld [vmem:[#allocation144_spill] sm:$0xff]  ;;  %v5083_v5 = vld [vmem:[%s9339_s3 + $0x128] sm:$0xff]  ;;  %v7449_v46 = vpop.permute.xlu0 %2860 }
  0xf8   :  { %v3487_v18 = vrot.slane %v3486_v59, 1  ;;  %v3656_v62 = vrot.slane %v3655_v55, 1  ;;  %v3370_v42 = vmul.f32 %v4641_v20, %v2354_v56  ;;  %v3829_v24 = vadd.f32 %v3828_v19, %v2352_v48 }
  0xf9   :  { %v3825_v58 = vrot.slane %v3824_v31, 1  ;;  %v3492_v11 = vadd.f32 %v3491_v39, %v3369_v50  ;;  %v3661_v40 = vadd.f32 %v4640_v30, %v3660_v60  ;;  %v2356_v28 = vmul.f32 %v7036_v13, %v9786_v34  ;;  %v9787_v34 = vld [vmem:[#allocation53_spill] sm:$0xff]  ;;  %v7463_v50 = vld [vmem:[%s9338_s2 + $0x138] sm:$0xff] }
  0xfa   :  { %v7441_v22 = vadd.f32 %v7277_v2, %v2480_v44  ;;  %v7444_v37 = vadd.f32 %v7280_v38, %v3135_v0  ;;  %v2482_v35 = vmul.f32 %v5083_v5, %v4641_v20  ;;  %v3830_v48 = vadd.f32 %v3829_v24, %v2353_v43  ;;  %v9791_v5 = vld [vmem:[#allocation69_spill] sm:$0xff] }
  0xfb   :  { %v7452_v33 = vadd.f32 %v7305_v6, %v2479_v54  ;;  %v7455_v19 = vadd.f32 %v7308_v51, %v3134_v7  ;;  %v3137_v2 = vmul.f32 %v4641_v20, %v7248_v12  ;;  %v2355_v38 = vmul.f32 %v7124_v15, %v9787_v34  ;;  %v7468_v6 = vld [vmem:[%s9338_s2 + $0x130] sm:$0xff] }
  0xfc   :  { %v3488_v44 = vadd.f32 %v3487_v18, %v3486_v59  ;;  %v3657_v0 = vadd.f32 %v3656_v62, %v3655_v55  ;;  %v3493_v43 = vadd.f32 %v3492_v11, %v3370_v42  ;;  %v3662_v51 = vadd.f32 %v4641_v20, %v3661_v40  ;;  %v5084_v55 = vld [vmem:[%s9339_s3 + $0x120] sm:$0xff]  ;;  %v7482_v20 = vld [vmem:[%s9336_s0 + $0x8] sm:$0x1f] }
  0xfd   :  { %v3826_v54 = vadd.f32 %v3825_v58, %v3824_v31  ;;  %v3372_v12 = vmul.f32 %v7463_v50, %v2356_v28  ;;  %v3371_v7 = vmul.f32 %v7468_v6, %v2355_v38  ;;  %v3831_v39 = vadd.f32 %v3830_v48, %v2354_v56  ;;  %v9788_v31 = vld [vmem:[#allocation37_spill] sm:$0xff]  ;;  %v7489_v56 = vpop.permute.xlu1 %2864  ;;  %v9790_v58 = vld [vmem:[#allocation91_spill] sm:$0xff]  ;;  %v7496_v40 = vld [vmem:[%s9338_s2 + $0x140] sm:$0xff] }
  0xfe   :  { %v7473_v59 = vadd.f32 %v7343_v47, %v2482_v35  ;;  %v2481_v60 = vmul.f32 %v5084_v55, %v4640_v30  ;;  %v3663_v18 = vadd.f32 %v7468_v6, %v3662_v51  ;;  %v9789_v62 = vsub.s32 3, %v9788_v31  ;;  %v9792_v51 = vld [vmem:[#allocation152_spill] sm:$0xff] }
  0xff   :  { %v3494_v47 = vadd.f32 %v3493_v43, %v3371_v7  ;;  %v3832_v24 = vadd.f32 %v3831_v39, %v2355_v38  ;;  %v2358_v11 = vmul.f32 %v9744_v45, %v9790_v58  ;;  %v2357_v35 = vmul.f32 %v9746_v9, %v9791_v5  ;;  %v7505_v38 = vpop.permute.xlu0 %2868  ;;  %v7510_v5 = vld [vmem:[%s9337_s1 + $0x38] sm:$0xff] }
 0x100   :  { %v7487_v42 = vrot.slane %v7482_v20, %v9789_v62  ;;  %v3998_v48 = vadd.f32 1.0, %v7263_v61  ;;  %v3960_v34 = vsub.f32 %v3657_v0, %v3488_v44  ;;  %v3136_v55 = vmul.f32 %v4640_v30, %v9792_v51  ;;  %9793 = vst [vmem:[#allocation103_spill] sm:$0xff] %v7505_v38  ;;  %v7521_v51 = vld [vmem:[%s9338_s2 + $0x148] sm:$0xff] }
 0x101   :  { %v3664_v62 = vadd.f32 %v7463_v50, %v3663_v18  ;;  %v3947_v43 = vsub.f32 %v3826_v54, %v3488_v44  ;;  %v3999_v7 = vadd.f32 1.0, %v3657_v0  ;;  %v3495_v39 = vadd.f32 %v3494_v47, %v3372_v12 }
 0x102   :  { %3039 = vbcast.lane.b32.xlu0 %v7487_v42, 264  ;;  %3035 = vbcast.lane.b32.xlu1 %v7487_v42, 256  ;;  %v3833_v58 = vadd.f32 %v3832_v24, %v2356_v28  ;;  %v7513_v61 = vadd.f32 %v7352_v52, %v3137_v2  ;;  %v7516_v30 = vadd.f32 %v7355_v27, %v2481_v60  ;;  %v7530_v52 = vld [vmem:[%s9338_s2 + $0x158] sm:$0xff]  ;;  %4981 = vrcp.f32 %v3998_v48 }
 0x103   :  { %v3665_v18 = vrot.slane %v3664_v62, 4  ;;  %v3140_v28 = vmul.f32 %v7496_v40, %v7300_v3  ;;  %v3496_v44 = vrot.slane %v3495_v39, 4  ;;  %v3374_v54 = vmul.f32 %v7521_v51, %v2358_v11  ;;  %v7540_v3 = vpop.permute.xlu1 %2872 }
 0x104   :  { %v3834_v0 = vrot.slane %v3833_v58, 4  ;;  %v3373_v12 = vmul.f32 %v7496_v40, %v2357_v35  ;;  %v7533_v27 = vadd.f32 %v7363_v23, %v3136_v55  ;;  %v7542_v47 = vmul.f32 %v3960_v34, %v3960_v34  ;;  %v5086_v23 = vld [vmem:[%s9339_s3 + $0x138] sm:$0xff] }
 0x105   :  { %v3666_v2 = vadd.f32 %v3665_v18, %v3664_v62  ;;  %v7536_v60 = vadd.f32 %v7423_v4, %v3140_v28  ;;  %v7544_v24 = vmul.f32 %v3947_v43, %v3947_v43  ;;  %4983 = vrcp.f32 %v3999_v7  ;;  %v7553_v4 = vld [vmem:[%s9338_s2 + $0x150] sm:$0xff]  ;;  %v9796_v62 = vld [vmem:[#allocation59_spill] sm:$0xff]  ;;  %v7559_v7 = vpop.permute.xlu0 %2876 }
 0x106   :  { %4386 = vperm.xlu0 %4747, %v7510_v5   ;;  %4304 = vperm.xlu1 %4748, %v7272_v53   ;;  %9794 = vst [vmem:[#allocation143_spill] sm:$0xff] %v7542_v47  ;;  %v2484_v48 = vmul.f32 %v5086_v23, %v7463_v50  ;;  %v3497_v55 = vadd.f32 %v3496_v44, %v3495_v39  ;;  %9797 = vst [vmem:[#allocation39_spill] sm:$0xff] %v7559_v7  ;;  %v9798_v47 = vld [vmem:[#allocation80_spill] sm:$0xff] }
 0x107   :  { %9795 = vst [vmem:[#allocation124_spill] sm:$0xff] %v7544_v24  ;;  %v3835_v53 = vadd.f32 %v3834_v0, %v3833_v58  ;;  %v3143_v34 = vmul.f32 %v7530_v52, %v7360_v63  ;;  %v2359_v43 = vmul.f32 %v9677_v1, %v9796_v62  ;;  %v3667_v18 = vrot.slane %v3666_v2, 2  ;;  %v7568_v39 = vld [vmem:[%s9337_s1 + $0x40] sm:$0xff]  ;;  %v9810_v1 = vld [vmem:[#allocation46_spill] sm:$0xff] }
 0x108   :  { %v3502_v28 = vadd.f32 %v3374_v54, %v3373_v12  ;;  %v3671_v23 = vadd.f32 %v7521_v51, %v7496_v40  ;;  %v2360_v24 = vmul.f32 %v6338_v25, %v9798_v47  ;;  %v3139_v63 = vmul.f32 %v7463_v50, %v7295_v49  ;;  %v9800_v54 = vld [vmem:[#allocation75_spill] sm:$0xff]  ;;  %v5087_v47 = vld [vmem:[%s9339_s3 + $0x130] sm:$0xff]  ;;  %v9807_v25 = vld [vmem:[#allocation125_spill] sm:$0xff] }
 0x109   :  { %v3840_v58 = vadd.f32 %v2358_v11, %v2357_v35  ;;  %v7573_v44 = vadd.f32 %v7444_v37, %v3143_v34  ;;  %v3142_v0 = vmul.f32 %v7553_v4, %v7333_v8  ;;  %v7579_v12 = vadd.f32 %v7380_v26, %v2484_v48  ;;  %v7592_v8 = vld [vmem:[%s9338_s2 + $0x168] sm:$0xff] }
 0x10a   :  { %3012 = vbcast.lane.b32.xlu0 %v9800_v54, 280  ;;  %v2483_v62 = vmul.f32 %v5087_v47, %v7468_v6  ;;  %v3138_v49 = vmul.f32 %v7468_v6, %v7265_v36  ;;  %v3375_v37 = vmul.f32 %v7553_v4, %v2359_v43  ;;  %v9802_v50 = vmov 1   ;;  %v5088_v35 = vld [vmem:[%s9339_s3 + $0x148] sm:$0xff]  ;;  %v7603_v6 = vpop.permute.xlu1 %2880 }
 0x10b   :  { %9799 = vst [vmem:[#allocation67_spill] sm:$0xff] %v7573_v44  ;;  %9801 = vst [vmem:[#allocation43_spill] sm:$0xff] %v7579_v12  ;;  %4749 = vset.pattern.permute.xlu1 %v9802_v50  ;;  %v3498_v26 = vrot.slane %v3497_v55, 2  ;;  %v3836_v11 = vrot.slane %v3835_v53, 2  ;;  %v2486_v48 = vmul.f32 %v5088_v35, %v7521_v51  ;;  %v7599_v34 = vadd.f32 %v7455_v19, %v3142_v0  ;;  %v7610_v44 = vld [vmem:[%s9338_s2 + $0x160] sm:$0xff]  ;;  %v9806_v19 = vld [vmem:[#allocation47_spill] sm:$0xff] }
 0x10c   :  { %4390 = vperm.xlu1 %4749, %v7568_v39   ;;  %v9804_v36 = vmov 0   ;;  %9805 = vst [vmem:[#allocation45_spill] sm:$0xff] %v7603_v6  ;;  %v3668_v47 = vadd.f32 %v3667_v18, %v3666_v2  ;;  %v3376_v7 = vmul.f32 %v7530_v52, %v2360_v24  ;;  %v3503_v12 = vadd.f32 %v3502_v28, %v3375_v37  ;;  %v7618_v18 = vpop.permute.xlu0 %2884  ;;  %v9809_v37 = vld [vmem:[#allocation105_spill] sm:$0xff] }
 0x10d   :  { %9803 = vst [vmem:[#allocation49_spill] sm:$0xff] %v7599_v34  ;;  %4750 = vset.pattern.permute.xlu0 %v9804_v36  ;;  %v3672_v38 = vadd.f32 %v7553_v4, %v3671_v23  ;;  %v3841_v35 = vadd.f32 %v3840_v58, %v2359_v43  ;;  %v2362_v0 = vmul.f32 %v6720_v10, %v9806_v19  ;;  %9808 = vst [vmem:[#allocation57_spill] sm:$0xff] %v7618_v18  ;;  %v7627_v58 = vpop.eup %4981 }
 0x10e   :  { %v3145_v34 = vmul.f32 %v7592_v8, %v7402_v17  ;;  %v2361_v2 = vmul.f32 %v6772_v32, %v9807_v25  ;;  %v3291_v28 = vadd.f32 %v7390_v14, %v3139_v63  ;;  %v7622_v23 = vadd.f32 %v7393_v29, %v2483_v62  ;;  %9811 = vst [vmem:[#allocation78_spill] sm:$0xff] %v7627_v58  ;;  %v9812_v25 = vld [vmem:[#allocation76_spill] sm:$0xff] }
 0x10f   :  { %v3279_v6 = vadd.f32 %v9809_v37, %v3138_v49  ;;  %v3141_v43 = vmul.f32 %v7521_v51, %v9810_v1  ;;  %v7630_v19 = vadd.f32 %v7411_v41, %v2486_v48  ;;  %v3144_v18 = vmul.f32 %v7610_v44, %v9812_v25  ;;  %v7639_v29 = vpop.eup %4983  ;;  %v9816_v25 = vld [vmem:[#allocation134_spill] sm:$0xff] }
 0x110   :  { %v7633_v17 = vadd.f32 %v7513_v61, %v3145_v34  ;;  %v3377_v14 = vmul.f32 %v7610_v44, %v2361_v2  ;;  %3043 = vbcast.lane.b32.xlu1 %v7487_v42, 272  ;;  %9813 = vst [vmem:[#allocation89_spill] sm:$0xff] %v7639_v29  ;;  %v3499_v63 = vadd.f32 %v3498_v26, %v3497_v55  ;;  %v3669_v62 = vrot.slane %v3668_v47, 1  ;;  %v7650_v34 = vld [vmem:[%s9338_s2 + $0x178] sm:$0xff]  ;;  %v7655_v55 = vld [vmem:[%s9338_s2 + $0x170] sm:$0xff]  ;;  %v5093_v29 = vld [vmem:[%s9339_s3 + $0x160] sm:$0xff] }
 0x111   :  { %v3837_v1 = vadd.f32 %v3836_v11, %v3835_v53  ;;  %v3504_v51 = vadd.f32 %v3503_v12, %v3376_v7  ;;  %4751 = vset.pattern.permute.xlu1 %v9804_v36  ;;  %v3378_v41 = vmul.f32 %v7592_v8, %v2362_v0  ;;  %v7644_v61 = vadd.f32 %v7533_v27, %v3144_v18  ;;  %v7657_v53 = vpop.permute.xlu1 %2888  ;;  %v5089_v27 = vld [vmem:[%s9339_s3 + $0x140] sm:$0xff]  ;;  %v5090_v11 = vld [vmem:[%s9339_s3 + $0x158] sm:$0xff]  ;;  %v9815_v18 = vld [vmem:[#allocation146_spill] sm:$0xff] }
 0x112   :  { %v3673_v49 = vadd.f32 %v7530_v52, %v3672_v38  ;;  %v3842_v48 = vadd.f32 %v3841_v35, %v2360_v24  ;;  %v3220_v7 = vadd.f32 %v7414_v16, %v3141_v43  ;;  %v2485_v38 = vmul.f32 %v5089_v27, %v7496_v40  ;;  %v7676_v43 = vpop.permute.xlu0 %2895  ;;  %v7690_v27 = vld [vmem:[%s9338_s2 + $0x188] sm:$0xff] }
 0x113   :  { %v3505_v24 = vadd.f32 %v3504_v51, %v3377_v14  ;;  %v9814_v12 = vsub.s32 4, %v9788_v31  ;;  %v2488_v36 = vmul.f32 %v5090_v11, %v7530_v52  ;;  %v2364_v37 = vmul.f32 %v7036_v13, %v9815_v18 }
 0x114   :  { %v3674_v16 = vadd.f32 %v7610_v44, %v3673_v49  ;;  %v3843_v35 = vadd.f32 %v3842_v48, %v2361_v2  ;;  %v3500_v40 = vrot.slane %v3499_v63, 1  ;;  %v2363_v14 = vmul.f32 %v7124_v15, %v9816_v25  ;;  %v7708_v25 = vld [vmem:[%s9338_s2 + $0x180] sm:$0xff] }
 0x115   :  { %v7667_v26 = vrot.slane %v7482_v20, %v9814_v12  ;;  %v3147_v20 = vmul.f32 %v7650_v34, %v7436_v57  ;;  %v3146_v52 = vmul.f32 %v7655_v55, %v7408_v21  ;;  %v3670_v51 = vadd.f32 %v3669_v62, %v3668_v47  ;;  %v5091_v57 = vld [vmem:[%s9339_s3 + $0x150] sm:$0xff] }
 0x116   :  { %v3838_v49 = vrot.slane %v3837_v1, 1  ;;  %v3506_v2 = vadd.f32 %v3505_v24, %v3378_v41  ;;  %v3675_v48 = vadd.f32 %v7592_v8, %v3674_v16  ;;  %v2487_v12 = vmul.f32 %v5091_v57, %v7553_v4  ;;  %v9817_v16 = vld [vmem:[#allocation93_spill] sm:$0xff]  ;;  %v7710_v4 = vpop.permute.xlu1 %2899 }
 0x117   :  { %3070 = vbcast.lane.b32.xlu0 %v7667_v26, 256  ;;  %3074 = vbcast.lane.b32.xlu1 %v7667_v26, 264  ;;  %v7696_v11 = vadd.f32 %v3291_v28, %v3147_v20  ;;  %v7698_v21 = vadd.f32 %v3279_v6, %v3146_v52  ;;  %v3379_v47 = vmul.f32 %v7655_v55, %v2363_v14  ;;  %v5092_v6 = vld [vmem:[%s9339_s3 + $0x168] sm:$0xff] }
 0x118   :  { %v3380_v62 = vmul.f32 %v7650_v34, %v2364_v37  ;;  %v3676_v41 = vadd.f32 %v7655_v55, %v3675_v48  ;;  %v3844_v24 = vadd.f32 %v3843_v35, %v2362_v0  ;;  %v2366_v18 = vmul.f32 %v9744_v45, %v9817_v16  ;;  %v9818_v35 = vld [vmem:[#allocation72_spill] sm:$0xff] }
 0x119   :  { %v2490_v28 = vmul.f32 %v5092_v6, %v7592_v8  ;;  %v3507_v20 = vadd.f32 %v3506_v2, %v3379_v47  ;;  %v3149_v0 = vmul.f32 %v7690_v27, %v7489_v56  ;;  %v2365_v52 = vmul.f32 %v9746_v9, %v9818_v35  ;;  %v7726_v8 = vpop.permute.xlu0 %2903 }
 0x11a   :  { %v3501_v48 = vadd.f32 %v3500_v40, %v3499_v63  ;;  %v3839_v57 = vadd.f32 %v3838_v49, %v3837_v1  ;;  %v4000_v16 = vadd.f32 1.0, %v3670_v51  ;;  %v2489_v58 = vmul.f32 %v5093_v29, %v7610_v44  ;;  %v9819_v1 = vld [vmem:[#allocation41_spill] sm:$0xff] }
 0x11b   :  { %4309 = vperm.xlu0 %4750, %v7510_v5   ;;  %4133 = vperm.xlu1 %4751, %v7568_v39   ;;  %v3677_v5 = vadd.f32 %v7650_v34, %v3676_v41  ;;  %v3845_v2 = vadd.f32 %v3844_v24, %v2363_v14  ;;  %v7729_v56 = vadd.f32 %v3220_v7, %v3149_v0  ;;  %v7741_v39 = vld [vmem:[%s9338_s2 + $0x198] sm:$0xff] }
 0x11c   :  { %v3148_v63 = vmul.f32 %v7708_v25, %v7449_v46  ;;  %v7734_v40 = vadd.f32 %v9819_v1, %v2485_v38  ;;  %v3508_v49 = vadd.f32 %v3507_v20, %v3380_v62  ;;  %v3382_v47 = vmul.f32 %v7690_v27, %v2366_v18  ;;  %v9823_v20 = vld [vmem:[#allocation112_spill] sm:$0xff]  ;;  %v5094_v1 = vld [vmem:[%s9339_s3 + $0x178] sm:$0xff] }
 0x11d   :  { %v3381_v44 = vmul.f32 %v7708_v25, %v2365_v52  ;;  %v7744_v29 = vadd.f32 %v7441_v22, %v2488_v36  ;;  %v7747_v7 = vadd.f32 %v7452_v33, %v2487_v12  ;;  %v7750_v46 = vadd.f32 %v7473_v59, %v2490_v28  ;;  %v7762_v22 = vld [vmem:[%s9338_s2 + $0x190] sm:$0xff]  ;;  %v7764_v33 = vpop.permute.xlu1 %2907  ;;  %v9822_v28 = vld [vmem:[#allocation83_spill] sm:$0xff]  ;;  %v7776_v35 = vpop.permute.xlu0 %2911 }
 0x11e   :  { %v7753_v38 = vadd.f32 %v7536_v60, %v3148_v63  ;;  %v3948_v14 = vsub.f32 %v3839_v57, %v3501_v48  ;;  %v3961_v62 = vsub.f32 %v3670_v51, %v3501_v48  ;;  %4985 = vrcp.f32 %v4000_v16  ;;  %v9820_v51 = vld [vmem:[#allocation60_spill] sm:$0xff]  ;;  %v9821_v12 = vld [vmem:[#allocation90_spill] sm:$0xff] }
 0x11f   :  { %3047 = vbcast.lane.b32.xlu0 %v7487_v42, 280  ;;  %v7757_v41 = vadd.f32 %v7516_v30, %v2489_v58  ;;  %3016 = vbcast.lane.b32.xlu1 %v9800_v54, 288  ;;  %v3678_v59 = vrot.slane %v3677_v5, 4  ;;  %v3846_v60 = vadd.f32 %v3845_v2, %v2364_v37  ;;  %v3151_v36 = vmul.f32 %v7741_v39, %v7540_v3  ;;  %v9825_v37 = vld [vmem:[#allocation103_spill] sm:$0xff] }
 0x120   :  { %4752 = vset.pattern.permute.xlu0 %v9802_v50  ;;  %v2367_v30 = vmul.f32 %v9821_v12, %v9820_v51  ;;  %v3509_v58 = vrot.slane %v3508_v49, 4  ;;  %v3515_v24 = vadd.f32 %v3382_v47, %v3381_v44  ;;  %v3684_v6 = vadd.f32 %v7690_v27, %v7708_v25  ;;  %v9824_v50 = vld [vmem:[#allocation67_spill] sm:$0xff]  ;;  %v7800_v44 = vld [vmem:[%s9338_s2 + $0x1a8] sm:$0xff] }
 0x121   :  { %v2368_v0 = vmul.f32 %v9823_v20, %v9822_v28  ;;  %v3853_v48 = vadd.f32 %v2366_v18, %v2365_v52  ;;  %v7779_v57 = vadd.f32 %v9824_v50, %v3151_v36  ;;  %v3150_v3 = vmul.f32 %v7762_v22, %v9825_v37  ;;  %v5095_v52 = vld [vmem:[%s9339_s3 + $0x170] sm:$0xff]  ;;  %v5096_v36 = vld [vmem:[%s9339_s3 + $0x188] sm:$0xff] }
 0x122   :  { %v3383_v16 = vmul.f32 %v7762_v22, %v2367_v30  ;;  %v7785_v2 = vmul.f32 %v3961_v62, %v3961_v62  ;;  %v7787_v63 = vmul.f32 %v3948_v14, %v3948_v14  ;;  %v2492_v18 = vmul.f32 %v5094_v1, %v7650_v34  ;;  %v9828_v51 = vld [vmem:[#allocation49_spill] sm:$0xff] }
 0x123   :  { %3020 = vbcast.lane.b32.xlu0 %v9800_v54, 296  ;;  %v2491_v47 = vmul.f32 %v5095_v52, %v7655_v55  ;;  %3078 = vbcast.lane.b32.xlu1 %v7667_v26, 272  ;;  %v3679_v14 = vadd.f32 %v3678_v59, %v3677_v5  ;;  %v3847_v62 = vrot.slane %v3846_v60, 4  ;;  %v2494_v34 = vmul.f32 %v5096_v36, %v7690_v27  ;;  %v7815_v5 = vld [vmem:[%s9338_s2 + $0x1a0] sm:$0xff]  ;;  %v7817_v59 = vpop.permute.xlu1 %2915  ;;  %v9830_v36 = vld [vmem:[#allocation45_spill] sm:$0xff] }
 0x124   :  { %9826 = vst [vmem:[#allocation108_spill] sm:$0xff] %v7785_v2  ;;  %9827 = vst [vmem:[#allocation44_spill] sm:$0xff] %v7787_v63  ;;  %v7808_v28 = vadd.f32 %v9828_v51, %v3150_v3  ;;  %v3510_v50 = vadd.f32 %v3509_v58, %v3508_v49  ;;  %v3384_v55 = vmul.f32 %v7741_v39, %v2368_v0  ;;  %v9829_v2 = vld [vmem:[#allocation107_spill] sm:$0xff]  ;;  %v9831_v49 = vld [vmem:[#allocation128_spill] sm:$0xff] }
 0x125   :  { %v3516_v37 = vadd.f32 %v3515_v24, %v3383_v16  ;;  %v3685_v1 = vadd.f32 %v7762_v22, %v3684_v6  ;;  %v3854_v52 = vadd.f32 %v3853_v48, %v2367_v30  ;;  %v2370_v27 = vmul.f32 %v6720_v10, %v9829_v2  ;;  %v9832_v24 = vld [vmem:[#allocation43_spill] sm:$0xff]  ;;  %v5097_v30 = vld [vmem:[%s9339_s3 + $0x180] sm:$0xff] }
 0x126   :  { %v3153_v3 = vmul.f32 %v7800_v44, %v9830_v36  ;;  %v2369_v58 = vmul.f32 %v6772_v32, %v9831_v49  ;;  %v7827_v6 = vadd.f32 %v9832_v24, %v2492_v18  ;;  %v7830_v16 = vadd.f32 %v7622_v23, %v2491_v47  ;;  %v5098_v2 = vld [vmem:[%s9339_s3 + $0x198] sm:$0xff]  ;;  %v7840_v36 = vpop.permute.xlu0 %2919 }
 0x127   :  { %3082 = vbcast.lane.b32.xlu0 %v7667_v26, 280  ;;  %v2493_v48 = vmul.f32 %v5097_v30, %v7708_v25  ;;  %v2496_v51 = vmul.f32 %v5098_v2, %v7741_v39  ;;  %9833 = vst [vmem:[#allocation114_spill] sm:$0xff] %v7840_v36  ;;  %3051 = vbcast.lane.b32.xlu1 %v7487_v42, 288  ;;  %v3680_v18 = vrot.slane %v3679_v14, 2  ;;  %v9834_v49 = vld [vmem:[#allocation39_spill] sm:$0xff]  ;;  %v3511_v30 = vrot.slane %v3510_v50, 2 }
 0x128   :  { %v7844_v23 = vadd.f32 %v7630_v19, %v2494_v34  ;;  %v7847_v47 = vadd.f32 %v7633_v17, %v3153_v3  ;;  %v3152_v25 = vmul.f32 %v7815_v5, %v9834_v49  ;;  %v7851_v24 = vpop.eup %4985  ;;  %v3848_v63 = vadd.f32 %v3847_v62, %v3846_v60  ;;  %v7857_v36 = vld [vmem:[%s9338_s2 + $0x1b8] sm:$0xff]  ;;  %v7867_v60 = vld [vmem:[%s9338_s2 + $0x1b0] sm:$0xff] }
 0x129   :  { %9835 = vst [vmem:[#allocation40_spill] sm:$0xff] %v7851_v24  ;;  %v3385_v2 = vmul.f32 %v7815_v5, %v2369_v58  ;;  %v3517_v31 = vadd.f32 %v3516_v37, %v3384_v55  ;;  %v3386_v19 = vmul.f32 %v7800_v44, %v2370_v27  ;;  %v3686_v34 = vadd.f32 %v7741_v39, %v3685_v1  ;;  %v9836_v49 = vld [vmem:[#allocation147_spill] sm:$0xff] }
 0x12a   :  { %v7861_v17 = vadd.f32 %v7644_v61, %v3152_v25  ;;  %v3855_v3 = vadd.f32 %v3854_v52, %v2368_v0  ;;  %v7871_v62 = vadd.f32 %v7734_v40, %v2493_v48  ;;  %v7874_v55 = vadd.f32 %v7744_v29, %v2496_v51  ;;  %v7878_v25 = vpop.permute.xlu1 %2923  ;;  %v5099_v29 = vld [vmem:[%s9339_s3 + $0x190] sm:$0xff]  ;;  %v9837_v48 = vld [vmem:[#allocation104_spill] sm:$0xff] }
 0x12b   :  { %3055 = vbcast.lane.b32.xlu0 %v7487_v42, 296  ;;  %v3518_v37 = vadd.f32 %v3517_v31, %v3385_v2  ;;  %v2372_v61 = vmul.f32 %v7036_v13, %v9836_v49  ;;  %3024 = vbcast.lane.b32.xlu1 %v9800_v54, 304  ;;  %v3681_v39 = vadd.f32 %v3680_v18, %v3679_v14  ;;  %v3849_v40 = vrot.slane %v3848_v63, 2  ;;  %v9838_v2 = vld [vmem:[#allocation57_spill] sm:$0xff]  ;;  %v7892_v14 = vpop.permute.xlu0 %2930 }
 0x12c   :  { %v3687_v0 = vadd.f32 %v7815_v5, %v3686_v34  ;;  %v3856_v1 = vadd.f32 %v3855_v3, %v2369_v58  ;;  %v3155_v52 = vmul.f32 %v7857_v36, %v7657_v53  ;;  %v2495_v31 = vmul.f32 %v5099_v29, %v7762_v22  ;;  %v7901_v3 = vld [vmem:[%s9338_s2 + $0x1c8] sm:$0xff] }
 0x12d   :  { %v2371_v51 = vmul.f32 %v7124_v15, %v9837_v48  ;;  %v3154_v49 = vmul.f32 %v7867_v60, %v9838_v2  ;;  %v3512_v18 = vadd.f32 %v3511_v30, %v3510_v50  ;;  %v3519_v53 = vadd.f32 %v3518_v37, %v3386_v19  ;;  %v9840_v37 = vld [vmem:[#allocation73_spill] sm:$0xff] }
 0x12e   :  { %v7895_v58 = vadd.f32 %v7696_v11, %v3155_v52  ;;  %v3688_v34 = vadd.f32 %v7800_v44, %v3687_v0  ;;  %v3388_v22 = vmul.f32 %v7857_v36, %v2372_v61  ;;  %v3857_v30 = vadd.f32 %v3856_v1, %v2370_v27  ;;  %v9842_v52 = vld [vmem:[#allocation96_spill] sm:$0xff]  ;;  %v7924_v1 = vpop.permute.xlu1 %2934 }
 0x12f   :  { %3028 = vbcast.lane.b32.xlu0 %v9800_v54, 312  ;;  %v7906_v29 = vadd.f32 %v7698_v21, %v3154_v49  ;;  %v3387_v50 = vmul.f32 %v7867_v60, %v2371_v51  ;;  %3086 = vbcast.lane.b32.xlu1 %v7667_v26, 288  ;;  %v3682_v11 = vrot.slane %v3681_v39, 1  ;;  %v7913_v0 = vmul.f32 %v9746_v9, %v9840_v37  ;;  %v7922_v27 = vld [vmem:[%s9338_s2 + $0x1c0] sm:$0xff] }
 0x130   :  { %v3689_v19 = vadd.f32 %v7867_v60, %v3688_v34  ;;  %v2374_v54 = vmul.f32 %v9744_v45, %v9842_v52  ;;  %v3850_v48 = vadd.f32 %v3849_v40, %v3848_v63  ;;  %v3858_v24 = vadd.f32 %v3857_v30, %v2371_v51  ;;  %v5100_v63 = vld [vmem:[%s9339_s3 + $0x1a8] sm:$0xff] }
 0x131   :  { %9839 = vst [vmem:[#allocation122_spill] sm:$0xff] %v7906_v29  ;;  %9841 = vst [vmem:[#allocation64_spill] sm:$0xff] %v7913_v0  ;;  %v3520_v2 = vadd.f32 %v3519_v53, %v3387_v50  ;;  %v3157_v21 = vmul.f32 %v7901_v3, %v7710_v4  ;;  %v3513_v49 = vrot.slane %v3512_v18, 1  ;;  %v7927_v34 = vadd.f32 %v7747_v7, %v2495_v31  ;;  %v5101_v4 = vld [vmem:[%s9339_s3 + $0x1a0] sm:$0xff]  ;;  %v7945_v31 = vld [vmem:[%s9338_s2 + $0x1d8] sm:$0xff] }
 0x132   :  { %v2498_v40 = vmul.f32 %v5100_v63, %v7800_v44  ;;  %v3690_v51 = vadd.f32 %v7857_v36, %v3689_v19  ;;  %v2497_v53 = vmul.f32 %v5101_v4, %v7815_v5  ;;  %v3859_v30 = vadd.f32 %v3858_v24, %v2372_v61  ;;  %v7947_v44 = vpop.permute.xlu0 %2938  ;;  %v7968_v29 = vpop.permute.xlu1 %2942 }
 0x133   :  { %3090 = vbcast.lane.b32.xlu0 %v7667_v26, 296  ;;  %v3521_v50 = vadd.f32 %v3520_v2, %v3388_v22  ;;  %v7940_v7 = vadd.f32 %v7729_v56, %v3157_v21  ;;  %9844 = vst [vmem:[#allocation157_spill] sm:$0xff] %v7947_v44  ;;  %3059 = vbcast.lane.b32.xlu1 %v7487_v42, 304  ;;  %v3851_v61 = vrot.slane %v3850_v48, 1 }
 0x134   :  { %v3691_v19 = vrot.slane %v3690_v51, 4  ;;  %v3390_v37 = vmul.f32 %v7901_v3, %v2374_v54  ;;  %v3156_v5 = vmul.f32 %v7922_v27, %v7676_v43  ;;  %v3389_v24 = vmul.f32 %v7922_v27, %v7913_v0 }
 0x135   :  { %9843 = vst [vmem:[#allocation115_spill] sm:$0xff] %v7940_v7  ;;  %v3683_v56 = vadd.f32 %v3682_v11, %v3681_v39  ;;  %v3522_v22 = vrot.slane %v3521_v50, 4  ;;  %v3860_v52 = vrot.slane %v3859_v30, 4  ;;  %v7956_v2 = vadd.f32 %v7750_v46, %v2498_v40  ;;  %v9845_v11 = vld [vmem:[#allocation85_spill] sm:$0xff] }
 0x136   :  { %v3692_v21 = vadd.f32 %v3691_v19, %v3690_v51  ;;  %v7959_v63 = vadd.f32 %v7753_v38, %v3156_v5  ;;  %v3159_v4 = vmul.f32 %v7945_v31, %v7764_v33  ;;  %v3514_v43 = vadd.f32 %v3513_v49, %v3512_v18  ;;  %v9846_v33 = vld [vmem:[#allocation61_spill] sm:$0xff]  ;;  %v4662_v5 = vld [vmem:[%s9338_s2 + $0x1d0] sm:$0xff] }
 0x137   :  { %3094 = vbcast.lane.b32.xlu0 %v7667_v26, 304  ;;  %v3523_v44 = vadd.f32 %v3522_v22, %v3521_v50  ;;  %v3697_v39 = vadd.f32 %v7901_v3, %v7922_v27  ;;  %v2376_v7 = vmul.f32 %v9823_v20, %v9845_v11  ;;  %3063 = vbcast.lane.b32.xlu1 %v7487_v42, 312  ;;  %v4665_v42 = vld [vmem:[%s9338_s2 + $0x1e8] sm:$0xff] }
 0x138   :  { %v3693_v46 = vrot.slane %v3692_v21, 2  ;;  %v3528_v38 = vadd.f32 %v3390_v37, %v3389_v24  ;;  %v7972_v40 = vadd.f32 %v7779_v57, %v3159_v4  ;;  %v2375_v51 = vmul.f32 %v9821_v12, %v9846_v33  ;;  %v7986_v57 = vpop.permute.xlu0 %2946  ;;  %v5104_v22 = vld [vmem:[%s9339_s3 + $0x1c8] sm:$0xff]  ;;  %v9848_v33 = vld [vmem:[#allocation110_spill] sm:$0xff] }
 0x139   :  { %v3852_v18 = vadd.f32 %v3851_v61, %v3850_v48  ;;  %v7977_v49 = vadd.f32 %v7757_v41, %v2497_v53  ;;  %v3861_v50 = vadd.f32 %v3860_v52, %v3859_v30  ;;  %v3866_v19 = vadd.f32 %v2374_v54, %v7913_v0  ;;  %9847 = vst [vmem:[#allocation58_spill] sm:$0xff] %v7986_v57  ;;  %v5102_v48 = vld [vmem:[%s9339_s3 + $0x1b8] sm:$0xff]  ;;  %v5103_v54 = vld [vmem:[%s9339_s3 + $0x1b0] sm:$0xff]  ;;  %v8011_v57 = vpop.permute.xlu1 %2950 }
 0x13a   :  { %v4001_v37 = vadd.f32 1.0, %v3683_v56  ;;  %v2500_v41 = vmul.f32 %v5102_v48, %v7857_v36  ;;  %v2499_v53 = vmul.f32 %v5103_v54, %v7867_v60  ;;  %v3391_v30 = vmul.f32 %v4662_v5, %v2375_v51 }
 0x13b   :  { %v3524_v24 = vrot.slane %v3523_v44, 2  ;;  %v3694_v61 = vadd.f32 %v3693_v46, %v3692_v21  ;;  %v2502_v52 = vmul.f32 %v5104_v22, %v7901_v3  ;;  %v3392_v4 = vmul.f32 %v7945_v31, %v2376_v7  ;;  %3098 = vbcast.lane.b32.xlu1 %v7667_v26, 312  ;;  %v5105_v21 = vld [vmem:[%s9339_s3 + $0x1c0] sm:$0xff]  ;;  %v9849_v3 = vld [vmem:[#allocation131_spill] sm:$0xff] }
 0x13c   :  { %v3529_v36 = vadd.f32 %v3528_v38, %v3391_v30  ;;  %v3698_v11 = vadd.f32 %v4662_v5, %v3697_v39  ;;  %v2378_v48 = vmul.f32 %v6720_v10, %v9848_v33  ;;  %v3161_v60 = vmul.f32 %v4665_v42, %v7817_v59  ;;  %v4664_v38 = vld [vmem:[%s9338_s2 + $0x1e0] sm:$0xff] }
 0x13d   :  { %v3862_v54 = vrot.slane %v3861_v50, 2  ;;  %v2501_v46 = vmul.f32 %v5105_v21, %v7922_v27  ;;  %v3867_v0 = vadd.f32 %v3866_v19, %v2375_v51  ;;  %v2377_v22 = vmul.f32 %v6772_v32, %v9849_v3 }
 0x13e   :  { %v8013_v26 = vsub.f32 %v3852_v18, %v3514_v43  ;;  %v8015_v39 = vsub.f32 %v3683_v56, %v3514_v43  ;;  %4987 = vrcp.f32 %v4001_v37  ;;  %v8018_v59 = vadd.f32 %v7847_v47, %v3161_v60  ;;  %v8029_v18 = vpop.permute.xlu0 %2954 }
 0x13f   :  { %v8024_v27 = vadd.f32 %v7827_v6, %v2500_v41  ;;  %v8027_v51 = vadd.f32 %v7830_v16, %v2499_v53  ;;  %v3695_v19 = vrot.slane %v3694_v61, 1  ;;  %v3393_v30 = vmul.f32 %v4664_v38, %v2377_v22  ;;  %v5106_v16 = vld [vmem:[%s9339_s3 + $0x1d8] sm:$0xff] }
 0x140   :  { %9850 = vst [vmem:[#allocation144_spill] sm:$0xff] %v8013_v26  ;;  %9851 = vst [vmem:[#allocation53_spill] sm:$0xff] %v8015_v39  ;;  %v3525_v56 = vadd.f32 %v3524_v24, %v3523_v44  ;;  %v3394_v43 = vmul.f32 %v4665_v42, %v2378_v48  ;;  %v3530_v37 = vadd.f32 %v3529_v36, %v3392_v4  ;;  %v5107_v44 = vld [vmem:[%s9339_s3 + $0x1d0] sm:$0xff]  ;;  %v8053_v36 = vpop.permute.xlu1 %2958  ;;  %v9865_v39 = vld [vmem:[#allocation113_spill] sm:$0xff] }
 0x141   :  { %v3699_v47 = vadd.f32 %v7945_v31, %v3698_v11  ;;  %v3863_v33 = vadd.f32 %v3862_v54, %v3861_v50  ;;  %v8033_v60 = vadd.f32 %v7844_v23, %v2502_v52  ;;  %v8036_v21 = vadd.f32 %v7871_v62, %v2501_v46  ;;  %v9853_v52 = vld [vmem:[#allocation117_spill] sm:$0xff] }
 0x142   :  { %v3868_v6 = vadd.f32 %v3867_v0, %v2376_v7  ;;  %v2504_v41 = vmul.f32 %v5106_v16, %v7945_v31  ;;  %v2503_v53 = vmul.f32 %v5107_v44, %v4662_v5  ;;  %v3531_v24 = vadd.f32 %v3530_v37, %v3393_v30  ;;  %v9855_v0 = vld [vmem:[#allocation151_spill] sm:$0xff]  ;;  %v5108_v54 = vld [vmem:[%s9339_s3 + $0x1e8] sm:$0xff]  ;;  %v9856_v44 = vld [vmem:[#allocation98_spill] sm:$0xff] }
 0x143   :  { %v3700_v50 = vadd.f32 %v4664_v38, %v3699_v47  ;;  %v8045_v4 = vadd.f32 %v3695_v19, %v3694_v61  ;;  %v8049_v62 = vmul.f32 %v7036_v13, %v9853_v52  ;;  %v2379_v7 = vmul.f32 %v7124_v15, %v9855_v0  ;;  %v4666_v61 = vld [vmem:[%s9338_s2 + $0x1f0] sm:$0xff]  ;;  %v8062_v47 = vpop.permute.xlu0 %2965 }
 0x144   :  { %v3869_v23 = vadd.f32 %v3868_v6, %v2377_v22  ;;  %v3526_v31 = vrot.slane %v3525_v56, 1  ;;  %v3158_v11 = vmul.f32 %v4662_v5, %v7726_v8  ;;  %v2506_v46 = vmul.f32 %v5108_v54, %v4665_v42  ;;  %v5109_v5 = vld [vmem:[%s9339_s3 + $0x1e0] sm:$0xff]  ;;  %v9858_v0 = vld [vmem:[#allocation74_spill] sm:$0xff] }
 0x145   :  { %9852 = vst [vmem:[#allocation91_spill] sm:$0xff] %v8045_v4  ;;  %9854 = vst [vmem:[#allocation69_spill] sm:$0xff] %v8049_v62  ;;  %v3532_v3 = vadd.f32 %v3531_v24, %v3394_v43  ;;  %v3864_v22 = vrot.slane %v3863_v33, 1  ;;  %v3395_v19 = vmul.f32 %v4666_v61, %v2379_v7  ;;  %v3701_v30 = vadd.f32 %v4665_v42, %v3700_v50  ;;  %v4667_v43 = vld [vmem:[%s9338_s2 + $0x1f8] sm:$0xff] }
 0x146   :  { %v3870_v37 = vadd.f32 %v3869_v23, %v2378_v48  ;;  %v8065_v6 = vadd.f32 %v7874_v55, %v2504_v41  ;;  %v8068_v8 = vadd.f32 %v7927_v34, %v2503_v53  ;;  %v2505_v16 = vmul.f32 %v5109_v5, %v4664_v38  ;;  %v5110_v24 = vld [vmem:[%s9339_s3 + $0x1f8] sm:$0xff] }
 0x147   :  { %v2382_v42 = vmul.f32 %v9744_v45, %v9856_v44  ;;  %v4002_v48 = vadd.f32 1.0, %v8045_v4  ;;  %v3160_v55 = vmul.f32 %v4664_v38, %v7776_v35  ;;  %v3396_v41 = vmul.f32 %v4667_v43, %v8049_v62 }
 0x148   :  { %v3533_v34 = vadd.f32 %v3532_v3, %v3395_v19  ;;  %v8081_v53 = vpop.eup %4987  ;;  %v2508_v50 = vmul.f32 %v5110_v24, %v4667_v43  ;;  %v3702_v23 = vadd.f32 %v4666_v61, %v3701_v30  ;;  %v3871_v52 = vadd.f32 %v3870_v37, %v2379_v7  ;;  %v4669_v3 = vld [vmem:[%s9338_s2 + $0x208] sm:$0xff]  ;;  %v4668_v7 = vld [vmem:[%s9338_s2 + $0x200] sm:$0xff]  ;;  %v8104_v19 = vpop.permute.xlu1 %2969 }
 0x149   :  { %9857 = vst [vmem:[#allocation152_spill] sm:$0xff] %v8081_v53  ;;  %v2381_v54 = vmul.f32 %v9746_v9, %v9858_v0  ;;  %v8088_v5 = vadd.f32 %v3526_v31, %v3525_v56  ;;  %v8090_v44 = vadd.f32 %v3864_v22, %v3863_v33  ;;  %v8093_v35 = vadd.f32 %v7808_v28, %v3158_v11  ;;  %v5111_v28 = vld [vmem:[%s9339_s3 + $0x1f0] sm:$0xff]  ;;  %v8116_v30 = vpop.permute.xlu0 %2973 }
 0x14a   :  { %v8096_v38 = vadd.f32 %v7956_v2, %v2506_v46  ;;  %v3163_v56 = vmul.f32 %v4667_v43, %v7878_v25  ;;  %v2507_v33 = vmul.f32 %v5111_v28, %v4666_v61  ;;  %v3398_v31 = vmul.f32 %v4669_v3, %v2382_v42  ;;  %v9861_v0 = vld [vmem:[#allocation86_spill] sm:$0xff] }
 0x14b   :  { %9859 = vst [vmem:[#allocation59_spill] sm:$0xff] %v8088_v5  ;;  %9860 = vst [vmem:[#allocation80_spill] sm:$0xff] %v8090_v44  ;;  %v3397_v2 = vmul.f32 %v4668_v7, %v2381_v54  ;;  %4989 = vrcp.f32 %v4002_v48  ;;  %v8111_v11 = vadd.f32 %v7977_v49, %v2505_v16  ;;  %v8114_v46 = vadd.f32 %v7861_v17, %v3160_v55  ;;  %v9862_v53 = vld [vmem:[#allocation114_spill] sm:$0xff]  ;;  %v5112_v49 = vld [vmem:[%s9339_s3 + $0x208] sm:$0xff] }
 0x14c   :  { %v3534_v22 = vadd.f32 %v3533_v34, %v3396_v41  ;;  %v8119_v37 = vadd.f32 %v8024_v27, %v2508_v50  ;;  %v3703_v25 = vadd.f32 %v4667_v43, %v3702_v23  ;;  %v3872_v24 = vadd.f32 %v3871_v52, %v8049_v62  ;;  %v9863_v55 = vld [vmem:[#allocation62_spill] sm:$0xff]  ;;  %v9867_v44 = vld [vmem:[#allocation132_spill] sm:$0xff] }
 0x14d   :  { %v2384_v28 = vmul.f32 %v9823_v20, %v9861_v0  ;;  %v3162_v48 = vmul.f32 %v4666_v61, %v9862_v53  ;;  %v2510_v17 = vmul.f32 %v5112_v49, %v4669_v3  ;;  %v3710_v16 = vadd.f32 %v4669_v3, %v4668_v7  ;;  %v5113_v61 = vld [vmem:[%s9339_s3 + $0x200] sm:$0xff]  ;;  %v4671_v49 = vld [vmem:[%s9338_s2 + $0x218] sm:$0xff] }
 0x14e   :  { %v2383_v41 = vmul.f32 %v9821_v12, %v9863_v55  ;;  %v3294_v27 = vadd.f32 %v7895_v58, %v3163_v56  ;;  %v8132_v43 = vadd.f32 %v8027_v51, %v2507_v33  ;;  %v3541_v34 = vadd.f32 %v3398_v31, %v3397_v2  ;;  %v8145_v58 = vld [vmem:[%s9338_s2 + $0x210] sm:$0xff]  ;;  %v8147_v51 = vpop.permute.xlu1 %2977  ;;  %v8158_v55 = vpop.permute.xlu0 %2981 }
 0x14f   :  { %v3879_v50 = vadd.f32 %v2382_v42, %v2381_v54  ;;  %v3535_v23 = vrot.slane %v3534_v22, 4  ;;  %v3165_v52 = vmul.f32 %v4669_v3, %v7924_v1  ;;  %v2509_v53 = vmul.f32 %v5113_v61, %v4668_v7  ;;  %v9864_v56 = vld [vmem:[#allocation122_spill] sm:$0xff] }
 0x150   :  { %v3164_v0 = vmul.f32 %v4668_v7, %v7892_v14  ;;  %v3704_v42 = vrot.slane %v3703_v25, 4  ;;  %v3873_v1 = vrot.slane %v3872_v24, 4  ;;  %v3400_v54 = vmul.f32 %v4671_v49, %v2384_v28  ;;  %v5114_v7 = vld [vmem:[%s9339_s3 + $0x218] sm:$0xff] }
 0x151   :  { %v3399_v3 = vmul.f32 %v8145_v58, %v2383_v41  ;;  %v3282_v33 = vadd.f32 %v9864_v56, %v3162_v48  ;;  %v8152_v14 = vadd.f32 %v8033_v60, %v2510_v17  ;;  %v2512_v31 = vmul.f32 %v5114_v7, %v4671_v49  ;;  %v9866_v48 = vld [vmem:[#allocation115_spill] sm:$0xff] }
 0x152   :  { %v3711_v2 = vadd.f32 %v8145_v58, %v3710_v16  ;;  %v3167_v61 = vmul.f32 %v4671_v49, %v7968_v29  ;;  %v3880_v26 = vadd.f32 %v3879_v50, %v2383_v41  ;;  %v2386_v4 = vmul.f32 %v6720_v10, %v9865_v39  ;;  %v8173_v16 = vld [vmem:[%s9338_s2 + $0x238] sm:$0xff]  ;;  %v8178_v39 = vld [vmem:[%s9338_s2 + $0x228] sm:$0xff] }
 0x153   :  { %v3542_v62 = vadd.f32 %v3541_v34, %v3399_v3  ;;  %v3223_v56 = vadd.f32 %v9866_v48, %v3165_v52  ;;  %v8165_v60 = vadd.f32 %v8036_v21, %v2509_v53  ;;  %v3211_v17 = vadd.f32 %v7959_v63, %v3164_v0  ;;  %v8183_v63 = vld [vmem:[%s9338_s2 + $0x220] sm:$0xff]  ;;  %v8213_v3 = vpop.permute.xlu0 %2989  ;;  %v8220_v48 = vld [vmem:[%s9338_s2 + $0x248] sm:$0xff] }
 0x154   :  { %v2385_v7 = vmul.f32 %v6772_v32, %v9867_v44  ;;  %v3536_v29 = vadd.f32 %v3535_v23, %v3534_v22  ;;  %v3705_v41 = vadd.f32 %v3704_v42, %v3703_v25  ;;  %v3874_v34 = vadd.f32 %v3873_v1, %v3872_v24  ;;  %v8192_v23 = vpop.permute.xlu1 %2985  ;;  %v9870_v0 = vld [vmem:[#allocation148_spill] sm:$0xff] }
 0x155   :  { %v3543_v21 = vadd.f32 %v3542_v62, %v3400_v54  ;;  %v8185_v44 = vpop.eup %4989  ;;  %v8188_v50 = vadd.f32 %v8065_v6, %v2512_v31  ;;  %v3402_v22 = vmul.f32 %v8178_v39, %v2386_v4  ;;  %v3712_v24 = vadd.f32 %v4671_v49, %v3711_v2  ;;  %v8204_v6 = vld [vmem:[%s9338_s2 + $0x230] sm:$0xff] }
 0x156   :  { %9868 = vst [vmem:[#allocation75_spill] sm:$0xff] %v8185_v44  ;;  %v3401_v25 = vmul.f32 %v8183_v63, %v2385_v7  ;;  %v8195_v52 = vadd.f32 %v7972_v40, %v3167_v61  ;;  %v3881_v53 = vadd.f32 %v3880_v26, %v2384_v28  ;;  %v2388_v42 = vmul.f32 %v7036_v13, %v9870_v0  ;;  %v5115_v49 = vld [vmem:[%s9339_s3 + $0x210] sm:$0xff]  ;;  %v9871_v28 = vld [vmem:[#allocation153_spill] sm:$0xff] }
 0x157   :  { %9869 = vst [vmem:[#allocation47_spill] sm:$0xff] %v8188_v50  ;;  %v3171_v62 = vmul.f32 %v8173_v16, %v8053_v36  ;;  %v2511_v1 = vmul.f32 %v5115_v49, %v8145_v58  ;;  %v3713_v26 = vadd.f32 %v8183_v63, %v3712_v24  ;;  %v2387_v54 = vmul.f32 %v7124_v15, %v9871_v28  ;;  %v9873_v50 = vld [vmem:[#allocation77_spill] sm:$0xff] }
 0x158   :  { %v3544_v40 = vadd.f32 %v3543_v21, %v3401_v25  ;;  %v3537_v36 = vrot.slane %v3536_v29, 2  ;;  %v3706_v31 = vrot.slane %v3705_v41, 2  ;;  %v3882_v2 = vadd.f32 %v3881_v53, %v2385_v7  ;;  %v9872_v7 = vld [vmem:[#allocation99_spill] sm:$0xff]  ;;  %v8232_v53 = vld [vmem:[%s9338_s2 + $0x240] sm:$0xff] }
 0x159   :  { %v8215_v61 = vadd.f32 %v3294_v27, %v3171_v62  ;;  %v3404_v0 = vmul.f32 %v8173_v16, %v2388_v42  ;;  %v3170_v21 = vmul.f32 %v8204_v6, %v8029_v18  ;;  %v3403_v25 = vmul.f32 %v8204_v6, %v2387_v54 }
 0x15a   :  { %v3545_v24 = vadd.f32 %v3544_v40, %v3402_v22  ;;  %v3875_v49 = vrot.slane %v3874_v34, 2  ;;  %v3714_v28 = vadd.f32 %v8178_v39, %v3713_v26  ;;  %v3883_v44 = vadd.f32 %v3882_v2, %v2386_v4  ;;  %v8240_v40 = vpop.permute.xlu1 %2993  ;;  %v9874_v26 = vld [vmem:[#allocation157_spill] sm:$0xff] }
 0x15b   :  { %v2390_v27 = vmul.f32 %v9744_v45, %v9872_v7  ;;  %v8234_v62 = vadd.f32 %v3282_v33, %v3170_v21  ;;  %v3173_v18 = vmul.f32 %v8220_v48, %v8104_v19  ;;  %v2389_v22 = vmul.f32 %v9746_v9, %v9873_v50  ;;  %v8254_v50 = vpop.permute.xlu0 %3000 }
 0x15c   :  { %v3546_v5 = vadd.f32 %v3545_v24, %v3403_v25  ;;  %v8243_v4 = vadd.f32 %v8068_v8, %v2511_v1  ;;  %v3166_v2 = vmul.f32 %v8145_v58, %v9874_v26  ;;  %v3715_v7 = vadd.f32 %v8204_v6, %v3714_v28  ;;  %v9879_v26 = vld [vmem:[#allocation87_spill] sm:$0xff] }
 0x15d   :  { %v3884_v45 = vadd.f32 %v3883_v44, %v2387_v54  ;;  %v8248_v33 = vadd.f32 %v3537_v36, %v3536_v29  ;;  %v8250_v25 = vadd.f32 %v3223_v56, %v3173_v18  ;;  %v3172_v19 = vmul.f32 %v8232_v53, %v8062_v47  ;;  %v8264_v29 = vld [vmem:[%s9338_s2 + $0x258] sm:$0xff] }
 0x15e   :  { %v3547_v21 = vadd.f32 %v3546_v5, %v3404_v0  ;;  %v8256_v24 = vadd.f32 %v3706_v31, %v3705_v41  ;;  %v8258_v8 = vadd.f32 %v3875_v49, %v3874_v34  ;;  %v3716_v1 = vadd.f32 %v8173_v16, %v3715_v7  ;;  %v9878_v0 = vld [vmem:[#allocation63_spill] sm:$0xff]  ;;  %v8284_v49 = vpop.permute.xlu1 %3004 }
 0x15f   :  { %9875 = vst [vmem:[#allocation125_spill] sm:$0xff] %v8248_v33  ;;  %v3885_v58 = vadd.f32 %v3884_v45, %v2388_v42  ;;  %v3406_v56 = vmul.f32 %v8220_v48, %v2390_v27  ;;  %v8267_v44 = vadd.f32 %v3211_v17, %v3172_v19  ;;  %v3405_v47 = vmul.f32 %v8232_v53, %v2389_v22  ;;  %v8276_v45 = vld [vmem:[%s9338_s2 + $0x250] sm:$0xff] }
 0x160   :  { %9876 = vst [vmem:[#allocation105_spill] sm:$0xff] %v8256_v24  ;;  %9877 = vst [vmem:[#allocation46_spill] sm:$0xff] %v8258_v8  ;;  %v3548_v5 = vrot.slane %v3547_v21, 4  ;;  %v3235_v41 = vadd.f32 %v8093_v35, %v3166_v2  ;;  %v3169_v34 = vmul.f32 %v8178_v39, %v8011_v57  ;;  %v3717_v54 = vrot.slane %v3716_v1, 4 }
 0x161   :  { %v3886_v36 = vrot.slane %v3885_v58, 4  ;;  %v3723_v31 = vadd.f32 %v8220_v48, %v8232_v53  ;;  %v3175_v17 = vmul.f32 %v8264_v29, %v8147_v51  ;;  %v2391_v35 = vmul.f32 %v9821_v12, %v9878_v0  ;;  %v8293_v51 = vpop.permute.xlu0 %3008 }
 0x162   :  { %v3549_v42 = vadd.f32 %v3548_v5, %v3547_v21  ;;  %v3718_v57 = vadd.f32 %v3717_v54, %v3716_v1  ;;  %v3892_v18 = vadd.f32 %v2390_v27, %v2389_v22  ;;  %v2392_v2 = vmul.f32 %v9823_v20, %v9879_v26  ;;  %v5116_v1 = vld [vmem:[%s9339_s3 + $0x228] sm:$0xff]  ;;  %v9880_v54 = vld [vmem:[#allocation58_spill] sm:$0xff] }
 0x163   :  { %v3887_v28 = vadd.f32 %v3886_v36, %v3885_v58  ;;  %v3554_v19 = vadd.f32 %v3406_v56, %v3405_v47  ;;  %v8289_v21 = vadd.f32 %v8195_v52, %v3175_v17  ;;  %v3174_v5 = vmul.f32 %v8276_v45, %v8116_v30  ;;  %v8304_v52 = vld [vmem:[%s9338_s2 + $0x268] sm:$0xff]  ;;  %v5117_v56 = vld [vmem:[%s9339_s3 + $0x220] sm:$0xff]  ;;  %v8315_v17 = vpop.permute.xlu1 %4358 }
 0x164   :  { %v3550_v7 = vrot.slane %v3549_v42, 2  ;;  %v2514_v27 = vmul.f32 %v5116_v1, %v8178_v39  ;;  %v3719_v22 = vrot.slane %v3718_v57, 2  ;;  %v3407_v58 = vmul.f32 %v8276_v45, %v2391_v35  ;;  %9881 = vst [vmem:[#allocation76_spill] sm:$0xff] %v8315_v17 }
 0x165   :  { %v3271_v30 = vadd.f32 %v8018_v59, %v3169_v34  ;;  %v2513_v47 = vmul.f32 %v5117_v56, %v8183_v63  ;;  %v3168_v36 = vmul.f32 %v8183_v63, %v9880_v54  ;;  %v8313_v39 = vadd.f32 %v3235_v41, %v3174_v5  ;;  %v8322_v59 = vld [vmem:[%s9338_s2 + $0x260] sm:$0xff]  ;;  %v8328_v54 = vpop.permute.xlu0 %4362 }
 0x166   :  { %v3551_v26 = vadd.f32 %v3550_v7, %v3549_v42  ;;  %v3888_v1 = vrot.slane %v3887_v28, 2  ;;  %v3408_v0 = vmul.f32 %v8264_v29, %v2392_v2  ;;  %v3724_v8 = vadd.f32 %v8276_v45, %v3723_v31  ;;  %v9882_v41 = vld [vmem:[#allocation136_spill] sm:$0xff]  ;;  %9883 = vst [vmem:[#allocation146_spill] sm:$0xff] %v8328_v54  ;;  %v5118_v42 = vld [vmem:[%s9339_s3 + $0x238] sm:$0xff]  ;;  %v5119_v7 = vld [vmem:[%s9339_s3 + $0x230] sm:$0xff] }
 0x167   :  { %v3555_v34 = vadd.f32 %v3554_v19, %v3407_v58  ;;  %v3893_v56 = vadd.f32 %v3892_v18, %v2391_v35  ;;  %v3177_v63 = vmul.f32 %v8304_v52, %v8192_v23  ;;  %v2393_v5 = vmul.f32 %v6772_v32, %v9882_v41  ;;  %v9884_v19 = vld [vmem:[#allocation116_spill] sm:$0xff] }
 0x168   :  { %v2516_v31 = vmul.f32 %v5118_v42, %v8173_v16  ;;  %v2515_v35 = vmul.f32 %v5119_v7, %v8204_v6  ;;  %v3720_v18 = vadd.f32 %v3719_v22, %v3718_v57  ;;  %v2394_v23 = vmul.f32 %v6720_v10, %v9884_v19  ;;  %v5122_v19 = vld [vmem:[%s9339_s3 + $0x258] sm:$0xff] }
 0x169   :  { %v8341_v58 = vadd.f32 %v8096_v38, %v2514_v27  ;;  %v3259_v41 = vadd.f32 %v8114_v46, %v3168_v36  ;;  %v8344_v24 = vadd.f32 %v3271_v30, %v3177_v63  ;;  %v3176_v16 = vmul.f32 %v8322_v59, %v8158_v55  ;;  %v8358_v46 = vld [vmem:[%s9338_s2 + $0x278] sm:$0xff]  ;;  %v8360_v30 = vpop.permute.xlu1 %4274 }
 0x16a   :  { %v8349_v42 = vadd.f32 %v8111_v11, %v2513_v47  ;;  %v3552_v33 = vrot.slane %v3551_v26, 1  ;;  %v3889_v54 = vadd.f32 %v3888_v1, %v3887_v28  ;;  %v3409_v6 = vmul.f32 %v8322_v59, %v2393_v5  ;;  %v9887_v36 = vld [vmem:[#allocation123_spill] sm:$0xff] }
 0x16b   :  { %9885 = vst [vmem:[#allocation134_spill] sm:$0xff] %v8344_v24  ;;  %v8352_v57 = vadd.f32 %v3259_v41, %v3176_v16  ;;  %v3556_v22 = vadd.f32 %v3555_v34, %v3408_v0  ;;  %v3725_v38 = vadd.f32 %v8264_v29, %v3724_v8  ;;  %v3894_v27 = vadd.f32 %v3893_v56, %v2392_v2  ;;  %v4682_v34 = vld [vmem:[%s9338_s2 + $0x270] sm:$0xff]  ;;  %v8375_v56 = vpop.permute.xlu0 %4366 }
 0x16c   :  { %v8363_v11 = vadd.f32 %v8119_v37, %v2516_v31  ;;  %v8366_v55 = vadd.f32 %v8132_v43, %v2515_v35  ;;  %v3721_v28 = vrot.slane %v3720_v18, 1  ;;  %v3410_v47 = vmul.f32 %v8304_v52, %v2394_v23  ;;  %9888 = vst [vmem:[#allocation72_spill] sm:$0xff] %v8375_v56  ;;  %v5120_v43 = vld [vmem:[%s9339_s3 + $0x248] sm:$0xff] }
 0x16d   :  { %9886 = vst [vmem:[#allocation93_spill] sm:$0xff] %v8352_v57  ;;  %v3557_v0 = vadd.f32 %v3556_v22, %v3409_v6  ;;  %v3726_v8 = vadd.f32 %v8322_v59, %v3725_v38  ;;  %v3895_v2 = vadd.f32 %v3894_v27, %v2393_v5  ;;  %v2396_v1 = vmul.f32 %v7036_v13, %v9887_v36  ;;  %v5121_v5 = vld [vmem:[%s9339_s3 + $0x240] sm:$0xff]  ;;  %v9889_v6 = vld [vmem:[#allocation121_spill] sm:$0xff]  ;;  %v4717_v57 = vld [vmem:[%s9346_s10 + $0x10] sm:$0xff] }
 0x16e   :  { %v3890_v37 = vrot.slane %v3889_v54, 1  ;;  %v2518_v63 = vmul.f32 %v5120_v43, %v8220_v48  ;;  %v2517_v31 = vmul.f32 %v5121_v5, %v8232_v53  ;;  %v3179_v7 = vmul.f32 %v8358_v46, %v8240_v40  ;;  %v5123_v48 = vld [vmem:[%s9339_s3 + $0x250] sm:$0xff]  ;;  %v8400_v53 = vld [vmem:[%s9338_s2 + $0x288] sm:$0xff]  ;;  %v8408_v43 = vpop.permute.xlu1 %4279 }
 0x16f   :  { %v3553_v35 = vadd.f32 %v3552_v33, %v3551_v26  ;;  %v2520_v41 = vmul.f32 %v5122_v19, %v8264_v29  ;;  %v2519_v16 = vmul.f32 %v5123_v48, %v8276_v45  ;;  %v2395_v22 = vmul.f32 %v7124_v15, %v9889_v6 }
 0x170   :  { %v8403_v40 = vadd.f32 %v8215_v61, %v3179_v7  ;;  %v3178_v33 = vmul.f32 %v4682_v34, %v8213_v3  ;;  %v3558_v29 = vadd.f32 %v3557_v0, %v3410_v47  ;;  %v3727_v26 = vadd.f32 %v8304_v52, %v3726_v8  ;;  %v9893_v8 = vld [vmem:[#allocation47_spill] sm:$0xff] }
 0x171   :  { %v3722_v38 = vadd.f32 %v3721_v28, %v3720_v18  ;;  %v3412_v27 = vmul.f32 %v8358_v46, %v2396_v1  ;;  %v3411_v45 = vmul.f32 %v4682_v34, %v2395_v22  ;;  %v3896_v36 = vadd.f32 %v3895_v2, %v2394_v23  ;;  %v8417_v28 = vpop.permute.xlu0 %4370 }
 0x172   :  { %9890 = vst [vmem:[#allocation41_spill] sm:$0xff] %v8403_v40  ;;  %v3891_v5 = vadd.f32 %v3890_v37, %v3889_v54  ;;  %v8411_v19 = vadd.f32 %v8234_v62, %v3178_v33  ;;  %v3728_v48 = vadd.f32 %v4682_v34, %v3727_v26  ;;  %v3181_v61 = vmul.f32 %v8400_v53, %v8284_v49  ;;  %v5125_v49 = vld [vmem:[%s9339_s3 + $0x260] sm:$0xff]  ;;  %v9895_v33 = vld [vmem:[#allocation130_spill] sm:$0xff]  ;;  %v9896_v26 = vld [vmem:[#allocation79_spill] sm:$0xff] }
 0x173   :  { %v2569_v3 = vadd.f32 %v8152_v14, %v2518_v63  ;;  %v2557_v47 = vadd.f32 %v8165_v60, %v2517_v31  ;;  %v3559_v0 = vadd.f32 %v3558_v29, %v3411_v45  ;;  %v3897_v18 = vadd.f32 %v3896_v36, %v2395_v22  ;;  %9892 = vst [vmem:[#allocation90_spill] sm:$0xff] %v8417_v28  ;;  %v5124_v14 = vld [vmem:[%s9339_s3 + $0x268] sm:$0xff]  ;;  %v8444_v36 = vpop.permute.xlu1 %4284 }
 0x174   :  { %9891 = vst [vmem:[#allocation60_spill] sm:$0xff] %v8411_v19  ;;  %v8420_v23 = vadd.f32 %v9893_v8, %v2520_v41  ;;  %v8423_v54 = vadd.f32 %v8243_v4, %v2519_v16  ;;  %v3729_v62 = vadd.f32 %v8358_v46, %v3728_v48  ;;  %v8427_v2 = vadd.f32 %v8250_v25, %v3181_v61  ;;  %v9894_v22 = vld [vmem:[#allocation101_spill] sm:$0xff] }
 0x175   :  { %v2522_v60 = vmul.f32 %v5124_v14, %v8304_v52  ;;  %v2521_v37 = vmul.f32 %v5125_v49, %v8322_v59  ;;  %v3560_v63 = vadd.f32 %v3559_v0, %v3412_v27  ;;  %v3898_v4 = vadd.f32 %v3897_v18, %v2396_v1  ;;  %v4684_v52 = vld [vmem:[%s9338_s2 + $0x280] sm:$0xff]  ;;  %v5126_v59 = vld [vmem:[%s9339_s3 + $0x278] sm:$0xff]  ;;  %v8463_v14 = vpop.permute.xlu0 %4374  ;;  %v4716_v40 = vld [vmem:[%s9346_s10 + $0x8] sm:$0xff] }
 0x176   :  { %v3952_v31 = vsub.f32 %v3891_v5, %v3553_v35  ;;  %v3965_v7 = vsub.f32 %v3722_v38, %v3553_v35  ;;  %v4004_v41 = vadd.f32 1.0, %v3722_v38  ;;  %v3730_v16 = vrot.slane %v3729_v62, 4  ;;  %v5127_v35 = vld [vmem:[%s9339_s3 + $0x270] sm:$0xff]  ;;  %v5128_v5 = vld [vmem:[%s9339_s3 + $0x288] sm:$0xff]  ;;  %9898 = vst [vmem:[#allocation112_spill] sm:$0xff] %v8463_v14 }
 0x177   :  { %v3561_v25 = vrot.slane %v3560_v63, 4  ;;  %v3899_v6 = vrot.slane %v3898_v4, 4  ;;  %v2398_v29 = vmul.f32 %v9895_v33, %v9894_v22  ;;  %v2397_v45 = vmul.f32 %v9746_v9, %v9896_v26 }
 0x178   :  { %v2524_v1 = vmul.f32 %v5126_v59, %v8358_v46  ;;  %v2523_v38 = vmul.f32 %v5127_v35, %v4682_v34  ;;  %v3731_v27 = vadd.f32 %v3730_v16, %v3729_v62  ;;  %v2526_v48 = vmul.f32 %v5128_v5, %v8400_v53  ;;  %v5129_v46 = vld [vmem:[%s9339_s3 + $0x280] sm:$0xff]  ;;  %v4714_v35 = vld [vmem:[%s9343_s7 + $0x38] sm:$0xff]  ;;  %v9906_v5 = vld [vmem:[#allocation66_spill] sm:$0xff] }
 0x179   :  { %v8458_v61 = vadd.f32 %v8341_v58, %v2522_v60  ;;  %v3562_v0 = vadd.f32 %v3561_v25, %v3560_v63  ;;  %v3900_v18 = vadd.f32 %v3899_v6, %v3898_v4  ;;  %v2525_v8 = vmul.f32 %v5129_v46, %v4684_v52  ;;  %v1197_v4 = vld [vmem:[%s9343_s7] sm:$0xff] }
 0x17a   :  { %v8465_v34 = vmul.f32 %v3965_v7, %v3965_v7  ;;  %v8468_v62 = vadd.f32 %v8349_v42, %v2521_v37  ;;  %v3732_v49 = vrot.slane %v3731_v27, 2  ;;  %v3180_v16 = vmul.f32 %v4684_v52, %v8254_v50  ;;  %v4709_v42 = vld [vmem:[%s9343_s7 + $0x10] sm:$0xff] }
 0x17b   :  { %9897 = vst [vmem:[#allocation83_spill] sm:$0xff] %v8458_v61  ;;  %v8471_v58 = vmul.f32 %v3952_v31, %v3952_v31  ;;  %4991 = vrcp.f32 %v4004_v41  ;;  %v3414_v60 = vmul.f32 %v8400_v53, %v2398_v29  ;;  %v3413_v63 = vmul.f32 %v4684_v52, %v2397_v45  ;;  %v4710_v41 = vld [vmem:[%s9343_s7 + $0x18] sm:$0xff] }
 0x17c   :  { %9899 = vst [vmem:[#allocation67_spill] sm:$0xff] %v8465_v34  ;;  %9900 = vst [vmem:[#allocation103_spill] sm:$0xff] %v8468_v62  ;;  %v8481_v37 = vadd.f32 %v8363_v11, %v2524_v1  ;;  %v8484_v50 = vadd.f32 %v8366_v55, %v2523_v38  ;;  %v3563_v31 = vrot.slane %v3562_v0, 2  ;;  %v8486_v7 = vadd.f32 %v2569_v3, %v2526_v48  ;;  %v8501_v11 = vld [vmem:[%s9338_s2 + $0x290] sm:$0xff]  ;;  %v4708_v55 = vld [vmem:[%s9343_s7 + $0x8] sm:$0xff] }
 0x17d   :  { %9901 = vst [vmem:[#allocation49_spill] sm:$0xff] %v8471_v58  ;;  %v3901_v25 = vrot.slane %v3900_v18, 2  ;;  %v8491_v6 = vadd.f32 %v2557_v47, %v2525_v8  ;;  %v8494_v22 = vadd.f32 %v8400_v53, %v4684_v52  ;;  %v8496_v26 = vadd.f32 %v2398_v29, %v2397_v45  ;;  %v4711_v3 = vld [vmem:[%s9343_s7 + $0x20] sm:$0xff]  ;;  %v8509_v47 = vpop.permute.xlu1 %4289  ;;  %v4713_v1 = vld [vmem:[%s9343_s7 + $0x30] sm:$0xff]  ;;  %v8535_v8 = vpop.permute.xlu0 %4378 }
 0x17e   :  { %9902 = vst [vmem:[#allocation107_spill] sm:$0xff] %v8481_v37  ;;  %9903 = vst [vmem:[#allocation45_spill] sm:$0xff] %v8484_v50  ;;  %v3733_v59 = vadd.f32 %v3732_v49, %v3731_v27  ;;  %v8512_v53 = vadd.f32 %v8267_v44, %v3180_v16  ;;  %v9905_v29 = vld [vmem:[#allocation36_spill] sm:$0xff]  ;;  %v8522_v38 = vadd.f32 %v3414_v60, %v3413_v63  ;;  %v5130_v44 = vld [vmem:[%s9339_s3 + $0x290] sm:$0xff] }
 0x17f   :  { %9904 = vst [vmem:[#allocation128_spill] sm:$0xff] %v8486_v7  ;;  %v1205_v52 = vmax.f32 %v1197_v4, %v9905_v29  ;;  %v1240_v45 = vmax.f32 %v4709_v42, %v9905_v29  ;;  %v8526_v27 = vmul.f32 %v9821_v12, %v9906_v5  ;;  %v8532_v48 = vmul.f32 %v5130_v44, %v8501_v11  ;;  %v4712_v4 = vld [vmem:[%s9343_s7 + $0x28] sm:$0xff]  ;;  %v4715_v37 = vld [vmem:[%s9343_s7 + $0x40] sm:$0xff] }
 0x180   :  { %v1258_v46 = vmax.f32 %v4710_v41, %v9905_v29  ;;  %9907 = vst [vmem:[#allocation43_spill] sm:$0xff] %v8535_v8  ;;  %v8537_v49 = vadd.f32 %v3563_v31, %v3562_v0  ;;  %v8541_v16 = vmul.f32 %v8501_v11, %v8293_v51  ;;  %v1222_v60 = vmax.f32 %v4708_v55, %v9905_v29  ;;  %v1191_v0 = vld [vmem:[%s9340_s4] sm:$0x3]  ;;  %v9908_v55 = vld [vmem:[#allocation37_spill] sm:$0xff] }
 0x181   :  { %v1276_v63 = vmax.f32 %v4711_v3, %v9905_v29  ;;  %v8548_v42 = vadd.f32 %v3901_v25, %v3900_v18  ;;  %v1196_v51 = vld [vmem:[%s9342_s6] sm:$0x1f]  ;;  %v1312_v31 = vmax.f32 %v4713_v1, %v9905_v29  ;;  %v1330_v41 = vmax.f32 %v4714_v35, %v9905_v29  ;;  %v8612_v62 = vpop.permute.xlu0 %4382 }
 0x182   :  { %v8559_v3 = vadd.s32 72, %v9908_v55  ;;  %v3734_v5 = vrot.slane %v3733_v59, 1  ;;  %v8562_v18 = vmax.f32 %v1205_v52, %v9905_v29  ;;  %v8565_v25 = vmax.f32 %v1240_v45, %v9905_v29  ;;  %v8579_v52 = vpop.permute.xlu1 %4294  ;;  %9911 = vst [vmem:[#allocation104_spill] sm:$0xff] %v8612_v62 }
 0x183   :  { %v8568_v44 = vadd.s32 64, %v9908_v55  ;;  %v8574_v1 = vmax.f32 %v1258_v46, %v9905_v29  ;;  %v1294_v35 = vmax.f32 %v4712_v4, %v9905_v29  ;;  %v8582_v45 = vmax.f32 %v1276_v63, %v9905_v29  ;;  %v1384_v4 = vld [vmem:[%s9346_s10] sm:$0xff] }
 0x184   :  { %vm1342_vm3 = vcmp.lt.s32.totalorder %v8559_v3, 74  ;;  %vm1350_vm4 = vcmp.lt.s32.totalorder %v8559_v3, 77  ;;  %v8597_v50 = vmax.f32 %v1312_v31, %v9905_v29  ;;  %v8600_v63 = vmax.f32 %v1330_v41, %v9905_v29 }
 0x185   :  { %9909 = vst [vmem:[#allocation39_spill] sm:$0xff] %v8568_v44  ;;  %v1343_v55 = vsel %vm1342_vm3, %v1191_v0, %v9905_v29  ;;  %v1351_v46 = vsel %vm1350_vm4, %v1196_v51, %v9905_v29  ;;  %vm1360_vm5 = vcmp.lt.s32.totalorder %v8568_v44, 65  ;;  %v8594_v19 = vpop.eup %4991  ;;  %v8615_v31 = vmax.f32 %v1222_v60, %v9905_v29  ;;  %v4718_v60 = vld [vmem:[%s9346_s10 + $0x18] sm:$0xff] }
 0x186   :  { %9910 = vst [vmem:[#allocation147_spill] sm:$0xff] %v8594_v19  ;;  %v1345_v0 = vsel %vm1344_vm0, %v1343_v55, %v9905_v29  ;;  %v1353_v51 = vsel %vm1352_vm1, %v1351_v46, %v9905_v29  ;;  %v1361_v55 = vsel %vm1360_vm5, %v4715_v37, %v9905_v29  ;;  %v3565_v46 = vrot.slane %v8537_v49, 1  ;;  %v4300_v14 = vpop.permute.xlu1 %4299 }
 0x187   :  { %v1346_v41 = vrot.slane %v1345_v0, 2  ;;  %v1354_v24 = vrot.slane %v1353_v51, 7  ;;  %v3903_v61 = vrot.slane %v8548_v42, 1  ;;  %v8623_v34 = vmax.f32 %v1294_v35, %v9905_v29 }
 0x188   :  { %v1392_v19 = vmax.f32 %v1384_v4, %v9905_v29  ;;  %v3735_v58 = vadd.f32 %v3734_v5, %v3733_v59  ;;  %v1409_v51 = vmax.f32 %v4716_v40, %v9905_v29  ;;  %v1427_v62 = vmax.f32 %v4717_v57, %v9905_v29  ;;  %v4719_v59 = vld [vmem:[%s9346_s10 + $0x20] sm:$0xff] }
 0x189   :  { %v1364_v0 = vmax.f32 %v1361_v55, %v1354_v24  ;;  %v4188_v37 = vmax.f32 %v8562_v18, %v8582_v45  ;;  %v4190_v8 = vmax.f32 %v8565_v25, %v8597_v50  ;;  %v4191_v35 = vmax.f32 %v8574_v1, %v8600_v63 }
 0x18a   :  { %v1396_v4 = vmax.f32 %v1392_v19, %v9905_v29  ;;  %v1413_v24 = vmax.f32 %v1409_v51, %v9905_v29  ;;  %v1431_v40 = vmax.f32 %v1427_v62, %v9905_v29  ;;  %v1445_v57 = vmax.f32 %v4718_v60, %v9905_v29  ;;  %v4720_v62 = vld [vmem:[%s9346_s10 + $0x28] sm:$0xff]  ;;  %v3040_v60 = vpop.permute.xlu0 %3039 }
 0x18b   :  { %v8638_v28 = vmax.f32 %v1364_v0, %v1346_v41  ;;  %v3415_v5 = vmul.f32 %v8501_v11, %v8526_v27  ;;  %v8650_v55 = vadd.f32 %v8501_v11, %v8494_v22  ;;  %v4189_v19 = vmax.f32 %v8615_v31, %v8623_v34 }
 0x18c   :  { %v4248_v41 = vmul.f32 %v1396_v4, %v8562_v18  ;;  %v3566_v0 = vadd.f32 %v3565_v46, %v8537_v49  ;;  %v4249_v13 = vmul.f32 %v1413_v24, %v8615_v31  ;;  %v4250_v22 = vmul.f32 %v1431_v40, %v8565_v25 }
 0x18d   :  { %9912 = vst [vmem:[#allocation57_spill] sm:$0xff] %v8638_v28  ;;  %v4192_v51 = vsel %vm4164_vm2, %v8638_v28, -inf  ;;  %v3904_v11 = vadd.f32 %v3903_v61, %v8548_v42  ;;  %v4195_v7 = vmax.f32 %v4190_v8, %v4191_v35  ;;  %v1463_v56 = vmax.f32 %v4719_v59, %v9905_v29  ;;  %v3036_v42 = vpop.permute.xlu1 %3035 }
 0x18e   :  { %v4193_v15 = vmax.f32 %v4188_v37, %v4192_v51  ;;  %v4005_v10 = vadd.f32 1.0, %v3735_v58  ;;  %v4257_v17 = vadd.f32 %v4249_v13, %v4248_v41  ;;  %v1449_v32 = vmax.f32 %v1445_v57, %v9905_v29  ;;  %v4692_v51 = vld [vmem:[%s9338_s2 + $0x2c0] sm:$0xff] }
 0x18f   :  { %v1481_v44 = vmax.f32 %v4720_v62, %v9905_v29  ;;  %v3966_v49 = vsub.f32 %v3735_v58, %v3566_v0  ;;  %v8669_v46 = vadd.f32 %v8423_v54, %v8532_v48  ;;  %v8673_v28 = vadd.f32 %v8313_v39, %v8541_v16  ;;  %v8685_v39 = vpop.permute.xlu0 %4386  ;;  %v9914_v16 = vld [vmem:[#allocation52_spill] sm:$0xff] }
 0x190   :  { %v4194_v61 = vmax.f32 %v4193_v15, %v4189_v19  ;;  %v8677_v8 = vadd.f32 %v8496_v26, %v8526_v27  ;;  %v4313_v13 = vmul.f32 %v8408_v43, %v1413_v24  ;;  %v4258_v37 = vadd.f32 %v4257_v17, %v4250_v22  ;;  %v4721_v15 = vld [vmem:[%s9346_s10 + $0x30] sm:$0xff] }
 0x191   :  { %v4251_v35 = vmul.f32 %v1449_v32, %v8574_v1  ;;  %v3953_v58 = vsub.f32 %v3904_v11, %v3566_v0  ;;  %v8682_v57 = vadd.f32 %v8522_v38, %v3415_v5  ;;  %v1467_v48 = vmax.f32 %v1463_v56, %v9905_v29 }
 0x192   :  { %v4196_v54 = vmax.f32 %v4194_v61, %v4195_v7  ;;  %4993 = vrcp.f32 %v4005_v10  ;;  %v4312_v26 = vmul.f32 %v8360_v30, %v1396_v4  ;;  %v4314_v17 = vmul.f32 %v8444_v36, %v1431_v40  ;;  %v9916_v4 = vld [vmem:[#allocation82_spill] sm:$0xff] }
 0x193   :  { %v1485_v43 = vmax.f32 %v1481_v44, %v9905_v29  ;;  %v8693_v27 = vmul.f32 %v3966_v49, %v3966_v49  ;;  %v4315_v7 = vmul.f32 %v8509_v47, %v1449_v32  ;;  %v2406_v56 = vmul.f32 %v9895_v33, %v9914_v16  ;;  %v4693_v44 = vld [vmem:[%s9338_s2 + $0x2c8] sm:$0xff]  ;;  %v4305_v47 = vpop.permute.xlu1 %4304 }
 0x194   :  { %v4197_v38 = vrot.slane %v4196_v54, 4  ;;  %v4320_v24 = vadd.f32 %v4313_v13, %v4312_v26  ;;  %v4259_v59 = vadd.f32 %v4258_v37, %v4251_v35  ;;  %v4252_v5 = vmul.f32 %v1467_v48, %v8582_v45  ;;  %v3013_v13 = vpop.permute.xlu0 %3012  ;;  %v5132_v26 = vld [vmem:[%s9339_s3 + $0x298] sm:$0xff] }
 0x195   :  { %9913 = vst [vmem:[#allocation73_spill] sm:$0xff] %v8693_v27  ;;  %v1499_v10 = vmax.f32 %v4721_v15, %v9905_v29  ;;  %v8700_v19 = vmul.f32 %v3953_v58, %v3953_v58  ;;  %v4316_v36 = vmul.f32 %v8579_v52, %v1467_v48  ;;  %v2405_v32 = vmul.f32 %v9746_v9, %v9916_v4  ;;  %v5131_v52 = vld [vmem:[%s9339_s3 + $0x2c8] sm:$0xff] }
 0x196   :  { %v4198_v30 = vmax.f32 %v4196_v54, %v4197_v38  ;;  %v4321_v40 = vadd.f32 %v4320_v24, %v4314_v17  ;;  %v4253_v41 = vmul.f32 %v1485_v43, %v8623_v34  ;;  %v4317_v62 = vmul.f32 %v4300_v14, %v1485_v43  ;;  %v4687_v14 = vld [vmem:[%s9338_s2 + $0x298] sm:$0xff]  ;;  %v5133_v38 = vld [vmem:[%s9339_s3 + $0x2c0] sm:$0xff] }
 0x197   :  { %9915 = vst [vmem:[#allocation96_spill] sm:$0xff] %v8700_v19  ;;  %v3189_v0 = vmul.f32 %v4693_v44, %v3040_v60  ;;  %v8715_v11 = vmul.f32 %v5131_v52, %v4693_v44  ;;  %v3422_v49 = vmul.f32 %v4693_v44, %v2406_v56  ;;  %v3188_v61 = vmul.f32 %v4692_v51, %v3036_v42  ;;  %v9917_v60 = vld [vmem:[#allocation51_spill] sm:$0xff]  ;;  %v9918_v42 = vld [vmem:[#allocation97_spill] sm:$0xff]  ;;  %v8738_v4 = vpop.permute.xlu1 %4390 }
 0x198   :  { %v4199_v22 = vrot.slane %v4198_v30, 2  ;;  %v4322_v37 = vadd.f32 %v4321_v40, %v4315_v7  ;;  %v4260_v35 = vadd.f32 %v4259_v59, %v4252_v5  ;;  %v1503_v58 = vmax.f32 %v1499_v10, %v9905_v29  ;;  %v9943_v19 = vld [vmem:[#allocation71_spill] sm:$0xff] }
 0x199   :  { %v2400_v54 = vmul.f32 %v9823_v20, %v9917_v60  ;;  %v3421_v15 = vmul.f32 %v4692_v51, %v2405_v32  ;;  %v2528_v17 = vmul.f32 %v5132_v26, %v4687_v14  ;;  %4995 = vlog2.f32 %v9918_v42  ;;  %v1378_v42 = vld [vmem:[%s9344_s8] sm:$0x3] }
 0x19a   :  { %v4200_v48 = vmax.f32 %v4198_v30, %v4199_v22  ;;  %v8728_v43 = vadd.f32 %v8427_v2, %v3189_v0  ;;  %v2533_v7 = vmul.f32 %v5133_v38, %v4692_v51  ;;  %v8733_v16 = vadd.f32 %v4693_v44, %v4692_v51 }
 0x19b   :  { %v3183_v24 = vmul.f32 %v4687_v14, %v3013_v13  ;;  %v4323_v5 = vadd.f32 %v4322_v37, %v4316_v36  ;;  %v3214_v10 = vadd.f32 %v8512_v53, %v3188_v61  ;;  %v8736_v30 = vadd.f32 %v2406_v56, %v2405_v32  ;;  %v8753_v53 = vld [vmem:[%s9338_s2 + $0x300] sm:$0xff] }
 0x19c   :  { %v4201_v59 = vrot.slane %v4200_v48, 1  ;;  %v8740_v40 = vpop.eup %4993  ;;  %v4261_v2 = vadd.f32 %v4260_v35, %v4253_v41  ;;  %v4254_v0 = vmul.f32 %v1503_v58, %v8597_v50  ;;  %v4318_v22 = vmul.f32 %v4305_v47, %v1503_v58  ;;  %v3071_v47 = vpop.permute.xlu0 %3070  ;;  %v9921_v41 = vld [vmem:[#allocation84_spill] sm:$0xff] }
 0x19d   :  { %9919 = vst [vmem:[#allocation85_spill] sm:$0xff] %v8740_v40  ;;  %v3416_v52 = vmul.f32 %v4687_v14, %v2400_v54  ;;  %v4324_v44 = vadd.f32 %v4323_v5, %v4317_v62  ;;  %v8745_v51 = vadd.f32 %v3422_v49, %v3421_v15  ;;  %v8748_v36 = vadd.f32 %v8420_v23, %v2528_v17  ;;  %v5134_v23 = vld [vmem:[%s9339_s3 + $0x300] sm:$0xff]  ;;  %v3044_v15 = vpop.permute.xlu1 %3043 }
 0x19e   :  { %v8743_v60 = vmax.f32 %v4200_v48, %v4201_v59  ;;  %v8756_v56 = vadd.f32 %v8289_v21, %v3183_v24  ;;  %v8759_v32 = vadd.f32 %v4687_v14, %v8650_v55  ;;  %v8763_v62 = vmul.f32 %v9746_v9, %v9921_v41  ;;  %v1383_v9 = vld [vmem:[%s9345_s9] sm:$0x1f]  ;;  %v5135_v59 = vld [vmem:[%s9339_s3 + $0x2d0] sm:$0xff] }
 0x19f   :  { %v2541_v49 = vmul.f32 %v5134_v23, %v8753_v53  ;;  %v2559_v13 = vadd.f32 %v8491_v6, %v2533_v7  ;;  %v8779_v37 = vadd.f32 %v4261_v2, %v4254_v0  ;;  %v8781_v35 = vadd.f32 %v4324_v44, %v4318_v22 }
 0x1a0   :  { %9920 = vst [vmem:[#allocation61_spill] sm:$0xff] %v8743_v60  ;;  %v4203_v61 = vsub.f32 %v8562_v18, %v8743_v60  ;;  %v4204_v21 = vsub.f32 %v8615_v31, %v8743_v60  ;;  %v4205_v55 = vsub.f32 %v8565_v25, %v8743_v60  ;;  %v8784_v58 = vadd.f32 %v8682_v57, %v3416_v52  ;;  %v4722_v25 = vld [vmem:[%s9346_s10 + $0x38] sm:$0xff] }
 0x1a1   :  { %v8787_v18 = vadd.f32 %v8677_v8, %v2400_v54  ;;  %v3196_v48 = vmul.f32 %v8753_v53, %v3071_v47  ;;  %v4206_v26 = vsub.f32 %v8574_v1, %v8743_v60  ;;  %v8797_v57 = vmul.f32 %v8753_v53, %v8763_v62  ;;  %v4694_v8 = vld [vmem:[%s9338_s2 + $0x2d0] sm:$0xff]  ;;  %v9922_v54 = vld [vmem:[#allocation68_spill] sm:$0xff] }
 0x1a2   :  { %v4212_v31 = vmul.f32 1.442695, %v4203_v61  ;;  %v4214_v6 = vmul.f32 1.442695, %v4204_v21  ;;  %v4216_v14 = vmul.f32 1.442695, %v4205_v55  ;;  %v2407_v17 = vmul.f32 %v9821_v12, %v9922_v54  ;;  %v4310_v54 = vpop.permute.xlu0 %4309 }
 0x1a3   :  { %v1538_v38 = vsel %vm1350_vm4, %v1383_v9, %v9905_v29  ;;  %v4996_v1 = vpop.eup %4995  ;;  %v4207_v7 = vsub.f32 %v8582_v45, %v8743_v60  ;;  %v2560_v24 = vadd.f32 %v2559_v13, %v2541_v49  ;;  %v8815_v5 = vmul.f32 %v5135_v59, %v4694_v8  ;;  %v4723_v45 = vld [vmem:[%s9346_s10 + $0x40] sm:$0xff] }
 0x1a4   :  { %4997 = vpow2.f32 %v4212_v31  ;;  %v2422_v2 = vmul.f32 0.6931472, %v4996_v1  ;;  %v3190_v0 = vmul.f32 %v4694_v8, %v3044_v15  ;;  %v1517_v22 = vmax.f32 %v4722_v25, %v9905_v29  ;;  %v9923_v49 = vld [vmem:[#allocation48_spill] sm:$0xff]  ;;  %v9925_v15 = vld [vmem:[#allocation57_spill] sm:$0xff] }
 0x1a5   :  { %4999 = vpow2.f32 %v4214_v6  ;;  %v4208_v52 = vsub.f32 %v8623_v34, %v8743_v60  ;;  %v1530_v44 = vsel %vm1342_vm3, %v1378_v42, %v9905_v29  ;;  %v1540_v47 = vsel %vm1352_vm1, %v1538_v38, %v9905_v29 }
 0x1a6   :  { %5001 = vpow2.f32 %v4216_v14  ;;  %v4218_v41 = vmul.f32 1.442695, %v4206_v26  ;;  %v4209_v23 = vsub.f32 %v8597_v50, %v8743_v60  ;;  %v2437_v61 = vadd.f32 %v2422_v2, %v9923_v49  ;;  %v9931_v49 = vld [vmem:[#allocation149_spill] sm:$0xff] }
 0x1a7   :  { %v3215_v21 = vadd.f32 %v3214_v10, %v3196_v48  ;;  %v4220_v55 = vmul.f32 1.442695, %v4207_v7  ;;  %v4210_v34 = vsub.f32 %v8600_v63, %v8743_v60  ;;  %v3423_v13 = vmul.f32 %v4694_v8, %v2407_v17 }
 0x1a8   :  { %v1541_v9 = vrot.slane %v1540_v47, 7  ;;  %v3300_v25 = vsub.f32 %v2437_v61, %v2560_v24  ;;  %v1521_v3 = vmax.f32 %v1517_v22, %v9905_v29  ;;  %v1532_v31 = vsel %vm1344_vm0, %v1530_v44, %v9905_v29  ;;  %v3075_v44 = vpop.permute.xlu1 %3074  ;;  %v5136_v47 = vld [vmem:[%s9339_s3 + $0x308] sm:$0xff] }
 0x1a9   :  { %v1548_v14 = vsel %vm1360_vm5, %v4723_v45, %v9905_v29  ;;  %v4222_v50 = vmul.f32 1.442695, %v4208_v52  ;;  %v4211_v10 = vsub.f32 %v9925_v15, %v8743_v60  ;;  %v3750_v48 = vadd.f32 %v4694_v8, %v8733_v16  ;;  %v9927_v16 = vld [vmem:[#allocation111_spill] sm:$0xff] }
 0x1aa   :  { %v3919_v26 = vadd.f32 %v8736_v30, %v2407_v17  ;;  %5003 = vpow2.f32 %v4218_v41  ;;  %v4224_v42 = vmul.f32 1.442695, %v4209_v23  ;;  %v8843_v38 = vmul.f32 %v3300_v25, %v3215_v21  ;;  %v4701_v17 = vld [vmem:[%s9338_s2 + $0x308] sm:$0xff]  ;;  %v9930_v23 = vld [vmem:[#allocation139_spill] sm:$0xff] }
 0x1ab   :  { %v4255_v1 = vmul.f32 %v1521_v3, %v8600_v63  ;;  %5005 = vpow2.f32 %v4220_v55  ;;  %v8847_v7 = vadd.f32 %v8673_v28, %v3190_v0  ;;  %v1533_v29 = vrot.slane %v1532_v31, 2  ;;  %v9928_v63 = vld [vmem:[#allocation106_spill] sm:$0xff]  ;;  %v9929_v28 = vld [vmem:[#allocation92_spill] sm:$0xff]  ;;  %v9934_v25 = vld [vmem:[#allocation127_spill] sm:$0xff] }
 0x1ac   :  { %v1551_v24 = vmax.f32 %v1548_v14, %v1541_v9  ;;  %v4226_v59 = vmul.f32 1.442695, %v4210_v34  ;;  %v3581_v2 = vadd.f32 %v8745_v51, %v3423_v13  ;;  %v4319_v22 = vmul.f32 %v4310_v54, %v1521_v3  ;;  %v9932_v55 = vld [vmem:[#allocation76_spill] sm:$0xff]  ;;  %v9935_v3 = vld [vmem:[#allocation145_spill] sm:$0xff] }
 0x1ad   :  { %9926 = vst [vmem:[#allocation110_spill] sm:$0xff] %v8847_v7  ;;  %5007 = vlog2.f32 %v9927_v16  ;;  %v4228_v8 = vmul.f32 1.442695, %v4211_v10  ;;  %v2414_v52 = vmul.f32 %v9895_v33, %v9928_v63  ;;  %v2408_v0 = vmul.f32 %v9823_v20, %v9929_v28  ;;  %v9933_v33 = vld [vmem:[#allocation146_spill] sm:$0xff]  ;;  %v9936_v14 = vld [vmem:[#allocation72_spill] sm:$0xff] }
 0x1ae   :  { %v4998_v30 = vpop.eup %4997  ;;  %5009 = vpow2.f32 %v4222_v50  ;;  %v4263_v51 = vadd.f32 %v8779_v37, %v4255_v1  ;;  %v2542_v41 = vmul.f32 %v5136_v47, %v4701_v17  ;;  %v2409_v61 = vmul.f32 %v9931_v49, %v9930_v23  ;;  %v8871_v37 = vld [vmem:[%s9338_s2 + $0x2d8] sm:$0xff]  ;;  %v9937_v1 = vld [vmem:[#allocation128_spill] sm:$0xff]  ;;  %v9939_v63 = vld [vmem:[#allocation118_spill] sm:$0xff] }
 0x1af   :  { %v5000_v45 = vpop.eup %4999  ;;  %5011 = vpow2.f32 %v4224_v42  ;;  %v4393_v34 = vmul.f32 %v4998_v30, %v9932_v55  ;;  %v8866_v9 = vmax.f32 %v1551_v24, %v1533_v29  ;;  %v2410_v31 = vmul.f32 %v9935_v3, %v9934_v25  ;;  %v8885_v16 = vld [vmem:[%s9338_s2 + $0x2e0] sm:$0xff]  ;;  %v9941_v47 = vld [vmem:[#allocation95_spill] sm:$0xff] }
 0x1b0   :  { %v5002_v21 = vpop.eup %5001  ;;  %v4394_v13 = vmul.f32 %v5000_v45, %v9933_v33  ;;  %v4230_v6 = vadd.f32 %v5000_v45, %v4998_v30  ;;  %v8877_v10 = vadd.f32 %v8781_v35, %v4319_v22  ;;  %v3424_v54 = vmul.f32 %v8871_v37, %v2408_v0  ;;  %v8890_v35 = vld [vmem:[%s9338_s2 + $0x2e8] sm:$0xff]  ;;  %v9938_v22 = vld [vmem:[#allocation156_spill] sm:$0xff] }
 0x1b1   :  { %v4395_v50 = vmul.f32 %v5002_v21, %v9936_v14  ;;  %5013 = vpow2.f32 %v4226_v59  ;;  %v2571_v29 = vadd.f32 %v9937_v1, %v8715_v11  ;;  %v3197_v24 = vmul.f32 %v4701_v17, %v3075_v44  ;;  %v9940_v44 = vld [vmem:[#allocation133_spill] sm:$0xff] }
 0x1b2   :  { %v4402_v42 = vadd.f32 %v4394_v13, %v4393_v34  ;;  %5015 = vpow2.f32 %v4228_v8  ;;  %v3430_v30 = vmul.f32 %v4701_v17, %v2414_v52  ;;  %v2411_v28 = vmul.f32 %v9939_v63, %v9938_v22 }
 0x1b3   :  { %v3425_v59 = vmul.f32 %v8885_v16, %v2409_v61  ;;  %v4256_v11 = vmul.f32 %v8866_v9, %v9925_v15  ;;  %v2412_v23 = vmul.f32 %v9941_v47, %v9940_v44  ;;  %v3426_v8 = vmul.f32 %v8890_v35, %v2410_v31 }
 0x1b4   :  { %v4403_v45 = vadd.f32 %v4402_v42, %v4395_v50  ;;  %v5004_v55 = vpop.eup %5003  ;;  %v4231_v34 = vadd.f32 %v5002_v21, %v4230_v6  ;;  %v3582_v33 = vadd.f32 %v3581_v2, %v3424_v54  ;;  %v3751_v13 = vadd.f32 %v8871_v37, %v3750_v48  ;;  %v8908_v42 = vld [vmem:[%s9338_s2 + $0x2f0] sm:$0xff]  ;;  %v8916_v48 = vld [vmem:[%s9338_s2 + $0x2f8] sm:$0xff] }
 0x1b5   :  { %v3920_v25 = vadd.f32 %v3919_v26, %v2408_v0  ;;  %v5006_v14 = vpop.eup %5005  ;;  %v2572_v1 = vadd.f32 %v2571_v29, %v2542_v41  ;;  %v3227_v22 = vadd.f32 %v8728_v43, %v3197_v24  ;;  %v8903_v50 = vadd.f32 %v4701_v17, %v8753_v53  ;;  %v9942_v0 = vld [vmem:[#allocation90_spill] sm:$0xff] }
 0x1b6   :  { %v8911_v44 = vadd.f32 1e-14, %v9925_v15  ;;  %v3427_v26 = vmul.f32 %v8908_v42, %v2411_v28  ;;  %v3583_v43 = vadd.f32 %v3582_v33, %v3425_v59  ;;  %v3752_v53 = vadd.f32 %v8885_v16, %v3751_v13 }
 0x1b7   :  { %v5008_v21 = vpop.eup %5007  ;;  %v3921_v2 = vadd.f32 %v3920_v25, %v2409_v61  ;;  %v4396_v41 = vmul.f32 %v5004_v55, %v9942_v0  ;;  %v4264_v6 = vsel %vm4164_vm2, %v4256_v11, 0.0  ;;  %v3428_v29 = vmul.f32 %v8916_v48, %v2412_v23  ;;  %v9946_v0 = vld [vmem:[#allocation104_spill] sm:$0xff] }
 0x1b8   :  { %v5010_v17 = vpop.eup %5009  ;;  %v2424_v54 = vmul.f32 0.6931472, %v5008_v21  ;;  %v4232_v60 = vadd.f32 %v5004_v55, %v4231_v34  ;;  %v3584_v15 = vadd.f32 %v3583_v43, %v3426_v8  ;;  %v3753_v27 = vadd.f32 %v8890_v35, %v3752_v53  ;;  %v4134_v8 = vpop.permute.xlu1 %4133 }
 0x1b9   :  { %v5012_v24 = vpop.eup %5011  ;;  %v3922_v40 = vadd.f32 %v3921_v2, %v2410_v31  ;;  %v8926_v59 = vadd.f32 %v3430_v30, %v8797_v57  ;;  %v8929_v61 = vadd.f32 %v2414_v52, %v8763_v62  ;;  %v4137_v33 = vsub.f32 0.0, %v8911_v44  ;;  %v9944_v31 = vld [vmem:[#allocation112_spill] sm:$0xff]  ;;  %v3048_v30 = vpop.permute.xlu0 %3047 }
 0x1ba   :  { %v2438_v7 = vadd.f32 %v2424_v54, %v9943_v19  ;;  %v8932_v11 = vadd.f32 %v4264_v6, %v4263_v51  ;;  %v3585_v13 = vadd.f32 %v3584_v15, %v3427_v26  ;;  %v3754_v25 = vadd.f32 %v8908_v42, %v3753_v27  ;;  %v9945_v19 = vld [vmem:[#allocation43_spill] sm:$0xff] }
 0x1bb   :  { %v3923_v55 = vadd.f32 %v3922_v40, %v2411_v28  ;;  %v8935_v34 = vpop.eup %5013  ;;  %v4397_v21 = vmul.f32 %v5006_v14, %v9944_v31  ;;  %v4398_v43 = vmul.f32 %v5010_v17, %v9945_v19  ;;  %v4139_v53 = vand.u32 2147483647, %v4137_v33 }
 0x1bc   :  { %v3301_v57 = vsub.f32 %v2438_v7, %v2572_v1  ;;  %v8939_v62 = vpop.eup %5015  ;;  %v4404_v52 = vadd.f32 %v4403_v45, %v4396_v41  ;;  %v4233_v2 = vadd.f32 %v5006_v14, %v4232_v60  ;;  %v3586_v51 = vadd.f32 %v3585_v13, %v3428_v29 }
 0x1bd   :  { %v3755_v15 = vadd.f32 %v8916_v48, %v3754_v25  ;;  %v8943_v27 = vmul.f32 %v4134_v8, %v8866_v9  ;;  %v4140_v40 = vsub.f32 0.0, %v4139_v53  ;;  %v4150_v28 = vand.u32 2147483647, %v8911_v44 }
 0x1be   :  { %v3309_v26 = vmul.f32 %v3301_v57, %v3227_v22  ;;  %v4399_v6 = vmul.f32 %v5012_v24, %v9946_v0  ;;  %v4401_v7 = vmul.f32 %v8939_v62, %v8738_v4  ;;  %v3191_v1 = vmul.f32 %v8871_v37, %v3048_v30 }
 0x1bf   :  { %v3924_v54 = vadd.f32 %v3923_v55, %v2412_v23  ;;  %v4405_v45 = vadd.f32 %v4404_v52, %v4397_v21  ;;  %v4141_v14 = vmul.f32 1.442695, %v4140_v40  ;;  %v4151_v22 = vsub.f32 0.0, %v4150_v28 }
 0x1c0   :  { %v8951_v60 = vadd.f32 %v3309_v26, %v8843_v38  ;;  %v4234_v41 = vadd.f32 %v5010_v17, %v4233_v2  ;;  %v4400_v29 = vmul.f32 %v8935_v34, %v8685_v39  ;;  %v3587_v13 = vrot.slane %v3586_v51, 4  ;;  %v5137_v38 = vld [vmem:[%s9339_s3 + $0x2d8] sm:$0xff]  ;;  %v8971_v2 = vpop.permute.xlu0 %3020 }
 0x1c1   :  { %v3756_v25 = vrot.slane %v3755_v15, 4  ;;  %v4406_v8 = vadd.f32 %v4405_v45, %v4398_v43  ;;  %5017 = vpow2.f32 %v4141_v14  ;;  %v4152_v31 = vmul.f32 1.442695, %v4151_v22  ;;  %v9947_v43 = vld [vmem:[#allocation119_spill] sm:$0xff]  ;;  %v9950_v45 = vld [vmem:[#allocation150_spill] sm:$0xff] }
 0x1c2   :  { %v4327_v4 = vsel %vm4164_vm2, %v8943_v27, 0.0  ;;  %v2536_v55 = vmul.f32 %v5137_v38, %v8871_v37  ;;  %v8963_v17 = vadd.f32 %v8756_v56, %v3191_v1  ;;  %v3925_v39 = vrot.slane %v3924_v54, 4  ;;  %v8976_v56 = vld [vmem:[%s9338_s2 + $0x2a0] sm:$0xff]  ;;  %v9948_v37 = vld [vmem:[#allocation137_spill] sm:$0xff] }
 0x1c3   :  { %v4407_v21 = vadd.f32 %v4406_v8, %v4399_v6  ;;  %v4409_v19 = vsel %vm4164_vm2, %v4401_v7, 0.0  ;;  %5019 = vpow2.f32 %v4152_v31  ;;  %v2402_v57 = vmul.f32 %v9935_v3, %v9947_v43  ;;  %v8993_v1 = vld [vmem:[%s9338_s2 + $0x2a8] sm:$0xff]  ;;  %v9010_v31 = vpop.permute.xlu1 %3016  ;;  %v9953_v7 = vld [vmem:[#allocation70_spill] sm:$0xff] }
 0x1c4   :  { %v8968_v30 = vadd.f32 %v3587_v13, %v3586_v51  ;;  %v3757_v53 = vadd.f32 %v3756_v25, %v3755_v15  ;;  %v4328_v52 = vadd.f32 %v4327_v4, %v8877_v10  ;;  %v2401_v26 = vmul.f32 %v9931_v49, %v9948_v37  ;;  %v9949_v51 = vld [vmem:[#allocation50_spill] sm:$0xff]  ;;  %v9015_v4 = vld [vmem:[%s9338_s2 + $0x2b8] sm:$0xff] }
 0x1c5   :  { %v8980_v40 = vadd.f32 %v5012_v24, %v4234_v41  ;;  %v4408_v28 = vadd.f32 %v4407_v21, %v4400_v29  ;;  %v2403_v15 = vmul.f32 %v9939_v63, %v9949_v51  ;;  %v8985_v6 = vadd.f32 %v3925_v39, %v3924_v54  ;;  %v9007_v25 = vld [vmem:[%s9338_s2 + $0x2b0] sm:$0xff] }
 0x1c6   :  { %v8987_v10 = vmax.f32 %v4137_v33, 0.0  ;;  %v2404_v24 = vmul.f32 %v9941_v47, %v9950_v45  ;;  %v3418_v22 = vmul.f32 %v8993_v1, %v2402_v57  ;;  %v3417_v41 = vmul.f32 %v8976_v56, %v2401_v26  ;;  %v9951_v21 = vld [vmem:[#allocation94_spill] sm:$0xff] }
 0x1c7   :  { %v8997_v14 = vadd.f32 %v4409_v19, %v4408_v28  ;;  %v3739_v33 = vadd.f32 %v8976_v56, %v8759_v32  ;;  %v3758_v29 = vrot.slane %v3757_v53, 2  ;;  %v4329_v13 = vrot.slane %v4328_v52, 4  ;;  %v9029_v28 = vld [vmem:[%s9338_s2 + $0x318] sm:$0xff]  ;;  %v9952_v51 = vld [vmem:[#allocation102_spill] sm:$0xff] }
 0x1c8   :  { %v3908_v8 = vadd.f32 %v8787_v18, %v2401_v26  ;;  %v3419_v32 = vmul.f32 %v9007_v25, %v2403_v15  ;;  %v3570_v38 = vadd.f32 %v8784_v58, %v3417_v41  ;;  %v9022_v19 = vmul.f32 %v9823_v20, %v9951_v21  ;;  %v3083_v26 = vpop.permute.xlu0 %3082  ;;  %v5138_v20 = vld [vmem:[%s9339_s3 + $0x318] sm:$0xff] }
 0x1c9   :  { %v3740_v39 = vadd.f32 %v8993_v1, %v3739_v33  ;;  %v3420_v18 = vmul.f32 %v9015_v4, %v2404_v24  ;;  %5021 = vlog2.f32 %v9952_v51  ;;  %v2544_v33 = vmul.f32 %v5138_v20, %v9029_v28 }
 0x1ca   :  { %v3909_v37 = vadd.f32 %v3908_v8, %v2402_v57  ;;  %v3571_v45 = vadd.f32 %v3570_v38, %v3418_v22  ;;  %v2595_v57 = vadd.f32 %v8748_v36, %v2536_v55  ;;  %v9038_v8 = vadd.f32 %v3758_v29, %v3757_v53  ;;  %v3079_v29 = vpop.permute.xlu1 %3078 }
 0x1cb   :  { %v5018_v58 = vpop.eup %5017  ;;  %v3741_v41 = vadd.f32 %v9007_v25, %v3740_v39  ;;  %v9040_v23 = vadd.f32 %v4329_v13, %v4328_v52  ;;  %v3199_v38 = vmul.f32 %v9029_v28, %v3083_v26  ;;  %v3432_v39 = vmul.f32 %v9029_v28, %v9022_v19  ;;  %v9954_v13 = vld [vmem:[#allocation140_spill] sm:$0xff]  ;;  %v9955_v26 = vld [vmem:[#allocation81_spill] sm:$0xff] }
 0x1cc   :  { %v4143_v21 = vadd.f32 1.0, %v5018_v58  ;;  %v3910_v0 = vadd.f32 %v3909_v37, %v2403_v15  ;;  %v3572_v51 = vadd.f32 %v3571_v45, %v3419_v32  ;;  %v2415_v36 = vmul.f32 %v9821_v12, %v9953_v7  ;;  %v4702_v15 = vld [vmem:[%s9338_s2 + $0x310] sm:$0xff]  ;;  %v9956_v45 = vld [vmem:[#allocation135_spill] sm:$0xff] }
 0x1cd   :  { %v5020_v43 = vpop.eup %5019  ;;  %v3742_v22 = vadd.f32 %v9015_v4, %v3741_v41  ;;  %v2596_v52 = vadd.f32 %v2595_v57, %v2544_v33  ;;  %v2417_v32 = vmul.f32 %v9931_v49, %v9954_v13  ;;  %v2583_v12 = vadd.f32 %v8669_v46, %v8815_v5  ;;  %v9957_v46 = vld [vmem:[#allocation158_spill] sm:$0xff] }
 0x1ce   :  { %5023 = vlog2.f32 %v4143_v21  ;;  %v4154_v54 = vadd.f32 1.0, %v5020_v43  ;;  %v3911_v20 = vadd.f32 %v3910_v0, %v2404_v24  ;;  %v3573_v55 = vadd.f32 %v3572_v51, %v3420_v18  ;;  %v5139_v0 = vld [vmem:[%s9339_s3 + $0x310] sm:$0xff]  ;;  %v9065_v21 = vld [vmem:[%s9338_s2 + $0x320] sm:$0xff] }
 0x1cf   :  { %v3743_v53 = vrot.slane %v3742_v22, 4  ;;  %v2543_v24 = vmul.f32 %v5139_v0, %v4702_v15  ;;  %v3251_v18 = vadd.f32 %v8963_v17, %v3199_v38  ;;  %v2418_v49 = vmul.f32 %v9935_v3, %v9956_v45  ;;  %v9958_v51 = vld [vmem:[#allocation42_spill] sm:$0xff] }
 0x1d0   :  { %5025 = vlog2.f32 %v4154_v54  ;;  %v3912_v37 = vrot.slane %v3911_v20, 4  ;;  %v3574_v7 = vrot.slane %v3573_v55, 4  ;;  %v3198_v54 = vmul.f32 %v4702_v15, %v3079_v29  ;;  %v9959_v0 = vld [vmem:[#allocation110_spill] sm:$0xff] }
 0x1d1   :  { %v3744_v43 = vadd.f32 %v3743_v53, %v3742_v22  ;;  %5027 = vlog2.f32 %v9955_v26  ;;  %v3431_v41 = vmul.f32 %v4702_v15, %v2415_v36  ;;  %v2419_v5 = vmul.f32 %v9939_v63, %v9957_v46 }
 0x1d2   :  { %v3913_v58 = vadd.f32 %v3912_v37, %v3911_v20  ;;  %v3575_v33 = vadd.f32 %v3574_v7, %v3573_v55  ;;  %v2420_v17 = vmul.f32 %v9941_v47, %v9958_v51  ;;  %v2584_v20 = vadd.f32 %v2583_v12, %v2543_v24  ;;  %v9076_v37 = vld [vmem:[%s9338_s2 + $0x328] sm:$0xff] }
 0x1d3   :  { %v3745_v57 = vrot.slane %v3744_v43, 2  ;;  %v5022_v22 = vpop.eup %5021  ;;  %v3433_v3 = vmul.f32 %v9065_v21, %v2417_v32  ;;  %v3594_v53 = vadd.f32 %v8926_v59, %v3431_v41  ;;  %v3763_v63 = vadd.f32 %v4702_v15, %v8903_v50  ;;  %v9960_v59 = vld [vmem:[#allocation56_spill] sm:$0xff] }
 0x1d4   :  { %v3914_v38 = vrot.slane %v3913_v58, 2  ;;  %v3576_v55 = vrot.slane %v3575_v33, 2  ;;  %v2428_v13 = vmul.f32 0.6931472, %v5022_v22  ;;  %v3239_v7 = vadd.f32 %v9959_v0, %v3198_v54 }
 0x1d5   :  { %v3746_v29 = vadd.f32 %v3745_v57, %v3744_v43  ;;  %v3434_v47 = vmul.f32 %v9076_v37, %v2418_v49  ;;  %v3595_v26 = vadd.f32 %v3594_v53, %v3432_v39  ;;  %v3932_v24 = vadd.f32 %v8929_v61, %v2415_v36  ;;  %v9086_v43 = vld [vmem:[%s9338_s2 + $0x330] sm:$0xff] }
 0x1d6   :  { %v3915_v45 = vadd.f32 %v3914_v38, %v3913_v58  ;;  %v2440_v41 = vadd.f32 %v2428_v13, %v9960_v59  ;;  %v3764_v57 = vadd.f32 %v9029_v28, %v3763_v63  ;;  %v3435_v50 = vmul.f32 %v9086_v43, %v2419_v5  ;;  %v9099_v38 = vld [vmem:[%s9338_s2 + $0x338] sm:$0xff] }
 0x1d7   :  { %v3747_v12 = vrot.slane %v3746_v29, 1  ;;  %v3596_v15 = vadd.f32 %v3595_v26, %v3433_v3  ;;  %v3933_v54 = vadd.f32 %v3932_v24, %v9022_v19  ;;  %v9961_v39 = vlaneseq }
 0x1d8   :  { %v5024_v46 = vpop.eup %5023  ;;  %v3577_v36 = vadd.f32 %v3576_v55, %v3575_v33  ;;  %v3303_v22 = vsub.f32 %v2440_v41, %v2596_v52  ;;  %v3436_v53 = vmul.f32 %v9099_v38, %v2420_v17  ;;  %v3765_v3 = vadd.f32 %v9065_v21, %v3764_v57 }
 0x1d9   :  { %v9092_v51 = vand.u32 127, %v9961_v39  ;;  %v4145_v61 = vmul.f32 0.6931472, %v5024_v46  ;;  %v9094_v58 = vadd.f32 %v3747_v12, %v3746_v29  ;;  %v3597_v13 = vadd.f32 %v3596_v15, %v3434_v47  ;;  %v9963_v47 = vld [vmem:[#allocation38_spill] sm:$0xff] }
 0x1da   :  { %v5026_v28 = vpop.eup %5025  ;;  %v3934_v19 = vadd.f32 %v3933_v54, %v2417_v32  ;;  %v3916_v33 = vrot.slane %v3915_v45, 1  ;;  %v9104_v55 = vmul.f32 %v3303_v22, %v3251_v18  ;;  %v3766_v24 = vadd.f32 %v9076_v37, %v3765_v3  ;;  %v9965_v54 = vld [vmem:[#allocation125_spill] sm:$0xff] }
 0x1db   :  { %9962 = vst [vmem:[#allocation131_spill] sm:$0xff] %v9092_v51  ;;  %v5028_v63 = vpop.eup %5027  ;;  %v4146_v0 = vadd.f32 %v4145_v61, %v8987_v10  ;;  %v4156_v26 = vmul.f32 0.6931472, %v5026_v28  ;;  %v3598_v29 = vadd.f32 %v3597_v13, %v3435_v50  ;;  %v3578_v59 = vrot.slane %v3577_v36, 1 }
 0x1dc   :  { %v2426_v52 = vmul.f32 0.6931472, %v5028_v63  ;;  %v3935_v12 = vadd.f32 %v3934_v19, %v2418_v49  ;;  %v4006_v41 = vadd.f32 1.0, %v9094_v58  ;;  %vm1802_vm6 = vcmp.lt.s32.totalorder %v9092_v51, 8 }
 0x1dd   :  { %v3599_v32 = vadd.f32 %v3598_v29, %v3436_v53  ;;  %v3767_v46 = vadd.f32 %v9086_v43, %v3766_v24  ;;  %v9112_v15 = vmul.f32 %v4146_v0, %v8943_v27  ;;  %v9964_v18 = vmax.f32 %v8911_v44, 0.0  ;;  %v9967_v29 = vld [vmem:[#allocation105_spill] sm:$0xff] }
 0x1de   :  { %v2439_v57 = vadd.f32 %v2426_v52, %v9963_v47  ;;  %v3936_v10 = vadd.f32 %v3935_v12, %v2419_v5  ;;  %v3539_v39 = vrot.slane %v9965_v54, 1  ;;  %v9966_v49 = vrot.slane %v8968_v30, 2  ;;  %v9969_v12 = vld [vmem:[#allocation46_spill] sm:$0xff] }
 0x1df   :  { %v4157_v50 = vadd.f32 %v4156_v26, %v9964_v18  ;;  %v3600_v28 = vrot.slane %v3599_v32, 4  ;;  %v3768_v13 = vadd.f32 %v9099_v38, %v3767_v46  ;;  %5029 = vrcp.f32 %v4006_v41 }
 0x1e0   :  { %v3590_v61 = vadd.f32 %v9966_v49, %v8968_v30  ;;  %v3302_v22 = vsub.f32 %v2439_v57, %v2584_v20  ;;  %v3937_v53 = vadd.f32 %v3936_v10, %v2420_v17  ;;  %v5154_v3 = vmov 0.0  }
 0x1e1   :  { %v9121_v5 = vsel %vm1802_vm6, 1.0, %v5154_v3  ;;  %v3579_v27 = vadd.f32 %v3578_v59, %v3577_v36  ;;  %v3769_v44 = vrot.slane %v3768_v13, 4  ;;  %v3601_v26 = vadd.f32 %v3600_v28, %v3599_v32  ;;  %v9971_v28 = vld [vmem:[#allocation59_spill] sm:$0xff] }
 0x1e2   :  { %v3591_v19 = vrot.slane %v3590_v61, 1  ;;  %v3310_v63 = vmul.f32 %v3302_v22, %v3239_v7  ;;  %v3938_v0 = vrot.slane %v3937_v53, 4  ;;  %v3540_v52 = vadd.f32 %v3539_v39, %v9965_v54 }
 0x1e3   :  { %v9968_v30 = vrot.slane %v9967_v29, 1  ;;  %v3760_v24 = vrot.slane %v9038_v8, 1  ;;  %v3877_v17 = vrot.slane %v9969_v12, 1  ;;  %v3770_v47 = vadd.f32 %v3769_v44, %v3768_v13  ;;  %v9973_v13 = vld [vmem:[#allocation91_spill] sm:$0xff] }
 0x1e4   :  { %v9130_v41 = vadd.f32 %v8951_v60, %v3310_v63  ;;  %v3602_v36 = vrot.slane %v3601_v26, 2  ;;  %v9970_v7 = vrot.slane %v8985_v6, 2  ;;  %v3592_v57 = vadd.f32 %v3591_v19, %v3590_v61  ;;  %v9972_v60 = vld [vmem:[#allocation80_spill] sm:$0xff] }
 0x1e5   :  { %v3709_v20 = vadd.f32 %v9968_v30, %v9967_v29  ;;  %v3878_v32 = vadd.f32 %v3877_v17, %v9969_v12  ;;  %v3917_v46 = vadd.f32 %v3916_v33, %v3915_v45  ;;  %v3939_v10 = vadd.f32 %v3938_v0, %v3937_v53 }
 0x1e6   :  { %v3928_v59 = vadd.f32 %v9970_v7, %v8985_v6  ;;  %v3603_v18 = vadd.f32 %v3602_v36, %v3601_v26  ;;  %v3761_v54 = vadd.f32 %v3760_v24, %v9038_v8  ;;  %v3771_v39 = vrot.slane %v3770_v47, 2  ;;  %v9975_v24 = vld [vmem:[#allocation53_spill] sm:$0xff] }
 0x1e7   :  { %v3940_v22 = vrot.slane %v3939_v10, 2  ;;  %v3950_v3 = vsub.f32 %v9972_v60, %v9971_v28  ;;  %v3963_v63 = vsub.f32 %v9973_v13, %v9971_v28  ;;  %v3964_v44 = vsub.f32 %v3709_v20, %v3540_v52  ;;  %v9977_v13 = vld [vmem:[#allocation109_spill] sm:$0xff] }
 0x1e8   :  { %v3929_v49 = vrot.slane %v3928_v59, 1  ;;  %v3604_v29 = vrot.slane %v3603_v18, 1  ;;  %v3772_v6 = vadd.f32 %v3771_v39, %v3770_v47  ;;  %v3967_v19 = vsub.f32 %v9094_v58, %v3579_v27 }
 0x1e9   :  { %v9974_v45 = vsub.f32 1.0, %v8866_v9  ;;  %v3941_v8 = vadd.f32 %v3940_v22, %v3939_v10  ;;  %v3951_v53 = vsub.f32 %v3878_v32, %v3540_v52  ;;  %v3954_v0 = vsub.f32 %v3917_v46, %v3579_v27  ;;  %v5030_v36 = vpop.eup %5029 }
 0x1ea   :  { %v3930_v61 = vadd.f32 %v3929_v49, %v3928_v59  ;;  %v3773_v26 = vrot.slane %v3772_v6, 1  ;;  %v3968_v30 = vsub.f32 %v3761_v54, %v3592_v57  ;;  %v3975_v12 = vmul.f32 %v9975_v24, %v9975_v24  ;;  %v9976_v59 = vld [vmem:[#allocation144_spill] sm:$0xff]  ;;  %v9986_v24 = vld [vmem:[#allocation147_spill] sm:$0xff] }
 0x1eb   :  { %v9144_v33 = vmul.f32 %v4157_v50, %v9974_v45  ;;  %v3976_v17 = vmul.f32 %v3963_v63, %v3963_v63  ;;  %v3605_v7 = vadd.f32 %v3604_v29, %v3603_v18  ;;  %v3942_v28 = vrot.slane %v3941_v8, 1  ;;  %v9978_v63 = vld [vmem:[#allocation78_spill] sm:$0xff]  ;;  %v9979_v29 = vld [vmem:[#allocation124_spill] sm:$0xff] }
 0x1ec   :  { %v3955_v47 = vsub.f32 %v3930_v61, %v3592_v57  ;;  %v3988_v58 = vmul.f32 %v9976_v59, %v9976_v59  ;;  %v3774_v39 = vadd.f32 %v3773_v26, %v3772_v6  ;;  %v9150_v49 = vmul.f32 %v3964_v44, %v3964_v44  ;;  %v9980_v57 = vld [vmem:[#allocation89_spill] sm:$0xff]  ;;  %v9981_v6 = vld [vmem:[#allocation44_spill] sm:$0xff] }
 0x1ed   :  { %v3980_v50 = vmul.f32 %v3967_v19, %v3967_v19  ;;  %v3989_v10 = vmul.f32 %v3950_v3, %v3950_v3  ;;  %v3943_v52 = vadd.f32 %v3942_v28, %v3941_v8  ;;  %v3993_v27 = vmul.f32 %v3954_v0, %v3954_v0  ;;  %v9982_v44 = vld [vmem:[#allocation40_spill] sm:$0xff] }
 0x1ee   :  { %v4003_v32 = vadd.f32 1.0, %v3709_v20  ;;  %v4007_v46 = vadd.f32 1.0, %v3761_v54  ;;  %v9152_v22 = vmul.f32 %v3968_v30, %v3968_v30  ;;  %v4008_v60 = vadd.f32 1.0, %v3774_v39  ;;  %v9983_v19 = vld [vmem:[#allocation152_spill] sm:$0xff]  ;;  %v9984_v20 = vld [vmem:[#allocation75_spill] sm:$0xff]  ;;  %v9985_v30 = vld [vmem:[#allocation49_spill] sm:$0xff] }
 0x1ef   :  { %v4024_v18 = vmul.f32 %v9978_v63, %v9977_v13  ;;  %v4025_v61 = vmul.f32 %v9980_v57, %v9979_v29  ;;  %v3990_v45 = vmul.f32 %v3951_v53, %v3951_v53  ;;  %v4026_v26 = vmul.f32 %v9982_v44, %v9981_v6  ;;  %v9987_v59 = vld [vmem:[#allocation96_spill] sm:$0xff]  ;;  %v9988_v13 = vld [vmem:[#allocation85_spill] sm:$0xff]  ;;  %v9990_v57 = vld [vmem:[#allocation143_spill] sm:$0xff] }
 0x1f0   :  { %5031 = vrcp.f32 %v4003_v32  ;;  %v4027_v3 = vmul.f32 %v9983_v19, %v3988_v58  ;;  %v3956_v8 = vsub.f32 %v3943_v52, %v3605_v7  ;;  %v3994_v0 = vmul.f32 %v3955_v47, %v3955_v47  ;;  %v9989_v53 = vld [vmem:[#allocation65_spill] sm:$0xff]  ;;  %v9991_v6 = vld [vmem:[#allocation108_spill] sm:$0xff]  ;;  %v9169_v52 = vpop.permute.xlu1 %3051 }
 0x1f1   :  { %5033 = vrcp.f32 %v4007_v46  ;;  %v4028_v54 = vmul.f32 %v9984_v20, %v3989_v10  ;;  %v4030_v28 = vmul.f32 %v9986_v24, %v9985_v30  ;;  %v4031_v63 = vmul.f32 %v9988_v13, %v9987_v59  ;;  %v9992_v10 = vld [vmem:[#allocation73_spill] sm:$0xff]  ;;  %v9993_v20 = vld [vmem:[#allocation155_spill] sm:$0xff] }
 0x1f2   :  { %5035 = vrcp.f32 %v4008_v60  ;;  %v4032_v29 = vmul.f32 %v5030_v36, %v3993_v27  ;;  %v4037_v32 = vadd.f32 %v4024_v18, %v9989_v53  ;;  %v4038_v51 = vadd.f32 %v4025_v61, %v9990_v57  ;;  %v9994_v24 = vld [vmem:[#allocation55_spill] sm:$0xff] }
 0x1f3   :  { %v4039_v44 = vadd.f32 %v4026_v26, %v9991_v6  ;;  %v4040_v58 = vadd.f32 %v4027_v3, %v3975_v12  ;;  %v3969_v47 = vsub.f32 %v3774_v39, %v3605_v7  ;;  %v4041_v46 = vadd.f32 %v4028_v54, %v3976_v17  ;;  %v9995_v26 = vld [vmem:[#allocation67_spill] sm:$0xff]  ;;  %v3056_v6 = vpop.permute.xlu0 %3055 }
 0x1f4   :  { %v4044_v60 = vadd.f32 %v4031_v63, %v9992_v10  ;;  %v4045_v19 = vadd.f32 %v4032_v29, %v3980_v50  ;;  %v4048_v30 = vmul.f32 %v9121_v5, %v9993_v20  ;;  %v4049_v36 = vmul.f32 %v9121_v5, %v9994_v24 }
 0x1f5   :  { %v4050_v27 = vmul.f32 %v9121_v5, %v4037_v32  ;;  %v4051_v18 = vmul.f32 %v9121_v5, %v4038_v51  ;;  %v3995_v61 = vmul.f32 %v3956_v8, %v3956_v8  ;;  %v4043_v12 = vadd.f32 %v4030_v28, %v9995_v26  ;;  %v9185_v28 = vpop.permute.xlu1 %3024 }
 0x1f6   :  { %v4052_v3 = vmul.f32 %v9121_v5, %v4039_v44  ;;  %v4053_v17 = vmul.f32 %v9121_v5, %v4040_v58  ;;  %v4054_v7 = vmul.f32 %v9121_v5, %v4041_v46  ;;  %v4057_v39 = vmul.f32 %v9121_v5, %v4044_v60 }
 0x1f7   :  { %v4074_v50 = vrot.slane %v4049_v36, 7  ;;  %v4077_v54 = vrot.slane %v4050_v27, 6  ;;  %v4080_v59 = vrot.slane %v4051_v18, 5  ;;  %v4058_v13 = vmul.f32 %v9121_v5, %v4045_v19 }
 0x1f8   :  { %v4083_v8 = vrot.slane %v4052_v3, 4  ;;  %v3982_v29 = vmul.f32 %v3969_v47, %v3969_v47  ;;  %v4056_v53 = vmul.f32 %v9121_v5, %v4043_v12  ;;  %v4086_v57 = vrot.slane %v4053_v17, 3  ;;  %v5140_v47 = vld [vmem:[%s9339_s3 + $0x2a8] sm:$0xff] }
 0x1f9   :  { %v4076_v51 = vsel %vm4075_vm7, %v4074_v50, %v4048_v30  ;;  %v4095_v10 = vrot.slane %v4057_v39, 7  ;;  %v4159_v19 = vadd.f32 %v9144_v33, %v9112_v15  ;;  %v2530_v20 = vmul.f32 %v5140_v47, %v8993_v1  ;;  %v3087_v39 = vpop.permute.xlu1 %3086  ;;  %v3029_v50 = vpop.permute.xlu0 %3028 }
 0x1fa   :  { %v5032_v63 = vpop.eup %5031  ;;  %v4079_v32 = vsel %vm4078_vm8, %v4077_v54, %v4076_v51  ;;  %v4089_v27 = vrot.slane %v4054_v7, 2  ;;  %v4097_v18 = vrot.slane %v4058_v13, 6  ;;  %v4331_v33 = vrot.slane %v9040_v23, 2 }
 0x1fb   :  { %v5034_v44 = vpop.eup %5033  ;;  %v4029_v58 = vmul.f32 %v5032_v63, %v3990_v45  ;;  %v4082_v46 = vsel %vm4081_vm9, %v4080_v59, %v4079_v32  ;;  %v4096_v15 = vsel %vm4075_vm7, %v4095_v10, %v4056_v53  ;;  %v3185_v3 = vmul.f32 %v8993_v1, %v8971_v2  ;;  %v9996_v63 = vld [vmem:[#allocation138_spill] sm:$0xff] }
 0x1fc   :  { %v5036_v60 = vpop.eup %5035  ;;  %v4033_v30 = vmul.f32 %v5034_v44, %v3994_v0  ;;  %v4085_v24 = vsel %vm4084_vm10, %v4083_v8, %v4082_v46  ;;  %v4098_v59 = vsel %vm4078_vm8, %v4097_v18, %v4096_v15  ;;  %v3193_v51 = vmul.f32 %v8890_v35, %v3056_v6 }
 0x1fd   :  { %v4034_v36 = vmul.f32 %v5036_v60, %v3995_v61  ;;  %v4042_v45 = vadd.f32 %v4029_v58, %v9150_v49  ;;  %v4088_v12 = vsel %vm4087_vm11, %v4086_v57, %v4085_v24  ;;  %v5141_v49 = vld [vmem:[%s9339_s3 + $0x2a0] sm:$0xff]  ;;  %v9215_v8 = vmul.f32 %v9121_v5, %v4159_v19  ;;  %v9999_v57 = vld [vmem:[#allocation103_spill] sm:$0xff]  ;;  %v10000_v58 = vld [vmem:[#allocation93_spill] sm:$0xff]  ;;  %v3060_v24 = vpop.permute.xlu1 %3059 }
 0x1fe   :  { %v4046_v26 = vadd.f32 %v4033_v30, %v9152_v22  ;;  %v2529_v61 = vmul.f32 %v5141_v49, %v8976_v56  ;;  %v3184_v22 = vmul.f32 %v8976_v56, %v9010_v31  ;;  %v4091_v2 = vsel %vm4090_vm12, %v4089_v27, %v4088_v12  ;;  %v9998_v31 = vld [vmem:[#allocation134_spill] sm:$0xff]  ;;  %v5142_v19 = vld [vmem:[%s9339_s3 + $0x2e8] sm:$0xff] }
 0x1ff   :  { %v4047_v17 = vadd.f32 %v4034_v36, %v3982_v29  ;;  %v4055_v0 = vmul.f32 %v9121_v5, %v4042_v45  ;;  %5037 = vlog2.f32 %v9996_v63  ;;  %v9997_v29 = vld [vmem:[#allocation83_spill] sm:$0xff]  ;;  %v3273_v53 = vadd.f32 %v9998_v31, %v3185_v3  ;;  %v10001_v30 = vld [vmem:[#allocation142_spill] sm:$0xff] }
 0x200   :  { %v4059_v7 = vmul.f32 %v9121_v5, %v4046_v26  ;;  %v2618_v56 = vadd.f32 %v9997_v29, %v2530_v20  ;;  %v2606_v44 = vadd.f32 %v9999_v57, %v2529_v61  ;;  %v3261_v46 = vadd.f32 %v10000_v58, %v3184_v22  ;;  %v3091_v26 = vpop.permute.xlu0 %3090  ;;  %v10005_v63 = vld [vmem:[#allocation154_spill] sm:$0xff]  ;;  %v5147_v29 = vld [vmem:[%s9339_s3 + $0x320] sm:$0xff] }
 0x201   :  { %v4060_v54 = vmul.f32 %v9121_v5, %v4047_v17  ;;  %v4092_v1 = vrot.slane %v4055_v0, 1  ;;  %v2538_v47 = vmul.f32 %v5142_v19, %v8890_v35  ;;  %v4332_v20 = vadd.f32 %v4331_v33, %v9040_v23  ;;  %v5143_v23 = vld [vmem:[%s9339_s3 + $0x2e0] sm:$0xff]  ;;  %v10002_v17 = vld [vmem:[#allocation54_spill] sm:$0xff]  ;;  %v5144_v0 = vld [vmem:[%s9339_s3 + $0x328] sm:$0xff] }
 0x202   :  { %v4099_v13 = vrot.slane %v4059_v7, 5  ;;  %5039 = vlog2.f32 %v10001_v30  ;;  %v3274_v45 = vadd.f32 %v3273_v53, %v3193_v51  ;;  %v3192_v27 = vmul.f32 %v8885_v16, %v9169_v52  ;;  %v3064_v51 = vpop.permute.xlu1 %3063  ;;  %v5148_v53 = vld [vmem:[%s9339_s3 + $0x2b8] sm:$0xff]  ;;  %v10006_v57 = vld [vmem:[#allocation60_spill] sm:$0xff] }
 0x203   :  { %v4101_v32 = vrot.slane %v4060_v54, 4  ;;  %v4094_v10 = vsel %vm4093_vm13, %v4092_v1, %v4091_v2  ;;  %v4175_v18 = vrot.slane %v9215_v8, 2  ;;  %v3187_v15 = vmul.f32 %v9015_v4, %v3029_v50  ;;  %v10003_v54 = vld [vmem:[#allocation41_spill] sm:$0xff]  ;;  %v5146_v1 = vld [vmem:[%s9339_s3 + $0x2f0] sm:$0xff]  ;;  %v10008_v30 = vld [vmem:[#allocation88_spill] sm:$0xff] }
 0x204   :  { %v4100_v60 = vsel %vm4081_vm9, %v4099_v13, %v4098_v59  ;;  %v4333_v3 = vrot.slane %v4332_v20, 1  ;;  %v3186_v35 = vmul.f32 %v9007_v25, %v9185_v28  ;;  %v2537_v33 = vmul.f32 %v5143_v23, %v8885_v16  ;;  %v5145_v16 = vld [vmem:[%s9339_s3 + $0x2b0] sm:$0xff]  ;;  %v10004_v59 = vld [vmem:[#allocation45_spill] sm:$0xff] }
 0x205   :  { %v4102_v6 = vsel %vm4084_vm10, %v4101_v32, %v4100_v60  ;;  %v9243_v52 = vadd.f32 %v9130_v41, %v9104_v55  ;;  %5041 = vlog2.f32 %v10002_v17  ;;  %v2546_v49 = vmul.f32 %v5144_v0, %v9076_v37  ;;  %v10009_v0 = vld [vmem:[#allocation57_spill] sm:$0xff] }
 0x206   :  { %v4106_v36 = vsel %vm4105_vm14, %v4102_v6, 0.0  ;;  %v2619_v28 = vadd.f32 %v2618_v56, %v2538_v47  ;;  %v3201_v61 = vmul.f32 %v9076_v37, %v3091_v26  ;;  %v2531_v22 = vmul.f32 %v5145_v16, %v9007_v25  ;;  %v3095_v6 = vpop.permute.xlu0 %3094  ;;  %v10007_v47 = vld [vmem:[#allocation107_spill] sm:$0xff] }
 0x207   :  { %v4107_v12 = vadd.f32 %v4106_v36, %v4094_v10  ;;  %v3262_v55 = vadd.f32 %v3261_v46, %v3192_v27  ;;  %v4178_v41 = vsel %vm4177_vm15, %v4175_v18, 0.0  ;;  %v9256_v7 = vadd.f32 %v4333_v3, %v4332_v20  ;;  %v5150_v36 = vld [vmem:[%s9339_s3 + $0x330] sm:$0xff] }
 0x208   :  { %v3200_v50 = vmul.f32 %v9065_v21, %v3087_v39  ;;  %v3297_v2 = vadd.f32 %v10003_v54, %v3187_v15  ;;  %v2539_v37 = vmul.f32 %v5146_v1, %v8908_v42  ;;  %v2630_v13 = vadd.f32 %v10004_v59, %v2531_v22  ;;  %v10011_v59 = vld [vmem:[#allocation141_spill] sm:$0xff] }
 0x209   :  { %4108 = vadd.xlane.f32.xlu1 %v4107_v12  ;;  %5043 = vlog2.f32 %v10005_v63  ;;  %v5038_v25 = vpop.eup %5037  ;;  %v2545_v39 = vmul.f32 %v5147_v29, %v9065_v21  ;;  %v2607_v56 = vadd.f32 %v2606_v44, %v2537_v33  ;;  %v3194_v31 = vmul.f32 %v8908_v42, %v3060_v24  ;;  %v5149_v42 = vld [vmem:[%s9339_s3 + $0x2f8] sm:$0xff]  ;;  %v3099_v33 = vpop.permute.xlu1 %3098 }
 0x20a   :  { %v2532_v32 = vmul.f32 %v5148_v53, %v9015_v4  ;;  %v3285_v58 = vadd.f32 %v10006_v57, %v3186_v35  ;;  %v2432_v46 = vmul.f32 0.6931472, %v5038_v25  ;;  %v2620_v10 = vadd.f32 %v2619_v28, %v2546_v49  ;;  %v10013_v57 = vld [vmem:[#allocation64_spill] sm:$0xff] }
 0x20b   :  { %v3275_v60 = vadd.f32 %v3274_v45, %v3201_v61  ;;  %v4347_v19 = vsel %vm4164_vm2, %v9256_v7, 0.0  ;;  %v3263_v21 = vadd.f32 %v3262_v55, %v3200_v50  ;;  %v2540_v44 = vmul.f32 %v5149_v42, %v8916_v48  ;;  %v10010_v61 = vld [vmem:[#allocation100_spill] sm:$0xff] }
 0x20c   :  { %v2642_v20 = vadd.f32 %v10007_v47, %v2532_v32  ;;  %v5040_v4 = vpop.eup %5039  ;;  %v2442_v24 = vadd.f32 %v2432_v46, %v10008_v30  ;;  %v2547_v45 = vmul.f32 %v5150_v36, %v9086_v43  ;;  %v2631_v27 = vadd.f32 %v2630_v13, %v2539_v37  ;;  %v10012_v32 = vld [vmem:[#allocation129_spill] sm:$0xff]  ;;  %v10014_v46 = vld [vmem:[#allocation126_spill] sm:$0xff] }
 0x20d   :  { %4179 = vadd.xlane.f32.xlu1 %v4178_v41  ;;  %v4236_v18 = vadd.f32 %v8935_v34, %v8980_v40  ;;  %v2430_v26 = vmul.f32 0.6931472, %v5040_v4  ;;  %v2608_v12 = vadd.f32 %v2607_v56, %v2545_v39  ;;  %v3286_v15 = vadd.f32 %v3285_v58, %v3194_v31  ;;  %v5151_v34 = vld [vmem:[%s9339_s3 + $0x338] sm:$0xff] }
 0x20e   :  { %v3202_v3 = vmul.f32 %v9086_v43, %v3095_v6  ;;  %v3305_v35 = vsub.f32 %v2442_v24, %v2620_v10  ;;  %v3195_v23 = vmul.f32 %v8916_v48, %v3064_v51  ;;  %v4237_v17 = vsel %vm4164_vm2, %v8939_v62, 0.0  ;;  %v10015_v10 = vld [vmem:[#allocation69_spill] sm:$0xff] }
 0x20f   :  { %v4430_v49 = vsub.f32 %v10009_v0, %v8866_v9  ;;  %v5042_v28 = vpop.eup %5041  ;;  %v2441_v16 = vadd.f32 %v2430_v26, %v10010_v61  ;;  %v2548_v40 = vmul.f32 %v5151_v34, %v9099_v38  ;;  %v2643_v43 = vadd.f32 %v2642_v20, %v2540_v44 }
 0x210   :  { %v4238_v22 = vadd.f32 %v4237_v17, %v4236_v18  ;;  %v3313_v55 = vmul.f32 %v3305_v35, %v3275_v60  ;;  %v2434_v48 = vmul.f32 0.6931472, %v5042_v28  ;;  %v2632_v41 = vadd.f32 %v2631_v27, %v2547_v45 }
 0x211   :  { %4348 = vadd.xlane.f32.xlu1 %v4347_v19  ;;  %v4431_v50 = vand.u32 2147483647, %v4430_v49  ;;  %v4411_v62 = vrot.slane %v8997_v14, 4  ;;  %v3304_v54 = vsub.f32 %v2441_v16, %v2608_v12  ;;  %v3203_v9 = vmul.f32 %v9099_v38, %v3099_v33  ;;  %v10016_v19 = vld [vmem:[#allocation120_spill] sm:$0xff] }
 0x212   :  { %v4239_v1 = vrot.slane %v4238_v22, 4  ;;  %v2443_v13 = vadd.f32 %v2434_v48, %v10011_v59  ;;  %v3287_v51 = vadd.f32 %v3286_v15, %v3202_v3  ;;  %v3298_v63 = vadd.f32 %v3297_v2, %v3195_v23 }
 0x213   :  { %v5044_v37 = vpop.eup %5043  ;;  %v4433_v25 = vrot.slane %v4431_v50, 6  ;;  %v3312_v29 = vmul.f32 %v3304_v54, %v3263_v21  ;;  %v2644_v56 = vadd.f32 %v2643_v43, %v2548_v40  ;;  %v4117_v58 = vadd.f32 %v10013_v57, %v10012_v32  ;;  %v10018_v40 = vld [vmem:[#allocation61_spill] sm:$0xff] }
 0x214   :  { %v2436_v39 = vmul.f32 0.6931472, %v5044_v37  ;;  %v4240_v31 = vadd.f32 %v4239_v1, %v4238_v22  ;;  %v3306_v53 = vsub.f32 %v2443_v13, %v2632_v41  ;;  %v4118_v60 = vadd.f32 %v10015_v10, %v10014_v46 }
 0x215   :  { %v4436_v38 = vsel %vm1344_vm0, %v4433_v25, 0.0  ;;  %v3319_v6 = vadd.f32 %v9243_v52, %v3312_v29  ;;  %v3299_v44 = vadd.f32 %v3298_v63, %v3203_v9  ;;  %v4412_v30 = vadd.f32 %v4411_v62, %v8997_v14 }
 0x216   :  { %v2444_v42 = vadd.f32 %v2436_v39, %v10016_v19  ;;  %v4241_v2 = vrot.slane %v4240_v31, 2  ;;  %4437 = vadd.xlane.f32.xlu1 %v4436_v38  ;;  %v3314_v21 = vmul.f32 %v3306_v53, %v3287_v51  ;;  %v10017_v24 = vrot.slane %v8932_v11, 4 }
 0x217   :  { %v3320_v20 = vadd.f32 %v3319_v6, %v3313_v55  ;;  %v4119_v18 = vadd.f32 %v4118_v60, %v4117_v58  ;;  %v4413_v15 = vrot.slane %v4412_v30, 2  ;;  %v4162_v14 = vrot.slane %v9215_v8, 1 }
 0x218   :  { %v3307_v47 = vsub.f32 %v2444_v42, %v2644_v56  ;;  %v4242_v4 = vadd.f32 %v4241_v2, %v4240_v31  ;;  %v4267_v36 = vadd.f32 %v10017_v24, %v8932_v11 }
 0x219   :  { %v3321_v27 = vadd.f32 %v3320_v20, %v3314_v21  ;;  %v4120_v35 = vmul.f32 %v9121_v5, %v4119_v18  ;;  %v4414_v23 = vadd.f32 %v4413_v15, %v4412_v30  ;;  %v4165_v11 = vsel %vm4164_vm2, %v4162_v14, 0.0 }
 0x21a   :  { %v3315_v45 = vmul.f32 %v3307_v47, %v3299_v44  ;;  %v4243_v26 = vrot.slane %v4242_v4, 1  ;;  %v4268_v3 = vrot.slane %v4267_v36, 2 }
 0x21b   :  { %v4415_v17 = vrot.slane %v4414_v23, 1 }
 0x21c   :  { %v3322_v52 = vadd.f32 %v3321_v27, %v3315_v45  ;;  %v4244_v12 = vadd.f32 %v4243_v26, %v4242_v4  ;;  %v4269_v33 = vadd.f32 %v4268_v3, %v4267_v36 }
 0x21d   :  { %v4416_v16 = vadd.f32 %v4415_v17, %v4414_v23 }
 0x21e   :  { %3323 = vadd.xlane.f32.xlu0 %v3322_v52  ;;  %5045 = vlog2.f32 %v4244_v12  ;;  %v4270_v0 = vrot.slane %v4269_v33, 1 }
 0x21f   :  { %5047 = vrcp.f32 %v4244_v12 }
 0x220   :  { %v4271_v61 = vadd.f32 %v4270_v0, %v4269_v33 }
 0x222   :  { %4121 = vadd.xlane.f32.xlu0 %v4120_v35 }
 0x226   :  { %4166 = vadd.xlane.f32.xlu0 %v4165_v11 }
 0x228   :  { %v5046_v49 = vpop.eup %5045 }
 0x229   :  { %v4246_v28 = vmul.f32 0.6931472, %v5046_v49  ;;  %v5048_v34 = vpop.eup %5047 }
 0x22a   :  { %v4418_v55 = vmul.f32 %v5048_v34, %v4416_v16 }
 0x22b   :  { %v4247_v43 = vadd.f32 %v4246_v28, %v10018_v40 }
 0x22c   :  { %v4419_v41 = vmul.f32 %v9121_v5, %v4418_v55 }
 0x22d   :  { %v4335_v22 = vsub.f32 %v4247_v43, %v4271_v61 }
 0x22e   :  { %v4420_v50 = vsel %vm4164_vm2, %v4419_v41, 0.0 }
 0x22f   :  { %v4336_v48 = vmul.f32 %v4335_v22, %v9256_v7 }
 0x231   :  { %v4337_v8 = vsel %vm4164_vm2, %v4336_v48, 0.0 }
 0x232   :  { %4338 = vadd.xlane.f32.xlu0 %v4337_v8 }
 0x236   :  { %4421 = vadd.xlane.f32.xlu0 %v4420_v50  ;;  %v10019_v50 = vld [vmem:[#allocation37_spill] sm:$0xff] }
 0x237   :  { %vm4460_vm0 = vcmp.eq.s32.totalorder %v10019_v50, 0 }
 0x296   :  { %v4109_v62 = vpop.xlane.xlu1 %4108 }
 0x297   :  { %v4110_v54 = vrot.slane %v4109_v62, 4 }
 0x299   :  { %v4111_v9 = vadd.f32 %v4110_v54, %v4109_v62  ;;  %v10020_v62 = vld [vmem:[#allocation131_spill] sm:$0xff] }
 0x29a   :  { %v4180_v1 = vpop.xlane.xlu1 %4179  ;;  %vm4465_vm1 = vcmp.eq.s32.totalorder %v10020_v62, 2  ;;  %vm4463_vm2 = vcmp.eq.s32.totalorder %v10020_v62, 1  ;;  %vm4461_vm4 = vcmp.eq.s32.totalorder %v10020_v62, 0 }
 0x29b   :  { %v4112_v37 = vrot.slane %v4111_v9, 2  ;;  %v4181_v59 = vrot.slane %v4180_v1, 4  ;;  %vm4466_vm3 = vmand %vm4460_vm0, %vm4465_vm1 }
 0x29c   :  { %vm4464_vm5 = vmand %vm4460_vm0, %vm4463_vm2 }
 0x29d   :  { %v4113_v63 = vadd.f32 %v4112_v37, %v4111_v9  ;;  %v4182_v29 = vadd.f32 %v4181_v59, %v4180_v1  ;;  %vm4462_vm6 = vmand %vm4460_vm0, %vm4461_vm4 }
 0x29e   :  { %v4349_v58 = vpop.xlane.xlu1 %4348 }
 0x29f   :  { %v4114_v31 = vrot.slane %v4113_v63, 1  ;;  %v4183_v32 = vrot.slane %v4182_v29, 2  ;;  %v4350_v44 = vrot.slane %v4349_v58, 4 }
 0x2a1   :  { %v4115_v38 = vadd.f32 %v4114_v31, %v4113_v63  ;;  %v4184_v2 = vadd.f32 %v4183_v32, %v4182_v29  ;;  %v4351_v24 = vadd.f32 %v4350_v44, %v4349_v58 }
 0x2a3   :  { %v4438_v47 = vpop.xlane.xlu1 %4437  ;;  %v4185_v45 = vrot.slane %v4184_v2, 1  ;;  %v4352_v26 = vrot.slane %v4351_v24, 2 }
 0x2a4   :  { %v4439_v36 = vrot.slane %v4438_v47, 4 }
 0x2a5   :  { %v4186_v15 = vadd.f32 %v4185_v45, %v4184_v2  ;;  %v4353_v33 = vadd.f32 %v4352_v26, %v4351_v24 }
 0x2a6   :  { %v4440_v12 = vadd.f32 %v4439_v36, %v4438_v47 }
 0x2a7   :  { %v4354_v61 = vrot.slane %v4353_v33, 1 }
 0x2a8   :  { %v4441_v23 = vrot.slane %v4440_v12, 2 }
 0x2a9   :  { %v4355_v22 = vadd.f32 %v4354_v61, %v4353_v33 }
 0x2aa   :  { %v4442_v28 = vadd.f32 %v4441_v23, %v4440_v12 }
 0x2ab   :  { %v3324_v13 = vpop.xlane.xlu0 %3323 }
 0x2ac   :  { %v3325_v51 = vrot.slane %v3324_v13, 4  ;;  %v4443_v55 = vrot.slane %v4442_v28, 1 }
 0x2ae   :  { %v3326_v25 = vadd.f32 %v3325_v51, %v3324_v13  ;;  %v4444_v41 = vadd.f32 %v4443_v55, %v4442_v28 }
 0x2af   :  { %v4122_v7 = vpop.xlane.xlu0 %4121 }
 0x2b0   :  { %v3327_v39 = vrot.slane %v3326_v25, 2  ;;  %v4123_v56 = vrot.slane %v4122_v7, 4 }
 0x2b2   :  { %v4124_v5 = vadd.f32 %v4123_v56, %v4122_v7  ;;  %v3328_v53 = vadd.f32 %v3327_v39, %v3326_v25 }
 0x2b3   :  { %v4167_v57 = vpop.xlane.xlu0 %4166 }
 0x2b4   :  { %v4125_v46 = vrot.slane %v4124_v5, 2  ;;  %v4168_v10 = vrot.slane %v4167_v57, 4  ;;  %v3329_v60 = vrot.slane %v3328_v53, 1 }
 0x2b6   :  { %v4169_v6 = vadd.f32 %v4168_v10, %v4167_v57  ;;  %v3330_v19 = vadd.f32 %v3329_v60, %v3328_v53  ;;  %v4126_v42 = vadd.f32 %v4125_v46, %v4124_v5 }
 0x2b8   :  { %v4170_v21 = vrot.slane %v4169_v6, 2  ;;  %4725 = vpush %v3330_v19  ;;  %v4127_v20 = vrot.slane %v4126_v42, 1 }
 0x2b9   :  { %4727 = vpush %v4115_v38 }
 0x2ba   :  { %v4128_v4 = vadd.f32 %v4127_v20, %v4126_v42  ;;  %v4171_v30 = vadd.f32 %v4170_v21, %v4169_v6 }
 0x2bc   :  { %4729 = vpush %v4128_v4  ;;  %v4172_v27 = vrot.slane %v4171_v30, 1 }
 0x2be   :  { %v4173_v18 = vadd.f32 %v4172_v27, %v4171_v30 }
 0x2bf   :  { %v4339_v52 = vpop.xlane.xlu0 %4338 }
 0x2c0   :  { %v4340_v3 = vrot.slane %v4339_v52, 4  ;;  %4731 = vpush %v4173_v18 }
 0x2c1   :  { %4733 = vpush %v4186_v15 }
 0x2c2   :  { %v4341_v35 = vadd.f32 %v4340_v3, %v4339_v52 }
 0x2c3   :  { %v4422_v14 = vpop.xlane.xlu0 %4421 }
 0x2c4   :  { %v4342_v17 = vrot.slane %v4341_v35, 2  ;;  %v4423_v11 = vrot.slane %v4422_v14, 4 }
 0x2c6   :  { %v4424_v0 = vadd.f32 %v4423_v11, %v4422_v14  ;;  %v4343_v49 = vadd.f32 %v4342_v17, %v4341_v35 }
 0x2c8   :  { %v4425_v16 = vrot.slane %v4424_v0, 2  ;;  %v4344_v34 = vrot.slane %v4343_v49, 1 }
 0x2ca   :  { %v4426_v40 = vadd.f32 %v4425_v16, %v4424_v0  ;;  %v4345_v43 = vadd.f32 %v4344_v34, %v4343_v49 }
 0x2cc   :  { %4735 = vpush %v4345_v43  ;;  %v4427_v48 = vrot.slane %v4426_v40, 1 }
 0x2cd   :  { %4737 = vpush %v4355_v22 }
 0x2ce   :  { %v4428_v8 = vadd.f32 %v4427_v48, %v4426_v40 }
 0x2d0   :  { %4739 = vpush %v4428_v8 }
 0x2d1   :  { %4741 = vpush %v4444_v41 }
 0x2e9   :  { %s4726_s3 = spop %4725 }
 0x2ea   :  { %s4728_s19 = spop %4727  ;;  %s3332_s20 = smul.f32 0.015625, %s4726_s3 }
 0x2eb   :  { %s4446_s0 = smul.f32 0.009615385, %s4728_s19 }
 0x2ed   :  { %s4730_s4 = spop %4729  ;;  %s4447_s7 = sadd.f32 %s4446_s0, %s3332_s20 }
 0x2ee   :  { %s4448_s2 = smul.f32 0.00390625, %s4730_s4 }
 0x2f0   :  { %s4449_s22 = sadd.f32 %s4448_s2, %s4447_s7 }
 0x2f1   :  { %s4732_s6 = spop %4731 }
 0x2f2   :  { %s4450_s21 = smul.f32 0.125, %s4732_s6  ;;  %s4734_s23 = spop %4733 }
 0x2f3   :  { %s4452_s25 = smul.f32 0.03125, %s4734_s23 }
 0x2f4   :  { %s4451_s24 = sadd.f32 %s4450_s21, %s4449_s22 }
 0x2f6   :  { %s4453_s9 = sadd.f32 %s4452_s25, %s4451_s24 }
 0x2fd   :  { %s4736_s5 = spop %4735 }
 0x2fe   :  { %s4738_s26 = spop %4737  ;;  %v4469_v9 = vstv %s4736_s5 }
 0x2ff   :  { %v4467_v54 = vstv %s4738_s26 }
 0x300   :  { %v4468_v1 = vsel %vm4466_vm3, %v4467_v54, 0.0 }
 0x301   :  { %s4740_s27 = spop %4739  ;;  %v4470_v37 = vsel %vm4464_vm5, %v4469_v9, %v4468_v1 }
 0x302   :  { %s4454_s28 = smul.f32 0.0019230769, %s4740_s27  ;;  %s4742_s29 = spop %4741 }
 0x303   :  { %s4456_s12 = smul.f32 0.0625, %s4742_s29 }
 0x304   :  { %s4455_s30 = sadd.f32 %s4454_s28, %s4453_s9 }
 0x306   :  { %s4457_s8 = sadd.f32 %s4456_s12, %s4455_s30 }
 0x308   :  { %v4471_v59 = vstv %s4457_s8 }
 0x309   :  { %v4472_v13 = vsel %vm4462_vm6, %v4471_v59, %v4470_v37 }
 0x30a   :  { %4473 = vst [vmem:[%s9347_s11] sm:$0xff] %v4472_v13 }

</bundles_post_ra>
